<compile_context>
chip_gen: v5e
topology: v5e:2x2
jax: 0.10.0
libtpu: 0.0.40
codegen_flags: <defaults>
</compile_context>

<pallas_src>
import functools

import jax
import jax.numpy as jnp
from jax import lax
from jax.experimental import pallas as pl
from jax.experimental.pallas import tpu as pltpu


# Layer schedule of the default AudioAutoencoder(num_encoder_layers=3,
# num_decoder_layers=3, kernel=4, stride=2, padding=1, no BN, no dropout).
_LAYERS = (
    ("conv", "relu"),
    ("conv", "relu"),
    ("conv", "relu"),
    ("tconv", "relu"),
    ("tconv", "relu"),
    ("tconv", "tanh"),
)
_K, _S, _P = 4, 2, 1


# ----------------------------------------------------------------------------
# Fused Pallas kernel: entire encoder + decoder in one invocation
# ----------------------------------------------------------------------------
def _fused_autoencoder_kernel(x_ref, *refs, layers, k, s, p):
    """refs = (w_0, b_0, ..., w_5, b_5, out_ref).

    w_i : (k * Cout_i, Cin_i)  tap-stacked weight (tap j in rows [j*Cout, (j+1)*Cout))
    b_i : (Cout_i, 1)
    Activations are kept per batch in (channels, length) layout; everything is
    VMEM resident for the whole forward pass.
    """
    out_ref = refs[-1]
    wb = refs[:-1]
    batch = x_ref.shape[0]

    # Static per-layer lengths (L halves in the encoder, doubles in the decoder).
    lengths = [x_ref.shape[2]]
    for kind, _ in layers:
        l_in = lengths[-1]
        if kind == "conv":
            lengths.append((l_in + 2 * p - k) // s + 1)
        else:
            lengths.append((l_in - 1) * s - 2 * p + k)

    # 0/1 phase-selection matrices, one per (layer, tap), hoisted out of the
    # batch loop.  They fold the strided gather / polyphase interleave into a
    # plain matmul:
    #   conv : sel[c, t] = 1  iff  c == s*t + j - p   (input pos feeding output t)
    #   tconv: sel[t, o] = 1  iff  o == s*t + j - p   (output pos fed by input t)
    gather = []
    for li, (kind, _) in enumerate(layers):
        l_in, l_out = lengths[li], lengths[li + 1]
        rows = lax.broadcasted_iota(jnp.int32, (l_in, l_out), 0)
        cols = lax.broadcasted_iota(jnp.int32, (l_in, l_out), 1)
        mats = []
        for j in range(k):
            if kind == "conv":
                sel = rows == s * cols + (j - p)
            else:
                sel = cols == s * rows + (j - p)
            mats.append(sel.astype(jnp.float32))
        gather.append(mats)

    for b in range(batch):
        h = x_ref[b].astype(jnp.float32)                      # (Cin, L)
        for li, (kind, act) in enumerate(layers):
            w = wb[2 * li][...]                               # (k*Cout, Cin)
            bias = wb[2 * li + 1][...]                        # (Cout, 1)
            c_out = w.shape[0] // k
            # All k taps against the input at once.
            if w.shape[1] == 1:
                taps = w * h                                  # outer product, (k*Cout, L_in)
            else:
                taps = jnp.dot(w, h, preferred_element_type=jnp.float32)
            acc = None
            for j in range(k):
                tap = taps[j * c_out:(j + 1) * c_out, :]      # (Cout, L_in)
                term = jnp.dot(tap, gather[li][j],
                               preferred_element_type=jnp.float32)  # (Cout, L_out)
                acc = term if acc is None else acc + term
            acc = acc + bias                                  # (Cout,1) broadcasts over lanes
            if act == "relu":
                h = jnp.maximum(acc, 0.0)
            elif act == "tanh":
                h = jnp.tanh(acc)
            else:
                h = acc
        out_ref[b, :, :] = h.astype(out_ref.dtype)


# ----------------------------------------------------------------------------
# Host wrappers
# ----------------------------------------------------------------------------
def pack_params(params):
    """One-time re-layout of PyTorch-style params into the kernel layout."""
    names = ("e0", "e1", "e2", "d0", "d1", "d2")
    packed = []
    for name, (kind, _) in zip(names, _LAYERS):
        w, b = params[name]
        if kind == "conv":                     # (Cout, Cin, k) -> (k, Cout, Cin)
            wk = jnp.transpose(w, (2, 0, 1))
        else:                                  # (Cin, Cout, k) -> (k, Cout, Cin)
            wk = jnp.transpose(w, (2, 1, 0))
        kk, c_out, c_in = wk.shape
        packed.append(wk.reshape(kk * c_out, c_in).astype(jnp.float32))
        packed.append(b.reshape(c_out, 1).astype(jnp.float32))
    return tuple(packed)


def audio_autoencoder_forward(x, packed):
    b, c_in, l = x.shape
    kernel = functools.partial(_fused_autoencoder_kernel,
                               layers=_LAYERS, k=_K, s=_S, p=_P)
    vmem = pl.BlockSpec(memory_space=pltpu.MemorySpace.VMEM)
    return pl.pallas_call(
        kernel,
        out_shape=jax.ShapeDtypeStruct((b, c_in, l), jnp.float32),
        in_specs=[vmem] * (1 + len(packed)),
        out_specs=vmem,
    )(x, *packed)


# ----------------------------------------------------------------------------
# Parameters (PyTorch-style init) and a pure-JAX reference for validation
# ----------------------------------------------------------------------------
def init_params(key, in_channels, hidden_channels, latent_dim, k=4):
    params = {}

    def conv_p(key, cin, cout):
        k1, k2 = jax.random.split(key)
        bound = 1.0 / jnp.sqrt(cin * k)
        w = jax.random.uniform(k1, (cout, cin, k), jnp.float32, -bound, bound)
        b = jax.random.uniform(k2, (cout,), jnp.float32, -bound, bound)
        return w, b

    def convT_p(key, cin, cout):
        k1, k2 = jax.random.split(key)
        bound = 1.0 / jnp.sqrt(cin * k)
        w = jax.random.uniform(k1, (cin, cout, k), jnp.float32, -bound, bound)
        b = jax.random.uniform(k2, (cout,), jnp.float32, -bound, bound)
        return w, b

    keys = jax.random.split(key, 6)
    params["e0"] = conv_p(keys[0], in_channels, hidden_channels)
    params["e1"] = conv_p(keys[1], hidden_channels, hidden_channels)
    params["e2"] = conv_p(keys[2], hidden_channels, latent_dim)
    params["d0"] = convT_p(keys[3], latent_dim, hidden_channels)
    params["d1"] = convT_p(keys[4], hidden_channels, hidden_channels)
    params["d2"] = convT_p(keys[5], hidden_channels, in_channels)
    return params


def _ref_act(y, act):
    if act == "relu":
        return jnp.maximum(y, 0.0)
    if act == "tanh":
        return jnp.tanh(y)
    return y


def _ref_conv1d(x, w, b, stride, padding, act):
    bsz, c_in, l = x.shape
    c_out, _, k = w.shape
    x_pad = jnp.pad(x, ((0, 0), (0, 0), (padding, padding)))
    l_out = (l + 2 * padding - k) // stride + 1
    idx = jnp.arange(l_out)[:, None] * stride + jnp.arange(k)[None, :]
    patches = x_pad[:, :, idx]                                    # (B, Cin, L_out, k)
    y = jnp.einsum("bclk,ock->bol", patches, w,
                   precision=lax.Precision.HIGHEST) + b[None, :, None]
    return _ref_act(y, act)


def _ref_conv_transpose1d(x, w, b, stride, padding, act):
    bsz, c_in, l = x.shape
    _, c_out, k = w.shape
    l_dil = (l - 1) * stride + 1
    x_dil = jnp.zeros((bsz, c_in, l_dil), x.dtype).at[:, :, ::stride].set(x)
    w_conv = jnp.transpose(w[:, :, ::-1], (1, 0, 2))              # (Cout, Cin, k)
    return _ref_conv1d(x_dil, w_conv, b, 1, k - 1 - padding, act)


def reference_forward(params, x):
    h = _ref_conv1d(x, *params["e0"], _S, _P, "relu")
    h = _ref_conv1d(h, *params["e1"], _S, _P, "relu")
    h = _ref_conv1d(h, *params["e2"], _S, _P, "relu")
    h = _ref_conv_transpose1d(h, *params["d0"], _S, _P, "relu")
    h = _ref_conv_transpose1d(h, *params["d1"], _S, _P, "relu")
    return _ref_conv_transpose1d(h, *params["d2"], _S, _P, "tanh")


# ----------------------------------------------------------------------------
if __name__ == "__main__":
    # Mono audio (in_channels=1), length 64 (divisible by 2^3 for 3 stride-2 layers).
    B, IN_CH, L = 2, 1, 64
    HIDDEN, LATENT = 32, 16

    params = init_params(jax.random.PRNGKey(42), IN_CH, HIDDEN, LATENT, k=_K)
    x = jax.random.normal(jax.random.PRNGKey(0), (B, IN_CH, L), dtype=jnp.float32)

    packed = pack_params(params)          # one-time weight re-layout (host side)
    fwd = jax.jit(audio_autoencoder_forward)
    x_recon = fwd(x, packed)
    jax.block_until_ready(x_recon)

    ref = reference_forward(params, x)

    assert x_recon.shape == (B, IN_CH, L), x_recon.shape
    assert bool(jnp.all(jnp.isfinite(x_recon)))
    assert bool(jnp.all(jnp.abs(x_recon) <= 1.0 + 1e-6))          # Tanh output range
    assert bool(jnp.allclose(x_recon, ref, atol=2e-2, rtol=0.0)), (
        float(jnp.max(jnp.abs(x_recon - ref))))
    print("KERNEL_OK")
</pallas_src>

<mosaic_0001>
module attributes {stable_mosaic.version = 11 : i64} {
  func.func @_fused_autoencoder_kernel(%arg0: memref<2x1x64xf32, #tpu.memory_space<vmem>>, %arg1: memref<128x1xf32, #tpu.memory_space<vmem>>, %arg2: memref<32x1xf32, #tpu.memory_space<vmem>>, %arg3: memref<128x32xf32, #tpu.memory_space<vmem>>, %arg4: memref<32x1xf32, #tpu.memory_space<vmem>>, %arg5: memref<64x32xf32, #tpu.memory_space<vmem>>, %arg6: memref<16x1xf32, #tpu.memory_space<vmem>>, %arg7: memref<128x16xf32, #tpu.memory_space<vmem>>, %arg8: memref<32x1xf32, #tpu.memory_space<vmem>>, %arg9: memref<128x32xf32, #tpu.memory_space<vmem>>, %arg10: memref<32x1xf32, #tpu.memory_space<vmem>>, %arg11: memref<4x32xf32, #tpu.memory_space<vmem>>, %arg12: memref<1x1xf32, #tpu.memory_space<vmem>>, %arg13: memref<2x1x64xf32, #tpu.memory_space<vmem>>) attributes {dimension_semantics = [], scalar_prefetch = 0 : i64, scratch_operands = 0 : i64, tpu.core_type = #tpu.core_type<tc>} {
    %0 = tpu.iota {dimensions = array<i32: 0>} : vector<64x32xi32>
    %1 = tpu.iota {dimensions = array<i32: 1>} : vector<64x32xi32>
    %c2_i32 = arith.constant 2 : i32
    %2 = vector.broadcast %c2_i32 : i32 to vector<64x32xi32>
    %3 = arith.muli %2, %1 : vector<64x32xi32>
    %c-1_i32 = arith.constant -1 : i32
    %4 = vector.broadcast %c-1_i32 : i32 to vector<64x32xi32>
    %5 = arith.addi %3, %4 : vector<64x32xi32>
    %6 = arith.cmpi eq, %0, %5 : vector<64x32xi32>
    %7 = arith.extui %6 : vector<64x32xi1> to vector<64x32xi32>
    %8 = arith.sitofp %7 : vector<64x32xi32> to vector<64x32xf32>
    %c2_i32_0 = arith.constant 2 : i32
    %9 = vector.broadcast %c2_i32_0 : i32 to vector<64x32xi32>
    %10 = arith.muli %9, %1 : vector<64x32xi32>
    %c0_i32 = arith.constant 0 : i32
    %11 = vector.broadcast %c0_i32 : i32 to vector<64x32xi32>
    %12 = arith.addi %10, %11 : vector<64x32xi32>
    %13 = arith.cmpi eq, %0, %12 : vector<64x32xi32>
    %14 = arith.extui %13 : vector<64x32xi1> to vector<64x32xi32>
    %15 = arith.sitofp %14 : vector<64x32xi32> to vector<64x32xf32>
    %c2_i32_1 = arith.constant 2 : i32
    %16 = vector.broadcast %c2_i32_1 : i32 to vector<64x32xi32>
    %17 = arith.muli %16, %1 : vector<64x32xi32>
    %c1_i32 = arith.constant 1 : i32
    %18 = vector.broadcast %c1_i32 : i32 to vector<64x32xi32>
    %19 = arith.addi %17, %18 : vector<64x32xi32>
    %20 = arith.cmpi eq, %0, %19 : vector<64x32xi32>
    %21 = arith.extui %20 : vector<64x32xi1> to vector<64x32xi32>
    %22 = arith.sitofp %21 : vector<64x32xi32> to vector<64x32xf32>
    %c2_i32_2 = arith.constant 2 : i32
    %23 = vector.broadcast %c2_i32_2 : i32 to vector<64x32xi32>
    %24 = arith.muli %23, %1 : vector<64x32xi32>
    %c2_i32_3 = arith.constant 2 : i32
    %25 = vector.broadcast %c2_i32_3 : i32 to vector<64x32xi32>
    %26 = arith.addi %24, %25 : vector<64x32xi32>
    %27 = arith.cmpi eq, %0, %26 : vector<64x32xi32>
    %28 = arith.extui %27 : vector<64x32xi1> to vector<64x32xi32>
    %29 = arith.sitofp %28 : vector<64x32xi32> to vector<64x32xf32>
    %30 = tpu.iota {dimensions = array<i32: 0>} : vector<32x16xi32>
    %31 = tpu.iota {dimensions = array<i32: 1>} : vector<32x16xi32>
    %c2_i32_4 = arith.constant 2 : i32
    %32 = vector.broadcast %c2_i32_4 : i32 to vector<32x16xi32>
    %33 = arith.muli %32, %31 : vector<32x16xi32>
    %c-1_i32_5 = arith.constant -1 : i32
    %34 = vector.broadcast %c-1_i32_5 : i32 to vector<32x16xi32>
    %35 = arith.addi %33, %34 : vector<32x16xi32>
    %36 = arith.cmpi eq, %30, %35 : vector<32x16xi32>
    %37 = arith.extui %36 : vector<32x16xi1> to vector<32x16xi32>
    %38 = arith.sitofp %37 : vector<32x16xi32> to vector<32x16xf32>
    %c2_i32_6 = arith.constant 2 : i32
    %39 = vector.broadcast %c2_i32_6 : i32 to vector<32x16xi32>
    %40 = arith.muli %39, %31 : vector<32x16xi32>
    %c0_i32_7 = arith.constant 0 : i32
    %41 = vector.broadcast %c0_i32_7 : i32 to vector<32x16xi32>
    %42 = arith.addi %40, %41 : vector<32x16xi32>
    %43 = arith.cmpi eq, %30, %42 : vector<32x16xi32>
    %44 = arith.extui %43 : vector<32x16xi1> to vector<32x16xi32>
    %45 = arith.sitofp %44 : vector<32x16xi32> to vector<32x16xf32>
    %c2_i32_8 = arith.constant 2 : i32
    %46 = vector.broadcast %c2_i32_8 : i32 to vector<32x16xi32>
    %47 = arith.muli %46, %31 : vector<32x16xi32>
    %c1_i32_9 = arith.constant 1 : i32
    %48 = vector.broadcast %c1_i32_9 : i32 to vector<32x16xi32>
    %49 = arith.addi %47, %48 : vector<32x16xi32>
    %50 = arith.cmpi eq, %30, %49 : vector<32x16xi32>
    %51 = arith.extui %50 : vector<32x16xi1> to vector<32x16xi32>
    %52 = arith.sitofp %51 : vector<32x16xi32> to vector<32x16xf32>
    %c2_i32_10 = arith.constant 2 : i32
    %53 = vector.broadcast %c2_i32_10 : i32 to vector<32x16xi32>
    %54 = arith.muli %53, %31 : vector<32x16xi32>
    %c2_i32_11 = arith.constant 2 : i32
    %55 = vector.broadcast %c2_i32_11 : i32 to vector<32x16xi32>
    %56 = arith.addi %54, %55 : vector<32x16xi32>
    %57 = arith.cmpi eq, %30, %56 : vector<32x16xi32>
    %58 = arith.extui %57 : vector<32x16xi1> to vector<32x16xi32>
    %59 = arith.sitofp %58 : vector<32x16xi32> to vector<32x16xf32>
    %60 = tpu.iota {dimensions = array<i32: 0>} : vector<16x8xi32>
    %61 = tpu.iota {dimensions = array<i32: 1>} : vector<16x8xi32>
    %c2_i32_12 = arith.constant 2 : i32
    %62 = vector.broadcast %c2_i32_12 : i32 to vector<16x8xi32>
    %63 = arith.muli %62, %61 : vector<16x8xi32>
    %c-1_i32_13 = arith.constant -1 : i32
    %64 = vector.broadcast %c-1_i32_13 : i32 to vector<16x8xi32>
    %65 = arith.addi %63, %64 : vector<16x8xi32>
    %66 = arith.cmpi eq, %60, %65 : vector<16x8xi32>
    %67 = arith.extui %66 : vector<16x8xi1> to vector<16x8xi32>
    %68 = arith.sitofp %67 : vector<16x8xi32> to vector<16x8xf32>
    %c2_i32_14 = arith.constant 2 : i32
    %69 = vector.broadcast %c2_i32_14 : i32 to vector<16x8xi32>
    %70 = arith.muli %69, %61 : vector<16x8xi32>
    %c0_i32_15 = arith.constant 0 : i32
    %71 = vector.broadcast %c0_i32_15 : i32 to vector<16x8xi32>
    %72 = arith.addi %70, %71 : vector<16x8xi32>
    %73 = arith.cmpi eq, %60, %72 : vector<16x8xi32>
    %74 = arith.extui %73 : vector<16x8xi1> to vector<16x8xi32>
    %75 = arith.sitofp %74 : vector<16x8xi32> to vector<16x8xf32>
    %c2_i32_16 = arith.constant 2 : i32
    %76 = vector.broadcast %c2_i32_16 : i32 to vector<16x8xi32>
    %77 = arith.muli %76, %61 : vector<16x8xi32>
    %c1_i32_17 = arith.constant 1 : i32
    %78 = vector.broadcast %c1_i32_17 : i32 to vector<16x8xi32>
    %79 = arith.addi %77, %78 : vector<16x8xi32>
    %80 = arith.cmpi eq, %60, %79 : vector<16x8xi32>
    %81 = arith.extui %80 : vector<16x8xi1> to vector<16x8xi32>
    %82 = arith.sitofp %81 : vector<16x8xi32> to vector<16x8xf32>
    %c2_i32_18 = arith.constant 2 : i32
    %83 = vector.broadcast %c2_i32_18 : i32 to vector<16x8xi32>
    %84 = arith.muli %83, %61 : vector<16x8xi32>
    %c2_i32_19 = arith.constant 2 : i32
    %85 = vector.broadcast %c2_i32_19 : i32 to vector<16x8xi32>
    %86 = arith.addi %84, %85 : vector<16x8xi32>
    %87 = arith.cmpi eq, %60, %86 : vector<16x8xi32>
    %88 = arith.extui %87 : vector<16x8xi1> to vector<16x8xi32>
    %89 = arith.sitofp %88 : vector<16x8xi32> to vector<16x8xf32>
    %90 = tpu.iota {dimensions = array<i32: 0>} : vector<8x16xi32>
    %91 = tpu.iota {dimensions = array<i32: 1>} : vector<8x16xi32>
    %c2_i32_20 = arith.constant 2 : i32
    %92 = vector.broadcast %c2_i32_20 : i32 to vector<8x16xi32>
    %93 = arith.muli %92, %90 : vector<8x16xi32>
    %c-1_i32_21 = arith.constant -1 : i32
    %94 = vector.broadcast %c-1_i32_21 : i32 to vector<8x16xi32>
    %95 = arith.addi %93, %94 : vector<8x16xi32>
    %96 = arith.cmpi eq, %91, %95 : vector<8x16xi32>
    %97 = arith.extui %96 : vector<8x16xi1> to vector<8x16xi32>
    %98 = arith.sitofp %97 : vector<8x16xi32> to vector<8x16xf32>
    %c2_i32_22 = arith.constant 2 : i32
    %99 = vector.broadcast %c2_i32_22 : i32 to vector<8x16xi32>
    %100 = arith.muli %99, %90 : vector<8x16xi32>
    %c0_i32_23 = arith.constant 0 : i32
    %101 = vector.broadcast %c0_i32_23 : i32 to vector<8x16xi32>
    %102 = arith.addi %100, %101 : vector<8x16xi32>
    %103 = arith.cmpi eq, %91, %102 : vector<8x16xi32>
    %104 = arith.extui %103 : vector<8x16xi1> to vector<8x16xi32>
    %105 = arith.sitofp %104 : vector<8x16xi32> to vector<8x16xf32>
    %c2_i32_24 = arith.constant 2 : i32
    %106 = vector.broadcast %c2_i32_24 : i32 to vector<8x16xi32>
    %107 = arith.muli %106, %90 : vector<8x16xi32>
    %c1_i32_25 = arith.constant 1 : i32
    %108 = vector.broadcast %c1_i32_25 : i32 to vector<8x16xi32>
    %109 = arith.addi %107, %108 : vector<8x16xi32>
    %110 = arith.cmpi eq, %91, %109 : vector<8x16xi32>
    %111 = arith.extui %110 : vector<8x16xi1> to vector<8x16xi32>
    %112 = arith.sitofp %111 : vector<8x16xi32> to vector<8x16xf32>
    %c2_i32_26 = arith.constant 2 : i32
    %113 = vector.broadcast %c2_i32_26 : i32 to vector<8x16xi32>
    %114 = arith.muli %113, %90 : vector<8x16xi32>
    %c2_i32_27 = arith.constant 2 : i32
    %115 = vector.broadcast %c2_i32_27 : i32 to vector<8x16xi32>
    %116 = arith.addi %114, %115 : vector<8x16xi32>
    %117 = arith.cmpi eq, %91, %116 : vector<8x16xi32>
    %118 = arith.extui %117 : vector<8x16xi1> to vector<8x16xi32>
    %119 = arith.sitofp %118 : vector<8x16xi32> to vector<8x16xf32>
    %120 = tpu.iota {dimensions = array<i32: 0>} : vector<16x32xi32>
    %121 = tpu.iota {dimensions = array<i32: 1>} : vector<16x32xi32>
    %c2_i32_28 = arith.constant 2 : i32
    %122 = vector.broadcast %c2_i32_28 : i32 to vector<16x32xi32>
    %123 = arith.muli %122, %120 : vector<16x32xi32>
    %c-1_i32_29 = arith.constant -1 : i32
    %124 = vector.broadcast %c-1_i32_29 : i32 to vector<16x32xi32>
    %125 = arith.addi %123, %124 : vector<16x32xi32>
    %126 = arith.cmpi eq, %121, %125 : vector<16x32xi32>
    %127 = arith.extui %126 : vector<16x32xi1> to vector<16x32xi32>
    %128 = arith.sitofp %127 : vector<16x32xi32> to vector<16x32xf32>
    %c2_i32_30 = arith.constant 2 : i32
    %129 = vector.broadcast %c2_i32_30 : i32 to vector<16x32xi32>
    %130 = arith.muli %129, %120 : vector<16x32xi32>
    %c0_i32_31 = arith.constant 0 : i32
    %131 = vector.broadcast %c0_i32_31 : i32 to vector<16x32xi32>
    %132 = arith.addi %130, %131 : vector<16x32xi32>
    %133 = arith.cmpi eq, %121, %132 : vector<16x32xi32>
    %134 = arith.extui %133 : vector<16x32xi1> to vector<16x32xi32>
    %135 = arith.sitofp %134 : vector<16x32xi32> to vector<16x32xf32>
    %c2_i32_32 = arith.constant 2 : i32
    %136 = vector.broadcast %c2_i32_32 : i32 to vector<16x32xi32>
    %137 = arith.muli %136, %120 : vector<16x32xi32>
    %c1_i32_33 = arith.constant 1 : i32
    %138 = vector.broadcast %c1_i32_33 : i32 to vector<16x32xi32>
    %139 = arith.addi %137, %138 : vector<16x32xi32>
    %140 = arith.cmpi eq, %121, %139 : vector<16x32xi32>
    %141 = arith.extui %140 : vector<16x32xi1> to vector<16x32xi32>
    %142 = arith.sitofp %141 : vector<16x32xi32> to vector<16x32xf32>
    %c2_i32_34 = arith.constant 2 : i32
    %143 = vector.broadcast %c2_i32_34 : i32 to vector<16x32xi32>
    %144 = arith.muli %143, %120 : vector<16x32xi32>
    %c2_i32_35 = arith.constant 2 : i32
    %145 = vector.broadcast %c2_i32_35 : i32 to vector<16x32xi32>
    %146 = arith.addi %144, %145 : vector<16x32xi32>
    %147 = arith.cmpi eq, %121, %146 : vector<16x32xi32>
    %148 = arith.extui %147 : vector<16x32xi1> to vector<16x32xi32>
    %149 = arith.sitofp %148 : vector<16x32xi32> to vector<16x32xf32>
    %150 = tpu.iota {dimensions = array<i32: 0>} : vector<32x64xi32>
    %151 = tpu.iota {dimensions = array<i32: 1>} : vector<32x64xi32>
    %c2_i32_36 = arith.constant 2 : i32
    %152 = vector.broadcast %c2_i32_36 : i32 to vector<32x64xi32>
    %153 = arith.muli %152, %150 : vector<32x64xi32>
    %c-1_i32_37 = arith.constant -1 : i32
    %154 = vector.broadcast %c-1_i32_37 : i32 to vector<32x64xi32>
    %155 = arith.addi %153, %154 : vector<32x64xi32>
    %156 = arith.cmpi eq, %151, %155 : vector<32x64xi32>
    %157 = arith.extui %156 : vector<32x64xi1> to vector<32x64xi32>
    %158 = arith.sitofp %157 : vector<32x64xi32> to vector<32x64xf32>
    %c2_i32_38 = arith.constant 2 : i32
    %159 = vector.broadcast %c2_i32_38 : i32 to vector<32x64xi32>
    %160 = arith.muli %159, %150 : vector<32x64xi32>
    %c0_i32_39 = arith.constant 0 : i32
    %161 = vector.broadcast %c0_i32_39 : i32 to vector<32x64xi32>
    %162 = arith.addi %160, %161 : vector<32x64xi32>
    %163 = arith.cmpi eq, %151, %162 : vector<32x64xi32>
    %164 = arith.extui %163 : vector<32x64xi1> to vector<32x64xi32>
    %165 = arith.sitofp %164 : vector<32x64xi32> to vector<32x64xf32>
    %c2_i32_40 = arith.constant 2 : i32
    %166 = vector.broadcast %c2_i32_40 : i32 to vector<32x64xi32>
    %167 = arith.muli %166, %150 : vector<32x64xi32>
    %c1_i32_41 = arith.constant 1 : i32
    %168 = vector.broadcast %c1_i32_41 : i32 to vector<32x64xi32>
    %169 = arith.addi %167, %168 : vector<32x64xi32>
    %170 = arith.cmpi eq, %151, %169 : vector<32x64xi32>
    %171 = arith.extui %170 : vector<32x64xi1> to vector<32x64xi32>
    %172 = arith.sitofp %171 : vector<32x64xi32> to vector<32x64xf32>
    %c2_i32_42 = arith.constant 2 : i32
    %173 = vector.broadcast %c2_i32_42 : i32 to vector<32x64xi32>
    %174 = arith.muli %173, %150 : vector<32x64xi32>
    %c2_i32_43 = arith.constant 2 : i32
    %175 = vector.broadcast %c2_i32_43 : i32 to vector<32x64xi32>
    %176 = arith.addi %174, %175 : vector<32x64xi32>
    %177 = arith.cmpi eq, %151, %176 : vector<32x64xi32>
    %178 = arith.extui %177 : vector<32x64xi1> to vector<32x64xi32>
    %179 = arith.sitofp %178 : vector<32x64xi32> to vector<32x64xf32>
    %c0 = arith.constant 0 : index
    %c0_44 = arith.constant 0 : index
    %c0_45 = arith.constant 0 : index
    %180 = vector.load %arg0[%c0, %c0_44, %c0_45] : memref<2x1x64xf32, #tpu.memory_space<vmem>>, vector<1x1x64xf32>
    %181 = vector.shape_cast %180 : vector<1x1x64xf32> to vector<1x64xf32>
    %c0_46 = arith.constant 0 : index
    %c0_47 = arith.constant 0 : index
    %182 = vector.load %arg1[%c0_46, %c0_47] : memref<128x1xf32, #tpu.memory_space<vmem>>, vector<128x1xf32>
    %c0_48 = arith.constant 0 : index
    %c0_49 = arith.constant 0 : index
    %183 = vector.load %arg2[%c0_48, %c0_49] : memref<32x1xf32, #tpu.memory_space<vmem>>, vector<32x1xf32>
    %184 = vector.broadcast %182 : vector<128x1xf32> to vector<128x64xf32>
    %185 = vector.broadcast %181 : vector<1x64xf32> to vector<128x64xf32>
    %186 = arith.mulf %184, %185 : vector<128x64xf32>
    %187 = vector.extract_strided_slice %186 {offsets = [0, 0], sizes = [32, 64], strides = [1, 1]} : vector<128x64xf32> to vector<32x64xf32>
    %cst = arith.constant dense<0.000000e+00> : vector<32x32xf32>
    %188 = tpu.matmul %187, %8, %cst {dimension_numbers = #tpu.dot_dimension_numbers<[1], [0], [0], [1], [0, 0, 1, 1], [], []>} : vector<32x64xf32>, vector<64x32xf32>, vector<32x32xf32> -> vector<32x32xf32>
    %189 = vector.extract_strided_slice %186 {offsets = [32, 0], sizes = [32, 64], strides = [1, 1]} : vector<128x64xf32> to vector<32x64xf32>
    %cst_50 = arith.constant dense<0.000000e+00> : vector<32x32xf32>
    %190 = tpu.matmul %189, %15, %cst_50 {dimension_numbers = #tpu.dot_dimension_numbers<[1], [0], [0], [1], [0, 0, 1, 1], [], []>} : vector<32x64xf32>, vector<64x32xf32>, vector<32x32xf32> -> vector<32x32xf32>
    %191 = arith.addf %188, %190 : vector<32x32xf32>
    %192 = vector.extract_strided_slice %186 {offsets = [64, 0], sizes = [32, 64], strides = [1, 1]} : vector<128x64xf32> to vector<32x64xf32>
    %cst_51 = arith.constant dense<0.000000e+00> : vector<32x32xf32>
    %193 = tpu.matmul %192, %22, %cst_51 {dimension_numbers = #tpu.dot_dimension_numbers<[1], [0], [0], [1], [0, 0, 1, 1], [], []>} : vector<32x64xf32>, vector<64x32xf32>, vector<32x32xf32> -> vector<32x32xf32>
    %194 = arith.addf %191, %193 : vector<32x32xf32>
    %195 = vector.extract_strided_slice %186 {offsets = [96, 0], sizes = [32, 64], strides = [1, 1]} : vector<128x64xf32> to vector<32x64xf32>
    %cst_52 = arith.constant dense<0.000000e+00> : vector<32x32xf32>
    %196 = tpu.matmul %195, %29, %cst_52 {dimension_numbers = #tpu.dot_dimension_numbers<[1], [0], [0], [1], [0, 0, 1, 1], [], []>} : vector<32x64xf32>, vector<64x32xf32>, vector<32x32xf32> -> vector<32x32xf32>
    %197 = arith.addf %194, %196 : vector<32x32xf32>
    %198 = vector.broadcast %183 : vector<32x1xf32> to vector<32x32xf32>
    %199 = arith.addf %197, %198 : vector<32x32xf32>
    %cst_53 = arith.constant 0.000000e+00 : f32
    %200 = vector.broadcast %cst_53 : f32 to vector<32x32xf32>
    %201 = arith.maximumf %199, %200 : vector<32x32xf32>
    %c0_54 = arith.constant 0 : index
    %c0_55 = arith.constant 0 : index
    %202 = vector.load %arg3[%c0_54, %c0_55] : memref<128x32xf32, #tpu.memory_space<vmem>>, vector<128x32xf32>
    %c0_56 = arith.constant 0 : index
    %c0_57 = arith.constant 0 : index
    %203 = vector.load %arg4[%c0_56, %c0_57] : memref<32x1xf32, #tpu.memory_space<vmem>>, vector<32x1xf32>
    %cst_58 = arith.constant dense<0.000000e+00> : vector<128x32xf32>
    %204 = tpu.matmul %202, %201, %cst_58 {dimension_numbers = #tpu.dot_dimension_numbers<[1], [0], [0], [1], [0, 0, 1, 1], [], []>} : vector<128x32xf32>, vector<32x32xf32>, vector<128x32xf32> -> vector<128x32xf32>
    %205 = vector.extract_strided_slice %204 {offsets = [0, 0], sizes = [32, 32], strides = [1, 1]} : vector<128x32xf32> to vector<32x32xf32>
    %cst_59 = arith.constant dense<0.000000e+00> : vector<32x16xf32>
    %206 = tpu.matmul %205, %38, %cst_59 {dimension_numbers = #tpu.dot_dimension_numbers<[1], [0], [0], [1], [0, 0, 1, 1], [], []>} : vector<32x32xf32>, vector<32x16xf32>, vector<32x16xf32> -> vector<32x16xf32>
    %207 = vector.extract_strided_slice %204 {offsets = [32, 0], sizes = [32, 32], strides = [1, 1]} : vector<128x32xf32> to vector<32x32xf32>
    %cst_60 = arith.constant dense<0.000000e+00> : vector<32x16xf32>
    %208 = tpu.matmul %207, %45, %cst_60 {dimension_numbers = #tpu.dot_dimension_numbers<[1], [0], [0], [1], [0, 0, 1, 1], [], []>} : vector<32x32xf32>, vector<32x16xf32>, vector<32x16xf32> -> vector<32x16xf32>
    %209 = arith.addf %206, %208 : vector<32x16xf32>
    %210 = vector.extract_strided_slice %204 {offsets = [64, 0], sizes = [32, 32], strides = [1, 1]} : vector<128x32xf32> to vector<32x32xf32>
    %cst_61 = arith.constant dense<0.000000e+00> : vector<32x16xf32>
    %211 = tpu.matmul %210, %52, %cst_61 {dimension_numbers = #tpu.dot_dimension_numbers<[1], [0], [0], [1], [0, 0, 1, 1], [], []>} : vector<32x32xf32>, vector<32x16xf32>, vector<32x16xf32> -> vector<32x16xf32>
    %212 = arith.addf %209, %211 : vector<32x16xf32>
    %213 = vector.extract_strided_slice %204 {offsets = [96, 0], sizes = [32, 32], strides = [1, 1]} : vector<128x32xf32> to vector<32x32xf32>
    %cst_62 = arith.constant dense<0.000000e+00> : vector<32x16xf32>
    %214 = tpu.matmul %213, %59, %cst_62 {dimension_numbers = #tpu.dot_dimension_numbers<[1], [0], [0], [1], [0, 0, 1, 1], [], []>} : vector<32x32xf32>, vector<32x16xf32>, vector<32x16xf32> -> vector<32x16xf32>
    %215 = arith.addf %212, %214 : vector<32x16xf32>
    %216 = vector.broadcast %203 : vector<32x1xf32> to vector<32x16xf32>
    %217 = arith.addf %215, %216 : vector<32x16xf32>
    %cst_63 = arith.constant 0.000000e+00 : f32
    %218 = vector.broadcast %cst_63 : f32 to vector<32x16xf32>
    %219 = arith.maximumf %217, %218 : vector<32x16xf32>
    %c0_64 = arith.constant 0 : index
    %c0_65 = arith.constant 0 : index
    %220 = vector.load %arg5[%c0_64, %c0_65] : memref<64x32xf32, #tpu.memory_space<vmem>>, vector<64x32xf32>
    %c0_66 = arith.constant 0 : index
    %c0_67 = arith.constant 0 : index
    %221 = vector.load %arg6[%c0_66, %c0_67] : memref<16x1xf32, #tpu.memory_space<vmem>>, vector<16x1xf32>
    %cst_68 = arith.constant dense<0.000000e+00> : vector<64x16xf32>
    %222 = tpu.matmul %220, %219, %cst_68 {dimension_numbers = #tpu.dot_dimension_numbers<[1], [0], [0], [1], [0, 0, 1, 1], [], []>} : vector<64x32xf32>, vector<32x16xf32>, vector<64x16xf32> -> vector<64x16xf32>
    %223 = vector.extract_strided_slice %222 {offsets = [0, 0], sizes = [16, 16], strides = [1, 1]} : vector<64x16xf32> to vector<16x16xf32>
    %cst_69 = arith.constant dense<0.000000e+00> : vector<16x8xf32>
    %224 = tpu.matmul %223, %68, %cst_69 {dimension_numbers = #tpu.dot_dimension_numbers<[1], [0], [0], [1], [0, 0, 1, 1], [], []>} : vector<16x16xf32>, vector<16x8xf32>, vector<16x8xf32> -> vector<16x8xf32>
    %225 = vector.extract_strided_slice %222 {offsets = [16, 0], sizes = [16, 16], strides = [1, 1]} : vector<64x16xf32> to vector<16x16xf32>
    %cst_70 = arith.constant dense<0.000000e+00> : vector<16x8xf32>
    %226 = tpu.matmul %225, %75, %cst_70 {dimension_numbers = #tpu.dot_dimension_numbers<[1], [0], [0], [1], [0, 0, 1, 1], [], []>} : vector<16x16xf32>, vector<16x8xf32>, vector<16x8xf32> -> vector<16x8xf32>
    %227 = arith.addf %224, %226 : vector<16x8xf32>
    %228 = vector.extract_strided_slice %222 {offsets = [32, 0], sizes = [16, 16], strides = [1, 1]} : vector<64x16xf32> to vector<16x16xf32>
    %cst_71 = arith.constant dense<0.000000e+00> : vector<16x8xf32>
    %229 = tpu.matmul %228, %82, %cst_71 {dimension_numbers = #tpu.dot_dimension_numbers<[1], [0], [0], [1], [0, 0, 1, 1], [], []>} : vector<16x16xf32>, vector<16x8xf32>, vector<16x8xf32> -> vector<16x8xf32>
    %230 = arith.addf %227, %229 : vector<16x8xf32>
    %231 = vector.extract_strided_slice %222 {offsets = [48, 0], sizes = [16, 16], strides = [1, 1]} : vector<64x16xf32> to vector<16x16xf32>
    %cst_72 = arith.constant dense<0.000000e+00> : vector<16x8xf32>
    %232 = tpu.matmul %231, %89, %cst_72 {dimension_numbers = #tpu.dot_dimension_numbers<[1], [0], [0], [1], [0, 0, 1, 1], [], []>} : vector<16x16xf32>, vector<16x8xf32>, vector<16x8xf32> -> vector<16x8xf32>
    %233 = arith.addf %230, %232 : vector<16x8xf32>
    %234 = vector.broadcast %221 : vector<16x1xf32> to vector<16x8xf32>
    %235 = arith.addf %233, %234 : vector<16x8xf32>
    %cst_73 = arith.constant 0.000000e+00 : f32
    %236 = vector.broadcast %cst_73 : f32 to vector<16x8xf32>
    %237 = arith.maximumf %235, %236 : vector<16x8xf32>
    %c0_74 = arith.constant 0 : index
    %c0_75 = arith.constant 0 : index
    %238 = vector.load %arg7[%c0_74, %c0_75] : memref<128x16xf32, #tpu.memory_space<vmem>>, vector<128x16xf32>
    %c0_76 = arith.constant 0 : index
    %c0_77 = arith.constant 0 : index
    %239 = vector.load %arg8[%c0_76, %c0_77] : memref<32x1xf32, #tpu.memory_space<vmem>>, vector<32x1xf32>
    %cst_78 = arith.constant dense<0.000000e+00> : vector<128x8xf32>
    %240 = tpu.matmul %238, %237, %cst_78 {dimension_numbers = #tpu.dot_dimension_numbers<[1], [0], [0], [1], [0, 0, 1, 1], [], []>} : vector<128x16xf32>, vector<16x8xf32>, vector<128x8xf32> -> vector<128x8xf32>
    %241 = vector.extract_strided_slice %240 {offsets = [0, 0], sizes = [32, 8], strides = [1, 1]} : vector<128x8xf32> to vector<32x8xf32>
    %cst_79 = arith.constant dense<0.000000e+00> : vector<32x16xf32>
    %242 = tpu.matmul %241, %98, %cst_79 {dimension_numbers = #tpu.dot_dimension_numbers<[1], [0], [0], [1], [0, 0, 1, 1], [], []>} : vector<32x8xf32>, vector<8x16xf32>, vector<32x16xf32> -> vector<32x16xf32>
    %243 = vector.extract_strided_slice %240 {offsets = [32, 0], sizes = [32, 8], strides = [1, 1]} : vector<128x8xf32> to vector<32x8xf32>
    %cst_80 = arith.constant dense<0.000000e+00> : vector<32x16xf32>
    %244 = tpu.matmul %243, %105, %cst_80 {dimension_numbers = #tpu.dot_dimension_numbers<[1], [0], [0], [1], [0, 0, 1, 1], [], []>} : vector<32x8xf32>, vector<8x16xf32>, vector<32x16xf32> -> vector<32x16xf32>
    %245 = arith.addf %242, %244 : vector<32x16xf32>
    %246 = vector.extract_strided_slice %240 {offsets = [64, 0], sizes = [32, 8], strides = [1, 1]} : vector<128x8xf32> to vector<32x8xf32>
    %cst_81 = arith.constant dense<0.000000e+00> : vector<32x16xf32>
    %247 = tpu.matmul %246, %112, %cst_81 {dimension_numbers = #tpu.dot_dimension_numbers<[1], [0], [0], [1], [0, 0, 1, 1], [], []>} : vector<32x8xf32>, vector<8x16xf32>, vector<32x16xf32> -> vector<32x16xf32>
    %248 = arith.addf %245, %247 : vector<32x16xf32>
    %249 = vector.extract_strided_slice %240 {offsets = [96, 0], sizes = [32, 8], strides = [1, 1]} : vector<128x8xf32> to vector<32x8xf32>
    %cst_82 = arith.constant dense<0.000000e+00> : vector<32x16xf32>
    %250 = tpu.matmul %249, %119, %cst_82 {dimension_numbers = #tpu.dot_dimension_numbers<[1], [0], [0], [1], [0, 0, 1, 1], [], []>} : vector<32x8xf32>, vector<8x16xf32>, vector<32x16xf32> -> vector<32x16xf32>
    %251 = arith.addf %248, %250 : vector<32x16xf32>
    %252 = vector.broadcast %239 : vector<32x1xf32> to vector<32x16xf32>
    %253 = arith.addf %251, %252 : vector<32x16xf32>
    %cst_83 = arith.constant 0.000000e+00 : f32
    %254 = vector.broadcast %cst_83 : f32 to vector<32x16xf32>
    %255 = arith.maximumf %253, %254 : vector<32x16xf32>
    %c0_84 = arith.constant 0 : index
    %c0_85 = arith.constant 0 : index
    %256 = vector.load %arg9[%c0_84, %c0_85] : memref<128x32xf32, #tpu.memory_space<vmem>>, vector<128x32xf32>
    %c0_86 = arith.constant 0 : index
    %c0_87 = arith.constant 0 : index
    %257 = vector.load %arg10[%c0_86, %c0_87] : memref<32x1xf32, #tpu.memory_space<vmem>>, vector<32x1xf32>
    %cst_88 = arith.constant dense<0.000000e+00> : vector<128x16xf32>
    %258 = tpu.matmul %256, %255, %cst_88 {dimension_numbers = #tpu.dot_dimension_numbers<[1], [0], [0], [1], [0, 0, 1, 1], [], []>} : vector<128x32xf32>, vector<32x16xf32>, vector<128x16xf32> -> vector<128x16xf32>
    %259 = vector.extract_strided_slice %258 {offsets = [0, 0], sizes = [32, 16], strides = [1, 1]} : vector<128x16xf32> to vector<32x16xf32>
    %cst_89 = arith.constant dense<0.000000e+00> : vector<32x32xf32>
    %260 = tpu.matmul %259, %128, %cst_89 {dimension_numbers = #tpu.dot_dimension_numbers<[1], [0], [0], [1], [0, 0, 1, 1], [], []>} : vector<32x16xf32>, vector<16x32xf32>, vector<32x32xf32> -> vector<32x32xf32>
    %261 = vector.extract_strided_slice %258 {offsets = [32, 0], sizes = [32, 16], strides = [1, 1]} : vector<128x16xf32> to vector<32x16xf32>
    %cst_90 = arith.constant dense<0.000000e+00> : vector<32x32xf32>
    %262 = tpu.matmul %261, %135, %cst_90 {dimension_numbers = #tpu.dot_dimension_numbers<[1], [0], [0], [1], [0, 0, 1, 1], [], []>} : vector<32x16xf32>, vector<16x32xf32>, vector<32x32xf32> -> vector<32x32xf32>
    %263 = arith.addf %260, %262 : vector<32x32xf32>
    %264 = vector.extract_strided_slice %258 {offsets = [64, 0], sizes = [32, 16], strides = [1, 1]} : vector<128x16xf32> to vector<32x16xf32>
    %cst_91 = arith.constant dense<0.000000e+00> : vector<32x32xf32>
    %265 = tpu.matmul %264, %142, %cst_91 {dimension_numbers = #tpu.dot_dimension_numbers<[1], [0], [0], [1], [0, 0, 1, 1], [], []>} : vector<32x16xf32>, vector<16x32xf32>, vector<32x32xf32> -> vector<32x32xf32>
    %266 = arith.addf %263, %265 : vector<32x32xf32>
    %267 = vector.extract_strided_slice %258 {offsets = [96, 0], sizes = [32, 16], strides = [1, 1]} : vector<128x16xf32> to vector<32x16xf32>
    %cst_92 = arith.constant dense<0.000000e+00> : vector<32x32xf32>
    %268 = tpu.matmul %267, %149, %cst_92 {dimension_numbers = #tpu.dot_dimension_numbers<[1], [0], [0], [1], [0, 0, 1, 1], [], []>} : vector<32x16xf32>, vector<16x32xf32>, vector<32x32xf32> -> vector<32x32xf32>
    %269 = arith.addf %266, %268 : vector<32x32xf32>
    %270 = vector.broadcast %257 : vector<32x1xf32> to vector<32x32xf32>
    %271 = arith.addf %269, %270 : vector<32x32xf32>
    %cst_93 = arith.constant 0.000000e+00 : f32
    %272 = vector.broadcast %cst_93 : f32 to vector<32x32xf32>
    %273 = arith.maximumf %271, %272 : vector<32x32xf32>
    %c0_94 = arith.constant 0 : index
    %c0_95 = arith.constant 0 : index
    %274 = vector.load %arg11[%c0_94, %c0_95] : memref<4x32xf32, #tpu.memory_space<vmem>>, vector<4x32xf32>
    %c0_96 = arith.constant 0 : index
    %c0_97 = arith.constant 0 : index
    %275 = vector.load %arg12[%c0_96, %c0_97] : memref<1x1xf32, #tpu.memory_space<vmem>>, vector<1x1xf32>
    %cst_98 = arith.constant dense<0.000000e+00> : vector<4x32xf32>
    %276 = tpu.matmul %274, %273, %cst_98 {dimension_numbers = #tpu.dot_dimension_numbers<[1], [0], [0], [1], [0, 0, 1, 1], [], []>} : vector<4x32xf32>, vector<32x32xf32>, vector<4x32xf32> -> vector<4x32xf32>
    %277 = vector.extract_strided_slice %276 {offsets = [0, 0], sizes = [1, 32], strides = [1, 1]} : vector<4x32xf32> to vector<1x32xf32>
    %cst_99 = arith.constant dense<0.000000e+00> : vector<1x64xf32>
    %278 = tpu.matmul %277, %158, %cst_99 {dimension_numbers = #tpu.dot_dimension_numbers<[1], [0], [0], [1], [0, 0, 1, 1], [], []>} : vector<1x32xf32>, vector<32x64xf32>, vector<1x64xf32> -> vector<1x64xf32>
    %279 = vector.extract_strided_slice %276 {offsets = [1, 0], sizes = [1, 32], strides = [1, 1]} : vector<4x32xf32> to vector<1x32xf32>
    %cst_100 = arith.constant dense<0.000000e+00> : vector<1x64xf32>
    %280 = tpu.matmul %279, %165, %cst_100 {dimension_numbers = #tpu.dot_dimension_numbers<[1], [0], [0], [1], [0, 0, 1, 1], [], []>} : vector<1x32xf32>, vector<32x64xf32>, vector<1x64xf32> -> vector<1x64xf32>
    %281 = arith.addf %278, %280 : vector<1x64xf32>
    %282 = vector.extract_strided_slice %276 {offsets = [2, 0], sizes = [1, 32], strides = [1, 1]} : vector<4x32xf32> to vector<1x32xf32>
    %cst_101 = arith.constant dense<0.000000e+00> : vector<1x64xf32>
    %283 = tpu.matmul %282, %172, %cst_101 {dimension_numbers = #tpu.dot_dimension_numbers<[1], [0], [0], [1], [0, 0, 1, 1], [], []>} : vector<1x32xf32>, vector<32x64xf32>, vector<1x64xf32> -> vector<1x64xf32>
    %284 = arith.addf %281, %283 : vector<1x64xf32>
    %285 = vector.extract_strided_slice %276 {offsets = [3, 0], sizes = [1, 32], strides = [1, 1]} : vector<4x32xf32> to vector<1x32xf32>
    %cst_102 = arith.constant dense<0.000000e+00> : vector<1x64xf32>
    %286 = tpu.matmul %285, %179, %cst_102 {dimension_numbers = #tpu.dot_dimension_numbers<[1], [0], [0], [1], [0, 0, 1, 1], [], []>} : vector<1x32xf32>, vector<32x64xf32>, vector<1x64xf32> -> vector<1x64xf32>
    %287 = arith.addf %284, %286 : vector<1x64xf32>
    %288 = vector.broadcast %275 : vector<1x1xf32> to vector<1x64xf32>
    %289 = arith.addf %287, %288 : vector<1x64xf32>
    %290 = math.tanh %289 : vector<1x64xf32>
    %c0_103 = arith.constant 0 : index
    %c0_104 = arith.constant 0 : index
    %c0_105 = arith.constant 0 : index
    %291 = vector.load %arg13[%c0_103, %c0_104, %c0_105] : memref<2x1x64xf32, #tpu.memory_space<vmem>>, vector<1x1x64xf32>
    %292 = vector.shape_cast %291 : vector<1x1x64xf32> to vector<1x64xf32>
    %293 = vector.shape_cast %290 : vector<1x64xf32> to vector<1x1x64xf32>
    tpu.vector_store %arg13[%c0_103, %c0_104, %c0_105], %293 {strides = array<i32>} : memref<2x1x64xf32, #tpu.memory_space<vmem>>, vector<1x1x64xf32>,
    %c1 = arith.constant 1 : index
    %c0_106 = arith.constant 0 : index
    %c0_107 = arith.constant 0 : index
    %294 = vector.load %arg0[%c1, %c0_106, %c0_107] : memref<2x1x64xf32, #tpu.memory_space<vmem>>, vector<1x1x64xf32>
    %295 = vector.shape_cast %294 : vector<1x1x64xf32> to vector<1x64xf32>
    %c0_108 = arith.constant 0 : index
    %c0_109 = arith.constant 0 : index
    %296 = vector.load %arg1[%c0_108, %c0_109] : memref<128x1xf32, #tpu.memory_space<vmem>>, vector<128x1xf32>
    %c0_110 = arith.constant 0 : index
    %c0_111 = arith.constant 0 : index
    %297 = vector.load %arg2[%c0_110, %c0_111] : memref<32x1xf32, #tpu.memory_space<vmem>>, vector<32x1xf32>
    %298 = vector.broadcast %296 : vector<128x1xf32> to vector<128x64xf32>
    %299 = vector.broadcast %295 : vector<1x64xf32> to vector<128x64xf32>
    %300 = arith.mulf %298, %299 : vector<128x64xf32>
    %301 = vector.extract_strided_slice %300 {offsets = [0, 0], sizes = [32, 64], strides = [1, 1]} : vector<128x64xf32> to vector<32x64xf32>
    %cst_112 = arith.constant dense<0.000000e+00> : vector<32x32xf32>
    %302 = tpu.matmul %301, %8, %cst_112 {dimension_numbers = #tpu.dot_dimension_numbers<[1], [0], [0], [1], [0, 0, 1, 1], [], []>} : vector<32x64xf32>, vector<64x32xf32>, vector<32x32xf32> -> vector<32x32xf32>
    %303 = vector.extract_strided_slice %300 {offsets = [32, 0], sizes = [32, 64], strides = [1, 1]} : vector<128x64xf32> to vector<32x64xf32>
    %cst_113 = arith.constant dense<0.000000e+00> : vector<32x32xf32>
    %304 = tpu.matmul %303, %15, %cst_113 {dimension_numbers = #tpu.dot_dimension_numbers<[1], [0], [0], [1], [0, 0, 1, 1], [], []>} : vector<32x64xf32>, vector<64x32xf32>, vector<32x32xf32> -> vector<32x32xf32>
    %305 = arith.addf %302, %304 : vector<32x32xf32>
    %306 = vector.extract_strided_slice %300 {offsets = [64, 0], sizes = [32, 64], strides = [1, 1]} : vector<128x64xf32> to vector<32x64xf32>
    %cst_114 = arith.constant dense<0.000000e+00> : vector<32x32xf32>
    %307 = tpu.matmul %306, %22, %cst_114 {dimension_numbers = #tpu.dot_dimension_numbers<[1], [0], [0], [1], [0, 0, 1, 1], [], []>} : vector<32x64xf32>, vector<64x32xf32>, vector<32x32xf32> -> vector<32x32xf32>
    %308 = arith.addf %305, %307 : vector<32x32xf32>
    %309 = vector.extract_strided_slice %300 {offsets = [96, 0], sizes = [32, 64], strides = [1, 1]} : vector<128x64xf32> to vector<32x64xf32>
    %cst_115 = arith.constant dense<0.000000e+00> : vector<32x32xf32>
    %310 = tpu.matmul %309, %29, %cst_115 {dimension_numbers = #tpu.dot_dimension_numbers<[1], [0], [0], [1], [0, 0, 1, 1], [], []>} : vector<32x64xf32>, vector<64x32xf32>, vector<32x32xf32> -> vector<32x32xf32>
    %311 = arith.addf %308, %310 : vector<32x32xf32>
    %312 = vector.broadcast %297 : vector<32x1xf32> to vector<32x32xf32>
    %313 = arith.addf %311, %312 : vector<32x32xf32>
    %cst_116 = arith.constant 0.000000e+00 : f32
    %314 = vector.broadcast %cst_116 : f32 to vector<32x32xf32>
    %315 = arith.maximumf %313, %314 : vector<32x32xf32>
    %c0_117 = arith.constant 0 : index
    %c0_118 = arith.constant 0 : index
    %316 = vector.load %arg3[%c0_117, %c0_118] : memref<128x32xf32, #tpu.memory_space<vmem>>, vector<128x32xf32>
    %c0_119 = arith.constant 0 : index
    %c0_120 = arith.constant 0 : index
    %317 = vector.load %arg4[%c0_119, %c0_120] : memref<32x1xf32, #tpu.memory_space<vmem>>, vector<32x1xf32>
    %cst_121 = arith.constant dense<0.000000e+00> : vector<128x32xf32>
    %318 = tpu.matmul %316, %315, %cst_121 {dimension_numbers = #tpu.dot_dimension_numbers<[1], [0], [0], [1], [0, 0, 1, 1], [], []>} : vector<128x32xf32>, vector<32x32xf32>, vector<128x32xf32> -> vector<128x32xf32>
    %319 = vector.extract_strided_slice %318 {offsets = [0, 0], sizes = [32, 32], strides = [1, 1]} : vector<128x32xf32> to vector<32x32xf32>
    %cst_122 = arith.constant dense<0.000000e+00> : vector<32x16xf32>
    %320 = tpu.matmul %319, %38, %cst_122 {dimension_numbers = #tpu.dot_dimension_numbers<[1], [0], [0], [1], [0, 0, 1, 1], [], []>} : vector<32x32xf32>, vector<32x16xf32>, vector<32x16xf32> -> vector<32x16xf32>
    %321 = vector.extract_strided_slice %318 {offsets = [32, 0], sizes = [32, 32], strides = [1, 1]} : vector<128x32xf32> to vector<32x32xf32>
    %cst_123 = arith.constant dense<0.000000e+00> : vector<32x16xf32>
    %322 = tpu.matmul %321, %45, %cst_123 {dimension_numbers = #tpu.dot_dimension_numbers<[1], [0], [0], [1], [0, 0, 1, 1], [], []>} : vector<32x32xf32>, vector<32x16xf32>, vector<32x16xf32> -> vector<32x16xf32>
    %323 = arith.addf %320, %322 : vector<32x16xf32>
    %324 = vector.extract_strided_slice %318 {offsets = [64, 0], sizes = [32, 32], strides = [1, 1]} : vector<128x32xf32> to vector<32x32xf32>
    %cst_124 = arith.constant dense<0.000000e+00> : vector<32x16xf32>
    %325 = tpu.matmul %324, %52, %cst_124 {dimension_numbers = #tpu.dot_dimension_numbers<[1], [0], [0], [1], [0, 0, 1, 1], [], []>} : vector<32x32xf32>, vector<32x16xf32>, vector<32x16xf32> -> vector<32x16xf32>
    %326 = arith.addf %323, %325 : vector<32x16xf32>
    %327 = vector.extract_strided_slice %318 {offsets = [96, 0], sizes = [32, 32], strides = [1, 1]} : vector<128x32xf32> to vector<32x32xf32>
    %cst_125 = arith.constant dense<0.000000e+00> : vector<32x16xf32>
    %328 = tpu.matmul %327, %59, %cst_125 {dimension_numbers = #tpu.dot_dimension_numbers<[1], [0], [0], [1], [0, 0, 1, 1], [], []>} : vector<32x32xf32>, vector<32x16xf32>, vector<32x16xf32> -> vector<32x16xf32>
    %329 = arith.addf %326, %328 : vector<32x16xf32>
    %330 = vector.broadcast %317 : vector<32x1xf32> to vector<32x16xf32>
    %331 = arith.addf %329, %330 : vector<32x16xf32>
    %cst_126 = arith.constant 0.000000e+00 : f32
    %332 = vector.broadcast %cst_126 : f32 to vector<32x16xf32>
    %333 = arith.maximumf %331, %332 : vector<32x16xf32>
    %c0_127 = arith.constant 0 : index
    %c0_128 = arith.constant 0 : index
    %334 = vector.load %arg5[%c0_127, %c0_128] : memref<64x32xf32, #tpu.memory_space<vmem>>, vector<64x32xf32>
    %c0_129 = arith.constant 0 : index
    %c0_130 = arith.constant 0 : index
    %335 = vector.load %arg6[%c0_129, %c0_130] : memref<16x1xf32, #tpu.memory_space<vmem>>, vector<16x1xf32>
    %cst_131 = arith.constant dense<0.000000e+00> : vector<64x16xf32>
    %336 = tpu.matmul %334, %333, %cst_131 {dimension_numbers = #tpu.dot_dimension_numbers<[1], [0], [0], [1], [0, 0, 1, 1], [], []>} : vector<64x32xf32>, vector<32x16xf32>, vector<64x16xf32> -> vector<64x16xf32>
    %337 = vector.extract_strided_slice %336 {offsets = [0, 0], sizes = [16, 16], strides = [1, 1]} : vector<64x16xf32> to vector<16x16xf32>
    %cst_132 = arith.constant dense<0.000000e+00> : vector<16x8xf32>
    %338 = tpu.matmul %337, %68, %cst_132 {dimension_numbers = #tpu.dot_dimension_numbers<[1], [0], [0], [1], [0, 0, 1, 1], [], []>} : vector<16x16xf32>, vector<16x8xf32>, vector<16x8xf32> -> vector<16x8xf32>
    %339 = vector.extract_strided_slice %336 {offsets = [16, 0], sizes = [16, 16], strides = [1, 1]} : vector<64x16xf32> to vector<16x16xf32>
    %cst_133 = arith.constant dense<0.000000e+00> : vector<16x8xf32>
    %340 = tpu.matmul %339, %75, %cst_133 {dimension_numbers = #tpu.dot_dimension_numbers<[1], [0], [0], [1], [0, 0, 1, 1], [], []>} : vector<16x16xf32>, vector<16x8xf32>, vector<16x8xf32> -> vector<16x8xf32>
    %341 = arith.addf %338, %340 : vector<16x8xf32>
    %342 = vector.extract_strided_slice %336 {offsets = [32, 0], sizes = [16, 16], strides = [1, 1]} : vector<64x16xf32> to vector<16x16xf32>
    %cst_134 = arith.constant dense<0.000000e+00> : vector<16x8xf32>
    %343 = tpu.matmul %342, %82, %cst_134 {dimension_numbers = #tpu.dot_dimension_numbers<[1], [0], [0], [1], [0, 0, 1, 1], [], []>} : vector<16x16xf32>, vector<16x8xf32>, vector<16x8xf32> -> vector<16x8xf32>
    %344 = arith.addf %341, %343 : vector<16x8xf32>
    %345 = vector.extract_strided_slice %336 {offsets = [48, 0], sizes = [16, 16], strides = [1, 1]} : vector<64x16xf32> to vector<16x16xf32>
    %cst_135 = arith.constant dense<0.000000e+00> : vector<16x8xf32>
    %346 = tpu.matmul %345, %89, %cst_135 {dimension_numbers = #tpu.dot_dimension_numbers<[1], [0], [0], [1], [0, 0, 1, 1], [], []>} : vector<16x16xf32>, vector<16x8xf32>, vector<16x8xf32> -> vector<16x8xf32>
    %347 = arith.addf %344, %346 : vector<16x8xf32>
    %348 = vector.broadcast %335 : vector<16x1xf32> to vector<16x8xf32>
    %349 = arith.addf %347, %348 : vector<16x8xf32>
    %cst_136 = arith.constant 0.000000e+00 : f32
    %350 = vector.broadcast %cst_136 : f32 to vector<16x8xf32>
    %351 = arith.maximumf %349, %350 : vector<16x8xf32>
    %c0_137 = arith.constant 0 : index
    %c0_138 = arith.constant 0 : index
    %352 = vector.load %arg7[%c0_137, %c0_138] : memref<128x16xf32, #tpu.memory_space<vmem>>, vector<128x16xf32>
    %c0_139 = arith.constant 0 : index
    %c0_140 = arith.constant 0 : index
    %353 = vector.load %arg8[%c0_139, %c0_140] : memref<32x1xf32, #tpu.memory_space<vmem>>, vector<32x1xf32>
    %cst_141 = arith.constant dense<0.000000e+00> : vector<128x8xf32>
    %354 = tpu.matmul %352, %351, %cst_141 {dimension_numbers = #tpu.dot_dimension_numbers<[1], [0], [0], [1], [0, 0, 1, 1], [], []>} : vector<128x16xf32>, vector<16x8xf32>, vector<128x8xf32> -> vector<128x8xf32>
    %355 = vector.extract_strided_slice %354 {offsets = [0, 0], sizes = [32, 8], strides = [1, 1]} : vector<128x8xf32> to vector<32x8xf32>
    %cst_142 = arith.constant dense<0.000000e+00> : vector<32x16xf32>
    %356 = tpu.matmul %355, %98, %cst_142 {dimension_numbers = #tpu.dot_dimension_numbers<[1], [0], [0], [1], [0, 0, 1, 1], [], []>} : vector<32x8xf32>, vector<8x16xf32>, vector<32x16xf32> -> vector<32x16xf32>
    %357 = vector.extract_strided_slice %354 {offsets = [32, 0], sizes = [32, 8], strides = [1, 1]} : vector<128x8xf32> to vector<32x8xf32>
    %cst_143 = arith.constant dense<0.000000e+00> : vector<32x16xf32>
    %358 = tpu.matmul %357, %105, %cst_143 {dimension_numbers = #tpu.dot_dimension_numbers<[1], [0], [0], [1], [0, 0, 1, 1], [], []>} : vector<32x8xf32>, vector<8x16xf32>, vector<32x16xf32> -> vector<32x16xf32>
    %359 = arith.addf %356, %358 : vector<32x16xf32>
    %360 = vector.extract_strided_slice %354 {offsets = [64, 0], sizes = [32, 8], strides = [1, 1]} : vector<128x8xf32> to vector<32x8xf32>
    %cst_144 = arith.constant dense<0.000000e+00> : vector<32x16xf32>
    %361 = tpu.matmul %360, %112, %cst_144 {dimension_numbers = #tpu.dot_dimension_numbers<[1], [0], [0], [1], [0, 0, 1, 1], [], []>} : vector<32x8xf32>, vector<8x16xf32>, vector<32x16xf32> -> vector<32x16xf32>
    %362 = arith.addf %359, %361 : vector<32x16xf32>
    %363 = vector.extract_strided_slice %354 {offsets = [96, 0], sizes = [32, 8], strides = [1, 1]} : vector<128x8xf32> to vector<32x8xf32>
    %cst_145 = arith.constant dense<0.000000e+00> : vector<32x16xf32>
    %364 = tpu.matmul %363, %119, %cst_145 {dimension_numbers = #tpu.dot_dimension_numbers<[1], [0], [0], [1], [0, 0, 1, 1], [], []>} : vector<32x8xf32>, vector<8x16xf32>, vector<32x16xf32> -> vector<32x16xf32>
    %365 = arith.addf %362, %364 : vector<32x16xf32>
    %366 = vector.broadcast %353 : vector<32x1xf32> to vector<32x16xf32>
    %367 = arith.addf %365, %366 : vector<32x16xf32>
    %cst_146 = arith.constant 0.000000e+00 : f32
    %368 = vector.broadcast %cst_146 : f32 to vector<32x16xf32>
    %369 = arith.maximumf %367, %368 : vector<32x16xf32>
    %c0_147 = arith.constant 0 : index
    %c0_148 = arith.constant 0 : index
    %370 = vector.load %arg9[%c0_147, %c0_148] : memref<128x32xf32, #tpu.memory_space<vmem>>, vector<128x32xf32>
    %c0_149 = arith.constant 0 : index
    %c0_150 = arith.constant 0 : index
    %371 = vector.load %arg10[%c0_149, %c0_150] : memref<32x1xf32, #tpu.memory_space<vmem>>, vector<32x1xf32>
    %cst_151 = arith.constant dense<0.000000e+00> : vector<128x16xf32>
    %372 = tpu.matmul %370, %369, %cst_151 {dimension_numbers = #tpu.dot_dimension_numbers<[1], [0], [0], [1], [0, 0, 1, 1], [], []>} : vector<128x32xf32>, vector<32x16xf32>, vector<128x16xf32> -> vector<128x16xf32>
    %373 = vector.extract_strided_slice %372 {offsets = [0, 0], sizes = [32, 16], strides = [1, 1]} : vector<128x16xf32> to vector<32x16xf32>
    %cst_152 = arith.constant dense<0.000000e+00> : vector<32x32xf32>
    %374 = tpu.matmul %373, %128, %cst_152 {dimension_numbers = #tpu.dot_dimension_numbers<[1], [0], [0], [1], [0, 0, 1, 1], [], []>} : vector<32x16xf32>, vector<16x32xf32>, vector<32x32xf32> -> vector<32x32xf32>
    %375 = vector.extract_strided_slice %372 {offsets = [32, 0], sizes = [32, 16], strides = [1, 1]} : vector<128x16xf32> to vector<32x16xf32>
    %cst_153 = arith.constant dense<0.000000e+00> : vector<32x32xf32>
    %376 = tpu.matmul %375, %135, %cst_153 {dimension_numbers = #tpu.dot_dimension_numbers<[1], [0], [0], [1], [0, 0, 1, 1], [], []>} : vector<32x16xf32>, vector<16x32xf32>, vector<32x32xf32> -> vector<32x32xf32>
    %377 = arith.addf %374, %376 : vector<32x32xf32>
    %378 = vector.extract_strided_slice %372 {offsets = [64, 0], sizes = [32, 16], strides = [1, 1]} : vector<128x16xf32> to vector<32x16xf32>
    %cst_154 = arith.constant dense<0.000000e+00> : vector<32x32xf32>
    %379 = tpu.matmul %378, %142, %cst_154 {dimension_numbers = #tpu.dot_dimension_numbers<[1], [0], [0], [1], [0, 0, 1, 1], [], []>} : vector<32x16xf32>, vector<16x32xf32>, vector<32x32xf32> -> vector<32x32xf32>
    %380 = arith.addf %377, %379 : vector<32x32xf32>
    %381 = vector.extract_strided_slice %372 {offsets = [96, 0], sizes = [32, 16], strides = [1, 1]} : vector<128x16xf32> to vector<32x16xf32>
    %cst_155 = arith.constant dense<0.000000e+00> : vector<32x32xf32>
    %382 = tpu.matmul %381, %149, %cst_155 {dimension_numbers = #tpu.dot_dimension_numbers<[1], [0], [0], [1], [0, 0, 1, 1], [], []>} : vector<32x16xf32>, vector<16x32xf32>, vector<32x32xf32> -> vector<32x32xf32>
    %383 = arith.addf %380, %382 : vector<32x32xf32>
    %384 = vector.broadcast %371 : vector<32x1xf32> to vector<32x32xf32>
    %385 = arith.addf %383, %384 : vector<32x32xf32>
    %cst_156 = arith.constant 0.000000e+00 : f32
    %386 = vector.broadcast %cst_156 : f32 to vector<32x32xf32>
    %387 = arith.maximumf %385, %386 : vector<32x32xf32>
    %c0_157 = arith.constant 0 : index
    %c0_158 = arith.constant 0 : index
    %388 = vector.load %arg11[%c0_157, %c0_158] : memref<4x32xf32, #tpu.memory_space<vmem>>, vector<4x32xf32>
    %c0_159 = arith.constant 0 : index
    %c0_160 = arith.constant 0 : index
    %389 = vector.load %arg12[%c0_159, %c0_160] : memref<1x1xf32, #tpu.memory_space<vmem>>, vector<1x1xf32>
    %cst_161 = arith.constant dense<0.000000e+00> : vector<4x32xf32>
    %390 = tpu.matmul %388, %387, %cst_161 {dimension_numbers = #tpu.dot_dimension_numbers<[1], [0], [0], [1], [0, 0, 1, 1], [], []>} : vector<4x32xf32>, vector<32x32xf32>, vector<4x32xf32> -> vector<4x32xf32>
    %391 = vector.extract_strided_slice %390 {offsets = [0, 0], sizes = [1, 32], strides = [1, 1]} : vector<4x32xf32> to vector<1x32xf32>
    %cst_162 = arith.constant dense<0.000000e+00> : vector<1x64xf32>
    %392 = tpu.matmul %391, %158, %cst_162 {dimension_numbers = #tpu.dot_dimension_numbers<[1], [0], [0], [1], [0, 0, 1, 1], [], []>} : vector<1x32xf32>, vector<32x64xf32>, vector<1x64xf32> -> vector<1x64xf32>
    %393 = vector.extract_strided_slice %390 {offsets = [1, 0], sizes = [1, 32], strides = [1, 1]} : vector<4x32xf32> to vector<1x32xf32>
    %cst_163 = arith.constant dense<0.000000e+00> : vector<1x64xf32>
    %394 = tpu.matmul %393, %165, %cst_163 {dimension_numbers = #tpu.dot_dimension_numbers<[1], [0], [0], [1], [0, 0, 1, 1], [], []>} : vector<1x32xf32>, vector<32x64xf32>, vector<1x64xf32> -> vector<1x64xf32>
    %395 = arith.addf %392, %394 : vector<1x64xf32>
    %396 = vector.extract_strided_slice %390 {offsets = [2, 0], sizes = [1, 32], strides = [1, 1]} : vector<4x32xf32> to vector<1x32xf32>
    %cst_164 = arith.constant dense<0.000000e+00> : vector<1x64xf32>
    %397 = tpu.matmul %396, %172, %cst_164 {dimension_numbers = #tpu.dot_dimension_numbers<[1], [0], [0], [1], [0, 0, 1, 1], [], []>} : vector<1x32xf32>, vector<32x64xf32>, vector<1x64xf32> -> vector<1x64xf32>
    %398 = arith.addf %395, %397 : vector<1x64xf32>
    %399 = vector.extract_strided_slice %390 {offsets = [3, 0], sizes = [1, 32], strides = [1, 1]} : vector<4x32xf32> to vector<1x32xf32>
    %cst_165 = arith.constant dense<0.000000e+00> : vector<1x64xf32>
    %400 = tpu.matmul %399, %179, %cst_165 {dimension_numbers = #tpu.dot_dimension_numbers<[1], [0], [0], [1], [0, 0, 1, 1], [], []>} : vector<1x32xf32>, vector<32x64xf32>, vector<1x64xf32> -> vector<1x64xf32>
    %401 = arith.addf %398, %400 : vector<1x64xf32>
    %402 = vector.broadcast %389 : vector<1x1xf32> to vector<1x64xf32>
    %403 = arith.addf %401, %402 : vector<1x64xf32>
    %404 = math.tanh %403 : vector<1x64xf32>
    %c1_166 = arith.constant 1 : index
    %c0_167 = arith.constant 0 : index
    %c0_168 = arith.constant 0 : index
    %405 = vector.load %arg13[%c1_166, %c0_167, %c0_168] : memref<2x1x64xf32, #tpu.memory_space<vmem>>, vector<1x1x64xf32>
    %406 = vector.shape_cast %405 : vector<1x1x64xf32> to vector<1x64xf32>
    %407 = vector.shape_cast %404 : vector<1x64xf32> to vector<1x1x64xf32>
    tpu.vector_store %arg13[%c1_166, %c0_167, %c0_168], %407 {strides = array<i32>} : memref<2x1x64xf32, #tpu.memory_space<vmem>>, vector<1x1x64xf32>,
    return
  }
}

</mosaic_0001>

<bundles_post_ra>
// kernel: audio_autoencoder_forward.1
= control target key start
LH: loop header
LB: loop body
LE: loop exit
PB: predicated region body
PF: predicated region fallthrough
CT: control target
= control target key end

     0   :  { %s6034_s0 = inlined_call_operand.vmem [shape: f32[2,1,64], index: 0, kind: input, shape index: {}]   ;;  %s6035_s1 = inlined_call_operand.vmem [shape: f32[128,1], index: 1, kind: input, shape index: {}]   ;;  %s6036_s2 = inlined_call_operand.vmem [shape: f32[32,1], index: 2, kind: input, shape index: {}]   ;;  %s6037_s3 = inlined_call_operand.vmem [shape: f32[128,32], index: 3, kind: input, shape index: {}]   ;;  %s6038_s4 = inlined_call_operand.vmem [shape: f32[32,1], index: 4, kind: input, shape index: {}]   ;;  %s6039_s5 = inlined_call_operand.vmem [shape: f32[64,32], index: 5, kind: input, shape index: {}]   ;;  %s6040_s6 = inlined_call_operand.vmem [shape: f32[16,1], index: 6, kind: input, shape index: {}]   ;;  %s6041_s7 = inlined_call_operand.vmem [shape: f32[128,16], index: 7, kind: input, shape index: {}]   ;;  %s6042_s8 = inlined_call_operand.vmem [shape: f32[32,1], index: 8, kind: input, shape index: {}]   ;;  %s6043_s9 = inlined_call_operand.vmem [shape: f32[128,32], index: 9, kind: input, shape index: {}]   ;;  %s6044_s10 = inlined_call_operand.vmem [shape: f32[32,1], index: 10, kind: input, shape index: {}]   ;;  %s6045_s11 = inlined_call_operand.vmem [shape: f32[4,32], index: 11, kind: input, shape index: {}]   ;;  %s6046_s12 = inlined_call_operand.<no memory space> [shape: f32[1,1], index: 12, kind: input, shape index: {}]   ;;  %s6047_s13 = inlined_call_operand.hbm [shape: f32[2,1,64], index: 13, kind: output, shape index: {}]  }
   0x1   :  { %v18_v0 = vstv %s6046_s12 }
   0x2   :  { %19 = vst [vmem:[#allocation2] sm:$0x1] %v18_v0 }
   0x3   :  { %v4180_v1 = vld [vmem:[%s6035_s1 + $0x60] sm:$0xff]  ;;  %v4185_v2 = vld [vmem:[%s6035_s1 + $0x48] sm:$0xff]  ;;  %v4190_v3 = vld [vmem:[%s6035_s1 + $0x30] sm:$0xff]  ;;  %v4099_v4 = vmov 0  }
   0x4   :  { %4065 = vset.pattern.permute.xlu2 %v4099_v4  ;;  %4064 = vset.pattern.permute.xlu1 %v4099_v4 }
   0x5   :  { %4063 = vset.pattern.permute.xlu0 %v4099_v4  ;;  %305 = vperm.xlu1 %4064, %v4180_v1  }
   0x6   :  { %290 = vperm.xlu2 %4065, %v4185_v2   ;;  %275 = vperm.xlu0 %4063, %v4190_v3  }
   0x7   :  { %20 = vsyncpa [#allocation4], 0  ;;  %v4198_v5 = vld [vmem:[%s6035_s1] sm:$0xff]  ;;  %v4203_v6 = vld [vmem:[%s6035_s1 + $0x68] sm:$0xff]  ;;  %v47_v29 = vlaneseq  ;;  %v6066_v39 = vmov 1.0   ;;  %v6117_v47 = vmov 0 }
   0x8   :  { %v4208_v7 = vld [vmem:[%s6035_s1 + $0x38] sm:$0xff]  ;;  %v4216_v8 = vld [vmem:[%s6035_s1 + $0x50] sm:$0xff]  ;;  %v4226_v10 = vld [vmem:[%s6035_s1 + $0x8] sm:$0xff]  ;;  %v6120_v49 = vmov 0  ;;  %v6123_v51 = vmov 0  ;;  %v6128_v53 = vmov 0 }
   0x9   :  { %v4221_v9 = vld [vmem:[%s6035_s1 + $0x70] sm:$0xff]  ;;  %v4234_v11 = vld [vmem:[%s6035_s1 + $0x20] sm:$0xff]  ;;  %v4239_v12 = vld [vmem:[%s6035_s1 + $0x58] sm:$0xff]  ;;  %v4337_v30 = vand.u32 127, %v47_v29  ;;  %v4341_v31 = vshrl.u32 %v47_v29, 7  ;;  %v6131_v54 = vmov 0 }
   0xa   :  { %v4244_v13 = vld [vmem:[%s6035_s1 + $0x10] sm:$0xff]  ;;  %v4252_v14 = vld [vmem:[%s6035_s1 + $0x18] sm:$0xff]  ;;  %v4257_v15 = vld [vmem:[%s6035_s1 + $0x28] sm:$0xff]  ;;  %v6134_v58 = vmov 0  ;;  %v6136_v59 = vmov 0  ;;  %v6144_v0 = vmov 0 }
   0xb   :  { %v4262_v16 = vld [vmem:[%s6035_s1 + $0x78] sm:$0xff]  ;;  %v4275_v18 = vld [vmem:[%s6036_s2 + $0x10] sm:$0xff]  ;;  %v4280_v19 = vld [vmem:[%s6035_s1 + $0x40] sm:$0xff]  ;;  %v4344_v32 = vmul.u32 2, %v4337_v30  ;;  %v4347_v33 = vadd.s32 56, %v4341_v31  ;;  %v4372_v38 = vadd.s32 48, %v4341_v31 }
   0xc   :  { %v4270_v17 = vld [vmem:[%s6036_s2 + $0x18] sm:$0xff]  ;;  %v4288_v20 = vld [vmem:[%s6036_s2] sm:$0xff]  ;;  %v4298_v22 = vld [vmem:[%s6036_s2 + $0x8] sm:$0xff]  ;;  %v4388_v40 = vadd.s32 40, %v4341_v31  ;;  %v4409_v41 = vadd.s32 32, %v4341_v31  ;;  %v4428_v42 = vadd.s32 24, %v4341_v31 }
   0xd   :  { %245 = vperm.xlu1 %4064, %v4198_v5   ;;  %v4293_v21 = vld [vmem:[%s6038_s4 + $0x18] sm:$0xff]  ;;  %v4306_v23 = vld [vmem:[%s6038_s4 + $0x8] sm:$0xff]  ;;  %v4311_v24 = vld [vmem:[%s6038_s4] sm:$0xff]  ;;  %6115 = vst [vmem:[#allocation6_spill] sm:$0xff] %v4344_v32  ;;  %v4350_v34 = vadd.s32 2, %v4344_v32  ;;  %vm6055_vm0 = vcmp.eq.s32.totalorder %v4347_v33, %v4344_v32  ;;  %vm6053_vm2 = vcmp.eq.s32.totalorder %v4372_v38, %v4344_v32  ;;  %v4431_v43 = vadd.s32 4294967295, %v4344_v32 }
   0xe   :  { %310 = vperm.xlu2 %4065, %v4203_v6   ;;  %280 = vperm.xlu0 %4063, %v4208_v7   ;;  %v4316_v25 = vld [vmem:[%s6038_s4 + $0x10] sm:$0xff]  ;;  %v4324_v26 = vld [vmem:[%s6040_s6] sm:$0xff]  ;;  %v4329_v27 = vld [vmem:[%s6042_s8 + $0x18] sm:$0xff]  ;;  %vm6051_vm4 = vcmp.eq.s32.totalorder %v4388_v40, %v4344_v32  ;;  %vm6050_vm6 = vcmp.eq.s32.totalorder %v4409_v41, %v4344_v32  ;;  %vm4462_vm8 = vcmp.eq.s32.totalorder %v4428_v42, %v4344_v32  ;;  %v4469_v48 = vadd.s32 16, %v4341_v31  ;;  %s3547_s21 = sshll.u32 %s6047_s13, 4  ;;  %s4102_s22 = smov 16   ;;  %s3548_s21 = int_to_ptr.hbm [resolvable:$true] %s3547_s21 }
   0xf   :  { %v4334_v28 = vld [vmem:[%s6040_s6 + $0x8] sm:$0xff]  ;;  %v4360_v36 = vld [vmem:[%s6042_s8] sm:$0xff]  ;;  %v4365_v37 = vld [vmem:[%s6042_s8 + $0x10] sm:$0xff]  ;;  %vm6059_vm1 = vcmp.eq.s32.totalorder %v4347_v33, %v4350_v34  ;;  %4042 = vmatpush.msk.msra.mxu2 %vm6055_vm0, %v6066_v39  ;;  %vm6058_vm3 = vcmp.eq.s32.totalorder %v4372_v38, %v4350_v34  ;;  %3607 = vmatpush.msk.msra.mxu0 %vm6055_vm0, %v6066_v39  ;;  %vm6057_vm5 = vcmp.eq.s32.totalorder %v4388_v40, %v4350_v34  ;;  %v6118_v47 = vsel %vm4462_vm8, 4294967295, %v6117_v47  ;;  %s4103_s23 = smov 1  }
  0x10   :  { %v4355_v35 = vld [vmem:[%s6042_s8 + $0x8] sm:$0xff]  ;;  %3643 = vmatpush.msk.msra.mxu3 %vm6059_vm1, %v6066_v39  ;;  %vm6056_vm7 = vcmp.eq.s32.totalorder %v4409_v41, %v4350_v34  ;;  %6116 = vst [vmem:[#allocation7_spill] sm:$0xff] %v4431_v43  ;;  %v4436_v44 = vld [vmem:[%s6044_s10 + $0x10] sm:$0xff]  ;;  %v4450_v46 = vld [vmem:[%s6044_s10 + $0x18] sm:$0xff]  ;;  %vm6048_vm9 = vcmp.eq.s32.totalorder %v4347_v33, %v4431_v43  ;;  %vm6084_vm10 = vcmp.eq.s32.totalorder %v4428_v42, %v4350_v34  ;;  %v4494_v50 = vadd.s32 8, %v4341_v31 }
  0x11   :  { %4043 = vmatpush.msk.msra.mxu2 %vm6053_vm2, %v6066_v39  ;;  %3608 = vmatpush.msk.msra.mxu0 %vm6053_vm2, %v6066_v39  ;;  %v4445_v45 = vld [vmem:[%s6044_s10 + $0x8] sm:$0xff]  ;;  %6119 = vst [vmem:[#allocation8_spill] sm:$0xff] %v6118_v47  ;;  %vm4487_vm11 = vcmp.eq.s32.totalorder %v4469_v48, %v4344_v32  ;;  %vm6049_vm12 = vcmp.eq.s32.totalorder %v4372_v38, %v4431_v43  ;;  %v4554_v55 = vadd.s32 1, %v4344_v32  ;;  %v4562_v56 = vld [vmem:[%s6044_s10] sm:$0xff] }
  0x12   :  { %3644 = vmatpush.msk.msra.mxu3 %vm6058_vm3, %v6066_v39  ;;  %3619 = vmatpush.msk.msra.mxu1 %vm6048_vm9, %v6066_v39  ;;  %v6121_v49 = vsel %vm4487_vm11, 4294967295, %v6120_v49  ;;  %vm6060_vm13 = vcmp.eq.s32.totalorder %v4469_v48, %v4350_v34  ;;  %vm4509_vm14 = vcmp.eq.s32.totalorder %v4494_v50, %v4344_v32  ;;  %vm6052_vm15 = vcmp.eq.s32.totalorder %v4388_v40, %v4431_v43  ;;  %v4739_v4 = vld [vmem:[%s6034_s0] ss:$0 sm:$0xff] }
  0x13   :  { %4044 = vmatpush.msk.msra.mxu2 %vm6051_vm4, %v6066_v39  ;;  %3609 = vmatpush.msk.msra.mxu0 %vm6051_vm4, %v6066_v39  ;;  %6122 = vst [vmem:[#allocation9_spill] sm:$0xff] %v6121_v49  ;;  %v6124_v51 = vsel %vm4509_vm14, 4294967295, %v6123_v51  ;;  %vm4521_vm9 = vcmp.eq.s32.totalorder %v4494_v50, %v4350_v34  ;;  %vm4549_vm4 = vcmp.eq.s32.totalorder %v4341_v31, %v4350_v34 }
  0x14   :  { %3645 = vmatpush.msk.msra.mxu3 %vm6057_vm5, %v6066_v39  ;;  %6125 = vst [vmem:[#allocation10_spill] sm:$0xff] %v6124_v51  ;;  %3620 = vmatpush.msk.msra.mxu1 %vm6049_vm12, %v6066_v39  ;;  %vm4537_vm12 = vcmp.eq.s32.totalorder %v4341_v31, %v4344_v32  ;;  %v6132_v54 = vsel %vm4549_vm4, 4294967295, %v6131_v54  ;;  %vm6062_vm2 = vcmp.eq.s32.totalorder %v4347_v33, %v4554_v55 }
  0x15   :  { %295 = vperm.xlu1 %4064, %v4216_v8   ;;  %4045 = vmatpush.msk.msra.mxu2 %vm6050_vm6, %v6066_v39  ;;  %v6129_v53 = vsel %vm4537_vm12, 4294967295, %v6128_v53  ;;  %6133 = vst [vmem:[#allocation12_spill] sm:$0xff] %v4554_v55  ;;  %vm6061_vm0 = vcmp.eq.s32.totalorder %v4372_v38, %v4554_v55  ;;  %vm6063_vm5 = vcmp.eq.s32.totalorder %v4388_v40, %v4554_v55 }
  0x16   :  { %315 = vperm.xlu2 %4065, %v4221_v9   ;;  %250 = vperm.xlu0 %4063, %v4226_v10   ;;  %6130 = vst [vmem:[#allocation11_spill] sm:$0xff] %v6129_v53  ;;  %vm4622_vm3 = vcmp.eq.s32.totalorder %v4341_v31, %v4431_v43  ;;  %vm4639_vm1 = vcmp.eq.s32.totalorder %v4428_v42, %v4554_v55 }
  0x17   :  { %3646 = vmatpush.msk.msra.mxu3 %vm6056_vm7, %v6066_v39  ;;  %3610 = vmatpush.msk.msra.mxu0 %vm6050_vm6, %v6066_v39  ;;  %vm6054_vm6 = vcmp.eq.s32.totalorder %v4409_v41, %v4431_v43  ;;  %vm4603_vm7 = vcmp.eq.s32.totalorder %v4494_v50, %v4431_v43  ;;  %v6137_v59 = vsel %vm4622_vm3, 4294967295, %v6136_v59  ;;  %v6211_v61 = vld [vmem:[#allocation7_spill] sm:$0xff] }
  0x18   :  { %4046 = vmatpush.msk.msra.mxu2 %vm4462_vm8, %v6066_v39  ;;  %3621 = vmatpush.msk.msra.mxu1 %vm6052_vm15, %v6066_v39  ;;  %vm6082_vm15 = vcmp.eq.s32.totalorder %v4428_v42, %v4431_v43  ;;  %v6135_v58 = vsel %vm4603_vm7, 4294967295, %v6134_v58 }
  0x19   :  { %3647 = vmatpush.msk.msra.mxu3 %vm6084_vm10, %v6066_v39  ;;  %3611 = vmatpush.msk.msra.mxu0 %vm4462_vm8, %v6066_v39 }
  0x1a   :  { %4047 = vmatpush.msk.msra.mxu2 %vm4487_vm11, %v6066_v39  ;;  %3622 = vmatpush.msk.msra.mxu1 %vm6054_vm6, %v6066_v39  ;;  %vm6065_vm6 = vcmp.eq.s32.totalorder %v4469_v48, %v4431_v43 }
  0x1b   :  { %3648 = vmatpush.msk.msra.mxu3 %vm6060_vm13, %v6066_v39  ;;  %3612 = vmatpush.msk.msra.mxu0 %vm4487_vm11, %v6066_v39  ;;  %vm6064_vm13 = vcmp.eq.s32.totalorder %v4409_v41, %v4554_v55 }
  0x1c   :  { %4048 = vmatpush.msk.msra.mxu2 %vm4509_vm14, %v6066_v39  ;;  %3623 = vmatpush.msk.msra.mxu1 %vm6082_vm15, %v6066_v39 }
  0x1d   :  { %265 = vperm.xlu1 %4064, %v4234_v11   ;;  %3649 = vmatpush.msk.msra.mxu3 %vm4521_vm9, %v6066_v39 }
  0x1e   :  { %300 = vperm.xlu2 %4065, %v4239_v12   ;;  %255 = vperm.xlu0 %4063, %v4244_v13  }
  0x1f   :  { %4049 = vmatpush.msk.msra.mxu2 %vm4537_vm12, %v6066_v39  ;;  %3613 = vmatpush.msk.msra.mxu0 %vm4509_vm14, %v6066_v39 }
  0x20   :  { %3650 = vmatpush.msk.msra.mxu3 %vm4549_vm4, %v6066_v39  ;;  %3624 = vmatpush.msk.msra.mxu1 %vm6065_vm6, %v6066_v39 }
  0x21   :  { %4050 = vmatpush.msk.msrb.mxu2 %vm6062_vm2, %v6066_v39  ;;  %3614 = vmatpush.msk.msra.mxu0 %vm4537_vm12, %v6066_v39 }
  0x22   :  { %3625 = vmatpush.msk.msra.mxu1 %vm4603_vm7, %v6066_v39  ;;  %3687 = vmatpush.msk.msrb.mxu3 %vm4639_vm1, %v6066_v39 }
  0x23   :  { %4051 = vmatpush.msk.msrb.mxu2 %vm6061_vm0, %v6066_v39  ;;  %3631 = vmatpush.msk.msrb.mxu0 %vm6062_vm2, %v6066_v39  ;;  %vm4683_vm2 = vcmp.eq.s32.totalorder %v4494_v50, %v4554_v55 }
  0x24   :  { %3626 = vmatpush.msk.msra.mxu1 %vm4622_vm3, %v6066_v39 }
  0x25   :  { %260 = vperm.xlu1 %4064, %v4252_v14   ;;  %4052 = vmatpush.msk.msrb.mxu2 %vm6063_vm5, %v6066_v39 }
  0x26   :  { %270 = vperm.xlu2 %4065, %v4257_v15   ;;  %320 = vperm.xlu0 %4063, %v4262_v16  }
  0x27   :  { %3632 = vmatpush.msk.msrb.mxu0 %vm6061_vm0, %v6066_v39  ;;  %4053 = vmatpush.msk.msrb.mxu2 %vm6064_vm13, %v6066_v39  ;;  %vm4664_vm0 = vcmp.eq.s32.totalorder %v4469_v48, %v4554_v55 }
  0x28   :  { %3671 = vmatpush.msk.msrb.mxu1 %vm4462_vm8, %v6066_v39  ;;  %3688 = vmatpush.msk.msrb.mxu3 %vm4664_vm0, %v6066_v39  ;;  %vm6168_vm8 = vcmp.eq.s32.totalorder %v4347_v33, %v4350_v34 }
  0x29   :  { %3633 = vmatpush.msk.msrb.mxu0 %vm6063_vm5, %v6066_v39  ;;  %4054 = vmatpush.msk.msrb.mxu2 %vm4639_vm1, %v6066_v39  ;;  %vm4702_vm5 = vcmp.eq.s32.totalorder %v4341_v31, %v4554_v55 }
  0x2a   :  { %3672 = vmatpush.msk.msrb.mxu1 %vm4487_vm11, %v6066_v39  ;;  %3689 = vmatpush.msk.msrb.mxu3 %vm4683_vm2, %v6066_v39  ;;  %v6145_v0 = vsel %vm4702_vm5, 4294967295, %v6144_v0 }
  0x2b   :  { %3634 = vmatpush.msk.msrb.mxu0 %vm6064_vm13, %v6066_v39  ;;  %4055 = vmatpush.msk.msrb.mxu2 %vm4664_vm0, %v6066_v39  ;;  %vm6083_vm13 = vcmask 523264  }
  0x2c   :  { %3673 = vmatpush.msk.msrb.mxu1 %vm4509_vm14, %v6066_v39  ;;  %3690 = vmatpush.msk.msrb.mxu3 %vm4702_vm5, %v6066_v39 }
  0x2d   :  { %532 = vperm.xlu1 %4064, %v4270_v17   ;;  %3635 = vmatpush.msk.msrb.mxu0 %vm4639_vm1, %v6066_v39 }
  0x2e   :  { %527 = vperm.xlu2 %4065, %v4275_v18   ;;  %285 = vperm.xlu0 %4063, %v4280_v19  }
  0x2f   :  { %4056 = vmatpush.msk.msrb.mxu2 %vm4683_vm2, %v6066_v39  ;;  %3636 = vmatpush.msk.msrb.mxu0 %vm4664_vm0, %v6066_v39 }
  0x30   :  { %3674 = vmatpush.msk.msrb.mxu1 %vm4537_vm12, %v6066_v39 }
  0x31   :  { %4057 = vmatpush.msk.msrb.mxu2 %vm4702_vm5, %v6066_v39  ;;  %3637 = vmatpush.msk.msrb.mxu0 %vm4683_vm2, %v6066_v39 }
  0x33   :  { %3638 = vmatpush.msk.msrb.mxu0 %vm4702_vm5, %v6066_v39 }
  0x35   :  { %517 = vperm.xlu1 %4064, %v4288_v20  }
  0x36   :  { %866 = vperm.xlu2 %4065, %v4293_v21   ;;  %522 = vperm.xlu0 %4063, %v4298_v22  }
  0x3d   :  { %856 = vperm.xlu1 %4064, %v4306_v23  }
  0x3e   :  { %851 = vperm.xlu2 %4065, %v4311_v24   ;;  %861 = vperm.xlu0 %4063, %v4316_v25  }
  0x45   :  { %1075 = vperm.xlu1 %4064, %v4324_v26  }
  0x46   :  { %1410 = vperm.xlu2 %4065, %v4329_v27   ;;  %1080 = vperm.xlu0 %4063, %v4334_v28  }
  0x4d   :  { %1400 = vperm.xlu1 %4064, %v4355_v35  }
  0x4e   :  { %1395 = vperm.xlu2 %4065, %v4360_v36   ;;  %1405 = vperm.xlu0 %4063, %v4365_v37  }
  0x55   :  { %1738 = vperm.xlu1 %4064, %v4436_v44  }
  0x56   :  { %1733 = vperm.xlu2 %4065, %v4445_v45   ;;  %1743 = vperm.xlu0 %4063, %v4450_v46  }
  0x5d   :  { %1907 = vperm.xlu1 %4064, %v4198_v5  }
  0x5e   :  { %1967 = vperm.xlu2 %4065, %v4180_v1   ;;  %1728 = vperm.xlu0 %4063, %v4562_v56  }
  0x60   :  { %v4599_v57 = vpop.permute.xlu2 %290 }
  0x65   :  { %1912 = vperm.xlu1 %4064, %v4226_v10  }
  0x66   :  { %1947 = vperm.xlu2 %4065, %v4280_v19   ;;  %1927 = vperm.xlu0 %4063, %v4234_v11  }
  0x68   :  { %v311_v62 = vpop.permute.xlu2 %310 }
  0x6d   :  { %1932 = vperm.xlu1 %4064, %v4257_v15  }
  0x6e   :  { %1917 = vperm.xlu2 %4065, %v4244_v13   ;;  %1972 = vperm.xlu0 %4063, %v4203_v6  }
  0x70   :  { %v316_v1 = vpop.permute.xlu2 %315 }
  0x75   :  { %1977 = vperm.xlu1 %4064, %v4221_v9  }
  0x76   :  { %1937 = vperm.xlu2 %4065, %v4190_v3   ;;  %1952 = vperm.xlu0 %4063, %v4185_v2   ;;  %v339_v3 = vmul.f32 %v4739_v4, %v311_v62 }
  0x77   :  { %v306_v5 = vpop.permute.xlu1 %305 }
  0x78   :  { %v338_v6 = vmul.f32 %v4739_v4, %v306_v5  ;;  %v301_v10 = vpop.permute.xlu2 %300  ;;  %v276_v11 = vpop.permute.xlu0 %275 }
  0x79   :  { %v332_v13 = vmul.f32 %v4739_v4, %v276_v11 }
  0x7a   :  { %3651 = vmatmul.msk.f32.vlgmr.msra.gmra.mxu3 %vm6083_vm13, %v338_v6 }
  0x7b   :  { %3617 = vmatmul.msk.f32.vlgmr.msra.gmra.mxu2 %vm6083_vm13, %v332_v13  ;;  %3711 = vmatpush.msk.msra.mxu3 %vm4509_vm14, %v6066_v39 }
  0x7c   :  { %3679 = vmatpush.msk.msra.mxu2 %vm6082_vm15, %v6066_v39  ;;  %vm6086_vm15 = vcmask 130048  }
  0x7d   :  { %1957 = vperm.xlu1 %4064, %v4216_v8   ;;  %3712 = vmatpush.msk.msra.mxu3 %vm4537_vm12, %v6066_v39 }
  0x7e   :  { %1982 = vperm.xlu2 %4065, %v4262_v16   ;;  %1922 = vperm.xlu0 %4063, %v4252_v14   ;;  %v340_v16 = vmul.f32 %v4739_v4, %v316_v1 }
  0x7f   :  { %v246_v2 = vpop.permute.xlu1 %245  ;;  %3680 = vmatpush.msk.msra.mxu2 %vm6065_vm6, %v6066_v39  ;;  %vm6146_vm6 = vcmp.eq.s32.totalorder %v4469_v48, %v4350_v34 }
  0x80   :  { %v281_v9 = vpop.permute.xlu0 %280  ;;  %v271_v15 = vpop.permute.xlu2 %270  ;;  %v326_v8 = vmul.f32 %v4739_v4, %v246_v2 }
  0x81   :  { %v333_v19 = vmul.f32 %v4739_v4, %v281_v9  ;;  %3681 = vmatpush.msk.msra.mxu2 %vm4603_vm7, %v6066_v39 }
  0x82   :  { %3627 = vmatmul.msk.f32.vlgmr.msra.gmra.mxu1 %vm6083_vm13, %v326_v8  ;;  %3652 = vmatmul.msk.f32.gmra.mxu3 %vm6083_vm13, %v339_v3  ;;  %v337_v3 = vmul.f32 %v4739_v4, %v301_v10 }
  0x83   :  { %3618 = vmatmul.msk.f32.gmra.mxu2 %vm6083_vm13, %v333_v19  ;;  %3695 = vmatpush.msk.msra.mxu1 %vm6084_vm10, %v6066_v39  ;;  %vm6089_vm10 = vcmask 64512  }
  0x84   :  { %3682 = vmatpush.msk.msra.mxu2 %vm4622_vm3, %v6066_v39 }
  0x85   :  { %1962 = vperm.xlu1 %4064, %v4239_v12   ;;  %3696 = vmatpush.msk.msra.mxu1 %vm6146_vm6, %v6066_v39  ;;  %v335_v12 = vmul.f32 %v4739_v4, %v4599_v57  ;;  %vm6085_vm6 = vcmask 261120  }
  0x86   :  { %2193 = vperm.xlu2 %4065, %v4270_v17   ;;  %1942 = vperm.xlu0 %4063, %v4208_v7  }
  0x87   :  { %v296_v14 = vpop.permute.xlu1 %295  ;;  %3697 = vmatpush.msk.msra.mxu1 %vm4521_vm9, %v6066_v39 }
  0x88   :  { %v4792_v29 = vpop.permute.xlu2 %527  ;;  %v251_v62 = vpop.permute.xlu0 %250  ;;  %v336_v6 = vmul.f32 %v4739_v4, %v296_v14 }
  0x89   :  { %v327_v5 = vmul.f32 %v4739_v4, %v251_v62  ;;  %3698 = vmatpush.msk.msra.mxu1 %vm4549_vm4, %v6066_v39 }
  0x8a   :  { %3653 = vmatmul.msk.f32.gmra.mxu3 %vm6083_vm13, %v340_v16 }
  0x8b   :  { %3628 = vmatmul.msk.f32.gmra.mxu1 %vm6083_vm13, %v327_v5  ;;  %3640 = vmatmul.msk.f32.vlgmr.msrb.gmra.mxu2 %vm6083_vm13, %v335_v12 }
  0x8d   :  { %2183 = vperm.xlu1 %4064, %v4298_v22  }
  0x8e   :  { %2178 = vperm.xlu2 %4065, %v4288_v20   ;;  %2188 = vperm.xlu0 %4063, %v4275_v18   ;;  %v331_v20 = vmul.f32 %v4739_v4, %v271_v15 }
  0x8f   :  { %v266_v7 = vpop.permute.xlu1 %265 }
  0x90   :  { %v4806_v17 = vpop.permute.xlu2 %866  ;;  %v256_v57 = vpop.permute.xlu0 %255  ;;  %v330_v1 = vmul.f32 %v4739_v4, %v266_v7 }
  0x91   :  { %v328_v11 = vmul.f32 %v4739_v4, %v256_v57 }
  0x92   :  { %3615 = vmatmul.msk.f32.vlgmr.msra.gmra.mxu0 %vm6083_vm13, %v330_v1 }
  0x93   :  { %3629 = vmatmul.msk.f32.gmra.mxu1 %vm6083_vm13, %v328_v11  ;;  %3641 = vmatmul.msk.f32.gmra.mxu2 %vm6083_vm13, %v336_v6 }
  0x95   :  { %2521 = vperm.xlu1 %4064, %v4316_v25  }
  0x96   :  { %2516 = vperm.xlu2 %4065, %v4306_v23   ;;  %2526 = vperm.xlu0 %4063, %v4293_v21  }
  0x97   :  { %v261_v18 = vpop.permute.xlu1 %260 }
  0x98   :  { %v4818_v22 = vpop.permute.xlu2 %851  ;;  %v321_v13 = vpop.permute.xlu0 %320  ;;  %v329_v2 = vmul.f32 %v4739_v4, %v261_v18 }
  0x99   :  { %v341_v9 = vmul.f32 %v4739_v4, %v321_v13 }
  0x9a   :  { %3616 = vmatmul.msk.f32.gmra.mxu0 %vm6083_vm13, %v331_v20 }
  0x9b   :  { %3630 = vmatmul.msk.f32.gmra.mxu1 %vm6083_vm13, %v329_v2  ;;  %3642 = vmatmul.msk.f32.gmra.mxu2 %vm6083_vm13, %v337_v3 }
  0x9c   :  { %3654 = vmatmul.msk.f32.gmra.mxu3 %vm6083_vm13, %v341_v9 }
  0x9d   :  { %2739 = vperm.xlu1 %4064, %v4334_v28  }
  0x9e   :  { %2734 = vperm.xlu2 %4065, %v4324_v26   ;;  %2511 = vperm.xlu0 %4063, %v4311_v24  }
  0x9f   :  { %v4830_v21 = vpop.permute.xlu1 %532 }
  0xa0   :  { %v4832_v23 = vpop.permute.xlu2 %1410  ;;  %v286_v25 = vpop.permute.xlu0 %285 }
  0xa1   :  { %v334_v10 = vmul.f32 %v4739_v4, %v286_v25 }
  0xa3   :  { %3639 = vmatmul.msk.f32.vlgmr.msrb.gmra.mxu0 %vm6083_vm13, %v334_v10 }
  0xa5   :  { %3063 = vperm.xlu1 %4064, %v4365_v37  }
  0xa6   :  { %3058 = vperm.xlu2 %4065, %v4355_v35   ;;  %3068 = vperm.xlu0 %4063, %v4329_v27   ;;  %v1755_v35 = vld [vmem:[#allocation2] sm:$0x1] }
  0xa7   :  { %v4839_v28 = vpop.permute.xlu1 %517 }
  0xa8   :  { %v4841_v26 = vpop.permute.xlu2 %1395  ;;  %v4843_v24 = vpop.permute.xlu0 %522 }
  0xad   :  { %3401 = vperm.xlu1 %4064, %v4450_v46  }
  0xae   :  { %3396 = vperm.xlu2 %4065, %v4436_v44   ;;  %3053 = vperm.xlu0 %4063, %v4360_v36   ;;  %v3413_v44 = vld [vmem:[#allocation2] sm:$0x1]  ;;  %v4865_v36 = vld [vmem:[%s6034_s0 + $0x1] ss:$0 sm:$0xff] }
  0xaf   :  { %v4848_v4 = vpop.permute.xlu1 %856 }
  0xb0   :  { %v4850_v15 = vpop.permute.xlu2 %1733  ;;  %v4852_v37 = vpop.permute.xlu0 %861 }
  0xb1   :  { %6147 = vst [vmem:[#allocation13_spill] sm:$0xff] %v4850_v15 }
  0xb5   :  { %3386 = vperm.xlu1 %4064, %v4562_v56  }
  0xb6   :  { %1875 = vperm.xlu2 %4065, %v1755_v35   ;;  %3391 = vperm.xlu0 %4063, %v4445_v45  }
  0xb7   :  { %v4856_v27 = vpop.permute.xlu1 %1075 }
  0xb8   :  { %v4858_v8 = vpop.permute.xlu2 %1967  ;;  %v4860_v46 = vpop.permute.xlu0 %1080 }
  0xbe   :  { %3533 = vperm.xlu0 %4063, %v3413_v44  }
  0xbf   :  { %v4867_v19 = vpop.permute.xlu1 %1400 }
  0xc0   :  { %v1948_v14 = vpop.permute.xlu2 %1947  ;;  %v4869_v56 = vpop.permute.xlu0 %1405 }
  0xc1   :  { %v4872_v45 = vmul.f32 %v4865_v36, %v1948_v14 }
  0xc3   :  { %6148 = vst [vmem:[#allocation14_spill] sm:$0xff] %v4872_v45 }
  0xc7   :  { %v4874_v16 = vpop.permute.xlu1 %1738 }
  0xc8   :  { %6149 = vst [vmem:[#allocation15_spill] sm:$0xff] %v4874_v16  ;;  %v1918_v62 = vpop.permute.xlu2 %1917  ;;  %v4876_v12 = vpop.permute.xlu0 %1743 }
  0xc9   :  { %6150 = vst [vmem:[#allocation16_spill] sm:$0xff] %v4876_v12  ;;  %v4879_v5 = vmul.f32 %v4865_v36, %v1918_v62 }
  0xcb   :  { %6151 = vst [vmem:[#allocation17_spill] sm:$0xff] %v4879_v5 }
  0xcf   :  { %v1908_v7 = vpop.permute.xlu1 %1907 }
  0xd0   :  { %v1938_v57 = vpop.permute.xlu2 %1937  ;;  %v4881_v1 = vpop.permute.xlu0 %1728  ;;  %v4884_v6 = vmul.f32 %v4865_v36, %v1908_v7 }
  0xd1   :  { %6152 = vst [vmem:[#allocation18_spill] sm:$0xff] %v4881_v1  ;;  %v4887_v11 = vmul.f32 %v4865_v36, %v1938_v57 }
  0xd2   :  { %6153 = vst [vmem:[#allocation19_spill] sm:$0xff] %v4884_v6 }
  0xd3   :  { %6154 = vst [vmem:[#allocation20_spill] sm:$0xff] %v4887_v11 }
  0xd7   :  { %v1913_v18 = vpop.permute.xlu1 %1912 }
  0xd8   :  { %v1928_v20 = vpop.permute.xlu0 %1927  ;;  %v4890_v13 = vmul.f32 %v4865_v36, %v1913_v18 }
  0xd9   :  { %v4893_v2 = vmul.f32 %v4865_v36, %v1928_v20 }
  0xda   :  { %6155 = vst [vmem:[#allocation21_spill] sm:$0xff] %v4890_v13 }
  0xdb   :  { %6156 = vst [vmem:[#allocation22_spill] sm:$0xff] %v4893_v2 }
  0xdf   :  { %v1933_v3 = vpop.permute.xlu1 %1932 }
  0xe0   :  { %v4896_v9 = vmul.f32 %v4865_v36, %v1933_v3 }
  0xe2   :  { %6157 = vst [vmem:[#allocation23_spill] sm:$0xff] %v4896_v9 }
  0xfd   :  { %v499_v35 = vpop.f32.mrf.mxu3 }
  0xfe   :  { %v378_v25 = vpop.f32.mrf.mxu2 }
  0xff   :  { %v413_v10 = vpop.f32.mrf.mxu1 }
 0x105   :  { %v502_v62 = vpop.f32.mrf.mxu3 }
 0x106   :  { %v381_v44 = vpop.f32.mrf.mxu2 }
 0x108   :  { %v416_v14 = vpop.f32.mrf.mxu1 }
 0x10d   :  { %v505_v18 = vpop.f32.mrf.mxu3 }
 0x10e   :  { %v457_v7 = vpop.f32.mrf.mxu2 }
 0x10f   :  { %v372_v57 = vpop.f32.mrf.mxu0 }
 0x110   :  { %v419_v39 = vpop.f32.mrf.mxu1  ;;  %v414_v9 = vadd.f32 %v413_v10, %v372_v57 }
 0x111   :  { %v420_v13 = vadd.f32 %v419_v39, %v378_v25 }
 0x116   :  { %v460_v5 = vpop.f32.mrf.mxu2 }
 0x117   :  { %v375_v6 = vpop.f32.mrf.mxu0  ;;  %v468_v2 = vadd.f32 %v460_v5, %v420_v13 }
 0x118   :  { %v417_v11 = vadd.f32 %v416_v14, %v375_v6  ;;  %v422_v20 = vpop.f32.mrf.mxu1  ;;  %v6158_v14 = vmov 1.0  }
 0x119   :  { %v423_v47 = vadd.f32 %v422_v20, %v381_v44  ;;  %v513_v32 = vadd.f32 %v505_v18, %v468_v2  ;;  %v558_v2 = vld [vmem:[%s6037_s3 + $0x78] sm:$0xff] }
 0x11a   :  { %v467_v49 = vadd.f32 %v457_v7, %v417_v11 }
 0x11b   :  { %v537_v51 = vadd.f32 %v4792_v29, %v513_v32  ;;  %v544_v32 = vld [vmem:[%s6037_s3 + $0x8] sm:$0xff]  ;;  %v549_v29 = vld [vmem:[%s6037_s3 + $0x30] sm:$0xff] }
 0x11c   :  { %v512_v16 = vadd.f32 %v502_v62, %v467_v49  ;;  %v543_v49 = vld [vmem:[%s6037_s3] sm:$0xff] }
 0x11d   :  { %v541_v5 = vmax.f32 %v537_v51, 0.0  ;;  %v546_v51 = vld [vmem:[%s6037_s3 + $0x18] sm:$0xff] }
 0x11e   :  { %v463_v3 = vpop.f32.mrf.mxu2  ;;  %v536_v6 = vadd.f32 %v4843_v24, %v512_v16  ;;  %v552_v24 = vld [vmem:[%s6037_s3 + $0x48] sm:$0xff]  ;;  %v555_v16 = vld [vmem:[%s6037_s3 + $0x60] sm:$0xff] }
 0x11f   :  { %v469_v1 = vadd.f32 %v463_v3, %v423_v47  ;;  %v508_v15 = vpop.f32.mrf.mxu3 }
 0x120   :  { %v454_v12 = vpop.f32.mrf.mxu0  ;;  %v540_v13 = vmax.f32 %v536_v6, 0.0 }
 0x121   :  { %v514_v45 = vadd.f32 %v508_v15, %v469_v1  ;;  %v466_v43 = vadd.f32 %v454_v12, %v414_v9  ;;  %v553_v15 = vld [vmem:[%s6037_s3 + $0x50] sm:$0xff]  ;;  %v556_v12 = vld [vmem:[%s6037_s3 + $0x68] sm:$0xff] }
 0x122   :  { %v557_v1 = vld [vmem:[%s6037_s3 + $0x70] sm:$0xff] }
 0x123   :  { %v538_v55 = vadd.f32 %v4830_v21, %v514_v45  ;;  %v511_v53 = vadd.f32 %v499_v35, %v466_v43  ;;  %v545_v43 = vld [vmem:[%s6037_s3 + $0x10] sm:$0xff]  ;;  %v550_v21 = vld [vmem:[%s6037_s3 + $0x38] sm:$0xff] }
 0x124   :  { %v554_v45 = vld [vmem:[%s6037_s3 + $0x58] sm:$0xff] }
 0x125   :  { %v542_v39 = vmax.f32 %v538_v55, 0.0  ;;  %v535_v11 = vadd.f32 %v4839_v28, %v511_v53  ;;  %v547_v53 = vld [vmem:[%s6037_s3 + $0x20] sm:$0xff]  ;;  %v548_v55 = vld [vmem:[%s6037_s3 + $0x28] sm:$0xff] }
 0x126   :  { %v551_v28 = vld [vmem:[%s6037_s3 + $0x40] sm:$0xff] }
 0x127   :  { %624 = vmatpush.msra.mxu0 %v542_v39  ;;  %v539_v47 = vmax.f32 %v535_v11, 0.0 }
 0x129   :  { %625 = vmatpush.msra.mxu0 %v541_v5 }
 0x12b   :  { %626 = vmatpush.msra.mxu0 %v540_v13 }
 0x12d   :  { %627 = vmatpush.msra.mxu0 %v539_v47 }
 0x12e   :  { %3655 = vmatmul.msk.f32.vlgmr.msra.gmra.mxu0 %vm6085_vm6, %v543_v49 }
 0x136   :  { %3656 = vmatmul.msk.f32.gmra.mxu0 %vm6085_vm6, %v544_v32 }
 0x13e   :  { %3657 = vmatmul.msk.f32.gmra.mxu0 %vm6085_vm6, %v545_v43 }
 0x146   :  { %3658 = vmatmul.msk.f32.gmra.mxu0 %vm6085_vm6, %v546_v51 }
 0x14e   :  { %3659 = vmatmul.msk.f32.gmra.mxu0 %vm6085_vm6, %v547_v53 }
 0x156   :  { %3660 = vmatmul.msk.f32.gmra.mxu0 %vm6085_vm6, %v548_v55 }
 0x15e   :  { %3661 = vmatmul.msk.f32.gmra.mxu0 %vm6085_vm6, %v549_v29 }
 0x166   :  { %3662 = vmatmul.msk.f32.gmra.mxu0 %vm6085_vm6, %v550_v21 }
 0x16e   :  { %3663 = vmatmul.msk.f32.gmra.mxu0 %vm6085_vm6, %v551_v28 }
 0x176   :  { %3664 = vmatmul.msk.f32.gmra.mxu0 %vm6085_vm6, %v552_v24 }
 0x17e   :  { %3665 = vmatmul.msk.f32.gmra.mxu0 %vm6085_vm6, %v553_v15 }
 0x186   :  { %3666 = vmatmul.msk.f32.gmra.mxu0 %vm6085_vm6, %v554_v45 }
 0x18e   :  { %3667 = vmatmul.msk.f32.gmra.mxu0 %vm6085_vm6, %v555_v16 }
 0x196   :  { %3668 = vmatmul.msk.f32.gmra.mxu0 %vm6085_vm6, %v556_v12 }
 0x19e   :  { %3669 = vmatmul.msk.f32.gmra.mxu0 %vm6085_vm6, %v557_v1 }
 0x1a6   :  { %3670 = vmatmul.msk.f32.gmra.mxu0 %vm6085_vm6, %v558_v2 }
 0x1ab   :  { %v629_v9 = vpop.f32.mrf.mxu0 }
 0x1ac   :  { %3683 = vmatmul.msk.f32.vlgmr.msra.gmra.mxu2 %vm6085_vm6, %v629_v9 }
 0x1b3   :  { %v632_v25 = vpop.f32.mrf.mxu0 }
 0x1b4   :  { %3684 = vmatmul.msk.f32.gmra.mxu2 %vm6085_vm6, %v632_v25 }
 0x1bb   :  { %v635_v10 = vpop.f32.mrf.mxu0 }
 0x1bc   :  { %3685 = vmatmul.msk.f32.gmra.mxu2 %vm6085_vm6, %v635_v10 }
 0x1c3   :  { %v638_v35 = vpop.f32.mrf.mxu0 }
 0x1c4   :  { %3686 = vmatmul.msk.f32.gmra.mxu2 %vm6085_vm6, %v638_v35 }
 0x1cb   :  { %v641_v44 = vpop.f32.mrf.mxu0 }
 0x1cc   :  { %3675 = vmatmul.msk.f32.vlgmr.msrb.gmra.mxu1 %vm6085_vm6, %v641_v44 }
 0x1cd   :  { %3719 = vmatpush.msk.msrb.mxu1 %vm4683_vm2, %v6158_v14 }
 0x1cf   :  { %3720 = vmatpush.msk.msrb.mxu1 %vm4702_vm5, %v6158_v14 }
 0x1d3   :  { %v644_v62 = vpop.f32.mrf.mxu0 }
 0x1d4   :  { %3676 = vmatmul.msk.f32.gmra.mxu1 %vm6085_vm6, %v644_v62 }
 0x1db   :  { %v647_v7 = vpop.f32.mrf.mxu0 }
 0x1dc   :  { %3677 = vmatmul.msk.f32.gmra.mxu1 %vm6085_vm6, %v647_v7 }
 0x1e3   :  { %v650_v57 = vpop.f32.mrf.mxu0 }
 0x1e4   :  { %3678 = vmatmul.msk.f32.gmra.mxu1 %vm6085_vm6, %v650_v57 }
 0x1eb   :  { %v653_v18 = vpop.f32.mrf.mxu0 }
 0x1ec   :  { %3691 = vmatmul.msk.f32.vlgmr.msrb.gmra.mxu3 %vm6085_vm6, %v653_v18 }
 0x1ed   :  { %3715 = vmatpush.msk.msrb.mxu3 %vm4603_vm7, %v6158_v14  ;;  %vm6170_vm7 = vcmp.eq.s32.totalorder %v4388_v40, %v4350_v34 }
 0x1ef   :  { %3716 = vmatpush.msk.msrb.mxu3 %vm4622_vm3, %v6158_v14  ;;  %vm6169_vm3 = vcmp.eq.s32.totalorder %v4372_v38, %v4350_v34 }
 0x1f3   :  { %v656_v20 = vpop.f32.mrf.mxu0 }
 0x1f4   :  { %3692 = vmatmul.msk.f32.gmra.mxu3 %vm6085_vm6, %v656_v20 }
 0x1fb   :  { %v659_v3 = vpop.f32.mrf.mxu0 }
 0x1fc   :  { %3693 = vmatmul.msk.f32.gmra.mxu3 %vm6085_vm6, %v659_v3 }
 0x203   :  { %v662_v39 = vpop.f32.mrf.mxu0 }
 0x204   :  { %3694 = vmatmul.msk.f32.gmra.mxu3 %vm6085_vm6, %v662_v39 }
 0x20b   :  { %v665_v6 = vpop.f32.mrf.mxu0 }
 0x20c   :  { %3699 = vmatmul.msk.f32.vlgmr.msra.gmra.mxu1 %vm6085_vm6, %v665_v6 }
 0x213   :  { %v668_v5 = vpop.f32.mrf.mxu0 }
 0x214   :  { %3700 = vmatmul.msk.f32.gmra.mxu1 %vm6085_vm6, %v668_v5 }
 0x21b   :  { %v671_v11 = vpop.f32.mrf.mxu0 }
 0x21c   :  { %3701 = vmatmul.msk.f32.gmra.mxu1 %vm6085_vm6, %v671_v11 }
 0x223   :  { %v674_v13 = vpop.f32.mrf.mxu0 }
 0x224   :  { %3702 = vmatmul.msk.f32.gmra.mxu1 %vm6085_vm6, %v674_v13 }
 0x22f   :  { %v747_v43 = vpop.f32.mrf.mxu2 }
 0x237   :  { %v750_v55 = vpop.f32.mrf.mxu2 }
 0x23f   :  { %v753_v24 = vpop.f32.mrf.mxu2 }
 0x247   :  { %v756_v12 = vpop.f32.mrf.mxu2 }
 0x249   :  { %v706_v47 = vpop.f32.mrf.mxu1 }
 0x24a   :  { %v748_v10 = vadd.f32 %v747_v43, %v706_v47  ;;  %v877_v43 = vld [vmem:[%s6039_s5] sm:$0xff] }
 0x251   :  { %v709_v49 = vpop.f32.mrf.mxu1 }
 0x252   :  { %v751_v2 = vadd.f32 %v750_v55, %v709_v49  ;;  %v884_v55 = vld [vmem:[%s6039_s5 + $0x38] sm:$0xff] }
 0x259   :  { %v712_v32 = vpop.f32.mrf.mxu1 }
 0x25a   :  { %v754_v16 = vadd.f32 %v753_v24, %v712_v32 }
 0x261   :  { %v715_v53 = vpop.f32.mrf.mxu1 }
 0x262   :  { %v757_v9 = vadd.f32 %v756_v12, %v715_v53  ;;  %v883_v53 = vld [vmem:[%s6039_s5 + $0x30] sm:$0xff] }
 0x26f   :  { %v788_v51 = vpop.f32.mrf.mxu3 }
 0x270   :  { %v800_v57 = vadd.f32 %v788_v51, %v748_v10  ;;  %v882_v51 = vld [vmem:[%s6039_s5 + $0x28] sm:$0xff] }
 0x277   :  { %v791_v29 = vpop.f32.mrf.mxu3 }
 0x278   :  { %v801_v35 = vadd.f32 %v791_v29, %v751_v2 }
 0x27f   :  { %v794_v15 = vpop.f32.mrf.mxu3 }
 0x280   :  { %v802_v25 = vadd.f32 %v794_v15, %v754_v16 }
 0x287   :  { %v797_v1 = vpop.f32.mrf.mxu3 }
 0x288   :  { %v803_v44 = vadd.f32 %v797_v1, %v757_v9 }
 0x289   :  { %v833_v21 = vpop.f32.mrf.mxu1 }
 0x28a   :  { %v845_v3 = vadd.f32 %v833_v21, %v800_v57 }
 0x28c   :  { %v869_v13 = vadd.f32 %v4818_v22, %v845_v3  ;;  %v879_v22 = vld [vmem:[%s6039_s5 + $0x10] sm:$0xff] }
 0x28e   :  { %v873_v32 = vmax.f32 %v869_v13, 0.0 }
 0x291   :  { %v836_v28 = vpop.f32.mrf.mxu1 }
 0x292   :  { %v846_v18 = vadd.f32 %v836_v28, %v801_v35 }
 0x294   :  { %v870_v5 = vadd.f32 %v4848_v4, %v846_v18  ;;  %v880_v4 = vld [vmem:[%s6039_s5 + $0x18] sm:$0xff] }
 0x296   :  { %v874_v47 = vmax.f32 %v870_v5, 0.0 }
 0x299   :  { %v839_v45 = vpop.f32.mrf.mxu1 }
 0x29a   :  { %v847_v62 = vadd.f32 %v839_v45, %v802_v25 }
 0x29c   :  { %v871_v39 = vadd.f32 %v4852_v37, %v847_v62  ;;  %v881_v37 = vld [vmem:[%s6039_s5 + $0x20] sm:$0xff] }
 0x29e   :  { %v875_v49 = vmax.f32 %v871_v39, 0.0 }
 0x2a1   :  { %v842_v7 = vpop.f32.mrf.mxu1 }
 0x2a2   :  { %v848_v20 = vadd.f32 %v842_v7, %v803_v44 }
 0x2a4   :  { %v872_v6 = vadd.f32 %v4806_v17, %v848_v20  ;;  %v878_v17 = vld [vmem:[%s6039_s5 + $0x8] sm:$0xff] }
 0x2a6   :  { %v876_v11 = vmax.f32 %v872_v6, 0.0 }
 0x2a8   :  { %923 = vmatpush.msrb.mxu2 %v876_v11 }
 0x2aa   :  { %924 = vmatpush.msrb.mxu2 %v875_v49  ;;  %v1087_v49 = vld [vmem:[%s6041_s7] sm:$0xff] }
 0x2ac   :  { %925 = vmatpush.msrb.mxu2 %v874_v47  ;;  %v1088_v47 = vld [vmem:[%s6041_s7 + $0x8] sm:$0xff] }
 0x2ae   :  { %926 = vmatpush.msrb.mxu2 %v873_v32  ;;  %v1091_v32 = vld [vmem:[%s6041_s7 + $0x20] sm:$0xff] }
 0x2af   :  { %3703 = vmatmul.msk.f32.vlgmr.msrb.gmra.mxu2 %vm6085_vm6, %v877_v43  ;;  %v1092_v43 = vld [vmem:[%s6041_s7 + $0x28] sm:$0xff] }
 0x2b7   :  { %3704 = vmatmul.msk.f32.gmra.mxu2 %vm6085_vm6, %v878_v17  ;;  %v1093_v17 = vld [vmem:[%s6041_s7 + $0x30] sm:$0xff] }
 0x2bf   :  { %3705 = vmatmul.msk.f32.gmra.mxu2 %vm6085_vm6, %v879_v22  ;;  %v1094_v22 = vld [vmem:[%s6041_s7 + $0x38] sm:$0xff] }
 0x2c7   :  { %3706 = vmatmul.msk.f32.gmra.mxu2 %vm6085_vm6, %v880_v4  ;;  %v1095_v4 = vld [vmem:[%s6041_s7 + $0x40] sm:$0xff] }
 0x2cf   :  { %3707 = vmatmul.msk.f32.gmra.mxu2 %vm6085_vm6, %v881_v37  ;;  %v1096_v37 = vld [vmem:[%s6041_s7 + $0x48] sm:$0xff] }
 0x2d7   :  { %3708 = vmatmul.msk.f32.gmra.mxu2 %vm6085_vm6, %v882_v51  ;;  %v1097_v51 = vld [vmem:[%s6041_s7 + $0x50] sm:$0xff] }
 0x2df   :  { %3709 = vmatmul.msk.f32.gmra.mxu2 %vm6085_vm6, %v883_v53  ;;  %v1098_v53 = vld [vmem:[%s6041_s7 + $0x58] sm:$0xff] }
 0x2e7   :  { %3710 = vmatmul.msk.f32.gmra.mxu2 %vm6085_vm6, %v884_v55  ;;  %v158_v55 = vmul.u32 2, %v4341_v31  ;;  %v1100_v31 = vld [vmem:[%s6041_s7 + $0x68] sm:$0xff] }
 0x2e9   :  { %vm5120_vm6 = vcmp.eq.s32.totalorder %v4337_v30, %v158_v55 }
 0x332   :  { %v928_v29 = vpop.f32.mrf.mxu2 }
 0x33a   :  { %v931_v21 = vpop.f32.mrf.mxu2 }
 0x342   :  { %v934_v28 = vpop.f32.mrf.mxu2 }
 0x343   :  { %3713 = vmatmul.msk.f32.vlgmr.msra.gmra.mxu3 %vm6086_vm15, %v934_v28  ;;  %v6159_v28 = vmov 0 }
 0x344   :  { %3723 = vmatpush.msk.msra.mxu3 %vm4521_vm9, %v6158_v14 }
 0x346   :  { %3724 = vmatpush.msk.msra.mxu3 %vm4549_vm4, %v6158_v14 }
 0x34a   :  { %v937_v24 = vpop.f32.mrf.mxu2 }
 0x34b   :  { %3714 = vmatmul.msk.f32.gmra.mxu3 %vm6086_vm15, %v937_v24  ;;  %v1101_v24 = vld [vmem:[%s6041_s7 + $0x70] sm:$0xff] }
 0x352   :  { %v940_v15 = vpop.f32.mrf.mxu2 }
 0x353   :  { %3717 = vmatmul.msk.f32.vlgmr.msrb.gmra.mxu3 %vm6086_vm15, %v928_v29  ;;  %3721 = vmatmul.msk.f32.vlgmr.msrb.gmra.mxu1 %vm6086_vm15, %v940_v15  ;;  %v159_v29 = vadd.s32 4294967295, %v158_v55  ;;  %v1102_v15 = vld [vmem:[%s6041_s7 + $0x78] sm:$0xff] }
 0x354   :  { %3743 = vmatpush.msk.msrb.mxu3 %vm5120_vm6, %v6158_v14 }
 0x355   :  { %vm5099_vm13 = vcmp.eq.s32.totalorder %v4337_v30, %v159_v29 }
 0x356   :  { %v6160_v28 = vsel %vm5099_vm13, 4294967295, %v6159_v28  ;;  %3748 = vmatpush.msk.msra.mxu2 %vm5099_vm13, %v6158_v14 }
 0x35a   :  { %v943_v45 = vpop.f32.mrf.mxu2 }
 0x35b   :  { %3718 = vmatmul.msk.f32.gmra.mxu3 %vm6086_vm15, %v931_v21  ;;  %3722 = vmatmul.msk.f32.gmra.mxu1 %vm6086_vm15, %v943_v45  ;;  %v1099_v21 = vld [vmem:[%s6041_s7 + $0x60] sm:$0xff] }
 0x362   :  { %v946_v16 = vpop.f32.mrf.mxu2 }
 0x363   :  { %3725 = vmatmul.msk.f32.vlgmr.msra.gmra.mxu3 %vm6086_vm15, %v946_v16 }
 0x36a   :  { %v949_v12 = vpop.f32.mrf.mxu2 }
 0x36b   :  { %3726 = vmatmul.msk.f32.gmra.mxu3 %vm6086_vm15, %v949_v12 }
 0x3c6   :  { %v976_v1 = vpop.f32.mrf.mxu3 }
 0x3ce   :  { %v979_v2 = vpop.f32.mrf.mxu3 }
 0x3d0   :  { %v1034_v10 = vpop.f32.mrf.mxu1 }
 0x3d6   :  { %v1005_v9 = vpop.f32.mrf.mxu3 }
 0x3d7   :  { %v1006_v44 = vadd.f32 %v1005_v9, %v976_v1  ;;  %v166_v9 = vadd.s32 1, %v158_v55 }
 0x3d8   :  { %v1037_v57 = vpop.f32.mrf.mxu1 }
 0x3d9   :  { %v1040_v7 = vadd.f32 %v1034_v10, %v1006_v44 }
 0x3de   :  { %v1008_v25 = vpop.f32.mrf.mxu3 }
 0x3df   :  { %v1009_v62 = vadd.f32 %v1008_v25, %v979_v2 }
 0x3e1   :  { %v1041_v20 = vadd.f32 %v1037_v57, %v1009_v62  ;;  %v6165_v57 = vmov 0 }
 0x3e6   :  { %v1065_v35 = vpop.f32.mrf.mxu3 }
 0x3e7   :  { %v1071_v18 = vadd.f32 %v1065_v35, %v1040_v7  ;;  %v170_v7 = vadd.s32 2, %v158_v55 }
 0x3e9   :  { %v1083_v6 = vadd.f32 %v4856_v27, %v1071_v18  ;;  %v1089_v27 = vld [vmem:[%s6041_s7 + $0x10] sm:$0xff]  ;;  %vm5144_vm11 = vcmp.eq.s32.totalorder %v4337_v30, %v170_v7 }
 0x3ea   :  { %v6166_v57 = vsel %vm5144_vm11, 4294967295, %v6165_v57  ;;  %3758 = vmatpush.msk.msrb.mxu0 %vm5144_vm11, %v6158_v14  ;;  %vm6174_vm11 = vcmp.eq.s32.totalorder %v4469_v48, %v4350_v34 }
 0x3eb   :  { %v1085_v13 = vmax.f32 %v1083_v6, 0.0 }
 0x3ee   :  { %v1068_v3 = vpop.f32.mrf.mxu3 }
 0x3ef   :  { %v1072_v39 = vadd.f32 %v1068_v3, %v1041_v20 }
 0x3f1   :  { %v1084_v5 = vadd.f32 %v4860_v46, %v1072_v39  ;;  %v1090_v46 = vld [vmem:[%s6041_s7 + $0x18] sm:$0xff] }
 0x3f3   :  { %v1086_v11 = vmax.f32 %v1084_v5, 0.0 }
 0x3f5   :  { %1169 = vmatpush.msra.mxu1 %v1086_v11 }
 0x3f7   :  { %1170 = vmatpush.msra.mxu1 %v1085_v13 }
 0x3f8   :  { %3727 = vmatmul.msk.f32.vlgmr.msra.gmra.mxu1 %vm6086_vm15, %v1087_v49 }
 0x400   :  { %3728 = vmatmul.msk.f32.gmra.mxu1 %vm6086_vm15, %v1088_v47 }
 0x408   :  { %3729 = vmatmul.msk.f32.gmra.mxu1 %vm6086_vm15, %v1089_v27 }
 0x410   :  { %3730 = vmatmul.msk.f32.gmra.mxu1 %vm6086_vm15, %v1090_v46 }
 0x418   :  { %3731 = vmatmul.msk.f32.gmra.mxu1 %vm6086_vm15, %v1091_v32 }
 0x420   :  { %3732 = vmatmul.msk.f32.gmra.mxu1 %vm6086_vm15, %v1092_v43 }
 0x428   :  { %3733 = vmatmul.msk.f32.gmra.mxu1 %vm6086_vm15, %v1093_v17 }
 0x430   :  { %3734 = vmatmul.msk.f32.gmra.mxu1 %vm6086_vm15, %v1094_v22 }
 0x438   :  { %3735 = vmatmul.msk.f32.gmra.mxu1 %vm6086_vm15, %v1095_v4 }
 0x440   :  { %3736 = vmatmul.msk.f32.gmra.mxu1 %vm6086_vm15, %v1096_v37 }
 0x448   :  { %3737 = vmatmul.msk.f32.gmra.mxu1 %vm6086_vm15, %v1097_v51 }
 0x450   :  { %3738 = vmatmul.msk.f32.gmra.mxu1 %vm6086_vm15, %v1098_v53 }
 0x458   :  { %3739 = vmatmul.msk.f32.gmra.mxu1 %vm6086_vm15, %v1099_v21 }
 0x460   :  { %3740 = vmatmul.msk.f32.gmra.mxu1 %vm6086_vm15, %v1100_v31 }
 0x468   :  { %3741 = vmatmul.msk.f32.gmra.mxu1 %vm6086_vm15, %v1101_v24 }
 0x470   :  { %3742 = vmatmul.msk.f32.gmra.mxu1 %vm6086_vm15, %v1102_v15  ;;  %vm5132_vm15 = vcmp.eq.s32.totalorder %v4337_v30, %v166_v9 }
 0x471   :  { %3753 = vmatpush.msk.msra.mxu3 %vm5132_vm15, %v6158_v14 }
 0x475   :  { %v1172_v45 = vpop.f32.mrf.mxu1 }
 0x476   :  { %3749 = vmatmul.msk.f32.vlgmr.msra.gmra.mxu2 %vm6089_vm10, %v1172_v45 }
 0x47d   :  { %v1175_v12 = vpop.f32.mrf.mxu1 }
 0x47e   :  { %3750 = vmatmul.msk.f32.gmra.mxu2 %vm6089_vm10, %v1175_v12 }
 0x485   :  { %v1178_v1 = vpop.f32.mrf.mxu1 }
 0x486   :  { %3751 = vmatmul.msk.f32.gmra.mxu2 %vm6089_vm10, %v1178_v1 }
 0x48d   :  { %v1181_v2 = vpop.f32.mrf.mxu1 }
 0x48e   :  { %3752 = vmatmul.msk.f32.gmra.mxu2 %vm6089_vm10, %v1181_v2 }
 0x495   :  { %v1184_v25 = vpop.f32.mrf.mxu1 }
 0x496   :  { %3744 = vmatmul.msk.f32.vlgmr.msrb.gmra.mxu3 %vm6089_vm10, %v1184_v25 }
 0x49d   :  { %v1187_v35 = vpop.f32.mrf.mxu1 }
 0x49e   :  { %3745 = vmatmul.msk.f32.gmra.mxu3 %vm6089_vm10, %v1187_v35 }
 0x4a5   :  { %v1190_v44 = vpop.f32.mrf.mxu1 }
 0x4a6   :  { %3746 = vmatmul.msk.f32.gmra.mxu3 %vm6089_vm10, %v1190_v44 }
 0x4ad   :  { %v1193_v62 = vpop.f32.mrf.mxu1 }
 0x4ae   :  { %3747 = vmatmul.msk.f32.gmra.mxu3 %vm6089_vm10, %v1193_v62 }
 0x4b5   :  { %v1196_v18 = vpop.f32.mrf.mxu1 }
 0x4b6   :  { %3754 = vmatmul.msk.f32.vlgmr.msra.gmra.mxu3 %vm6089_vm10, %v1196_v18 }
 0x4bd   :  { %v1199_v20 = vpop.f32.mrf.mxu1 }
 0x4be   :  { %3755 = vmatmul.msk.f32.gmra.mxu3 %vm6089_vm10, %v1199_v20 }
 0x4c5   :  { %v1202_v3 = vpop.f32.mrf.mxu1 }
 0x4c6   :  { %3756 = vmatmul.msk.f32.gmra.mxu3 %vm6089_vm10, %v1202_v3 }
 0x4cd   :  { %v1205_v39 = vpop.f32.mrf.mxu1 }
 0x4ce   :  { %3757 = vmatmul.msk.f32.gmra.mxu3 %vm6089_vm10, %v1205_v39 }
 0x4d5   :  { %v1208_v6 = vpop.f32.mrf.mxu1 }
 0x4d6   :  { %3759 = vmatmul.msk.f32.vlgmr.msrb.gmra.mxu0 %vm6089_vm10, %v1208_v6 }
 0x4dd   :  { %v1211_v5 = vpop.f32.mrf.mxu1 }
 0x4de   :  { %3760 = vmatmul.msk.f32.gmra.mxu0 %vm6089_vm10, %v1211_v5 }
 0x4e5   :  { %v1214_v11 = vpop.f32.mrf.mxu1 }
 0x4e6   :  { %3761 = vmatmul.msk.f32.gmra.mxu0 %vm6089_vm10, %v1214_v11 }
 0x4ed   :  { %v1217_v13 = vpop.f32.mrf.mxu1 }
 0x4ee   :  { %3762 = vmatmul.msk.f32.gmra.mxu0 %vm6089_vm10, %v1217_v13  ;;  %vm6167_vm10 = vcmask 261120  }
 0x4f9   :  { %v1291_v32 = vpop.f32.mrf.mxu2 }
 0x501   :  { %v1294_v17 = vpop.f32.mrf.mxu2 }
 0x509   :  { %v1297_v51 = vpop.f32.mrf.mxu2 }
 0x511   :  { %v1300_v21 = vpop.f32.mrf.mxu2 }
 0x519   :  { %v1250_v49 = vpop.f32.mrf.mxu3 }
 0x51a   :  { %v1292_v12 = vadd.f32 %v1291_v32, %v1250_v49  ;;  %v1421_v49 = vld [vmem:[%s6043_s9] sm:$0xff] }
 0x51b   :  { %v1429_v32 = vld [vmem:[%s6043_s9 + $0x40] sm:$0xff] }
 0x521   :  { %v1253_v47 = vpop.f32.mrf.mxu3 }
 0x522   :  { %v1295_v24 = vadd.f32 %v1294_v17, %v1253_v47  ;;  %v1426_v47 = vld [vmem:[%s6043_s9 + $0x28] sm:$0xff]  ;;  %v1431_v17 = vld [vmem:[%s6043_s9 + $0x50] sm:$0xff] }
 0x529   :  { %v1256_v27 = vpop.f32.mrf.mxu3 }
 0x52a   :  { %v1298_v29 = vadd.f32 %v1297_v51, %v1256_v27  ;;  %v1427_v27 = vld [vmem:[%s6043_s9 + $0x30] sm:$0xff] }
 0x531   :  { %v1259_v46 = vpop.f32.mrf.mxu3 }
 0x532   :  { %v1301_v15 = vadd.f32 %v1300_v21, %v1259_v46  ;;  %v1428_v46 = vld [vmem:[%s6043_s9 + $0x38] sm:$0xff] }
 0x533   :  { %v6263_v21 = vld [vmem:[#allocation17_spill] sm:$0xff] }
 0x539   :  { %v1332_v43 = vpop.f32.mrf.mxu3 }
 0x53a   :  { %v1344_v35 = vadd.f32 %v1332_v43, %v1292_v12  ;;  %v1430_v43 = vld [vmem:[%s6043_s9 + $0x48] sm:$0xff] }
 0x541   :  { %v1335_v22 = vpop.f32.mrf.mxu3 }
 0x542   :  { %v1345_v1 = vadd.f32 %v1335_v22, %v1295_v24  ;;  %v1432_v22 = vld [vmem:[%s6043_s9 + $0x58] sm:$0xff] }
 0x549   :  { %v1338_v53 = vpop.f32.mrf.mxu3 }
 0x54a   :  { %v1346_v45 = vadd.f32 %v1338_v53, %v1298_v29  ;;  %v1435_v53 = vld [vmem:[%s6043_s9 + $0x70] sm:$0xff]  ;;  %v2000_v29 = vmul.f32 %v4865_v36, %v4858_v8 }
 0x551   :  { %v1341_v31 = vpop.f32.mrf.mxu3 }
 0x552   :  { %v1347_v2 = vadd.f32 %v1341_v31, %v1301_v15  ;;  %v1973_v31 = vpop.permute.xlu0 %1972 }
 0x553   :  { %v1377_v4 = vpop.f32.mrf.mxu0  ;;  %v2001_v8 = vmul.f32 %v4865_v36, %v1973_v31 }
 0x554   :  { %v1389_v7 = vadd.f32 %v1377_v4, %v1344_v35  ;;  %v1433_v4 = vld [vmem:[%s6043_s9 + $0x60] sm:$0xff] }
 0x556   :  { %v1413_v6 = vadd.f32 %v4841_v26, %v1389_v7  ;;  %v1423_v26 = vld [vmem:[%s6043_s9 + $0x10] sm:$0xff] }
 0x558   :  { %v1417_v13 = vmax.f32 %v1413_v6, 0.0 }
 0x55b   :  { %v1380_v37 = vpop.f32.mrf.mxu0 }
 0x55c   :  { %v1390_v44 = vadd.f32 %v1380_v37, %v1345_v1  ;;  %v5257_v37 = vmul.u32 2, %v4494_v50  ;;  %v1434_v50 = vld [vmem:[%s6043_s9 + $0x68] sm:$0xff] }
 0x55e   :  { %v1414_v3 = vadd.f32 %v4867_v19, %v1390_v44  ;;  %v1424_v19 = vld [vmem:[%s6043_s9 + $0x18] sm:$0xff]  ;;  %v5260_v51 = vadd.s32 4294967295, %v5257_v37  ;;  %v5313_v44 = vadd.s32 1, %v5257_v37 }
 0x560   :  { %v1418_v11 = vmax.f32 %v1414_v3, 0.0  ;;  %v5329_v3 = vadd.s32 2, %v5257_v37 }
 0x563   :  { %v1383_v55 = vpop.f32.mrf.mxu0 }
 0x564   :  { %v1391_v9 = vadd.f32 %v1383_v55, %v1346_v45  ;;  %v1436_v55 = vld [vmem:[%s6043_s9 + $0x78] sm:$0xff]  ;;  %v1978_v45 = vpop.permute.xlu1 %1977 }
 0x565   :  { %v2002_v1 = vmul.f32 %v4865_v36, %v1978_v45 }
 0x566   :  { %v1415_v18 = vadd.f32 %v4869_v56, %v1391_v9  ;;  %v1425_v56 = vld [vmem:[%s6043_s9 + $0x20] sm:$0xff] }
 0x568   :  { %v1419_v5 = vmax.f32 %v1415_v18, 0.0 }
 0x56b   :  { %v1386_v25 = vpop.f32.mrf.mxu0 }
 0x56c   :  { %v1392_v62 = vadd.f32 %v1386_v25, %v1347_v2  ;;  %v1983_v2 = vpop.permute.xlu2 %1982 }
 0x56d   :  { %v2003_v25 = vmul.f32 %v4865_v36, %v1983_v2 }
 0x56e   :  { %v1416_v20 = vadd.f32 %v4832_v23, %v1392_v62  ;;  %v1422_v23 = vld [vmem:[%s6043_s9 + $0x8] sm:$0xff] }
 0x570   :  { %v1420_v39 = vmax.f32 %v1416_v20, 0.0 }
 0x572   :  { %1501 = vmatpush.msrb.mxu2 %v1420_v39  ;;  %v6202_v39 = vld [vmem:[#allocation12_spill] sm:$0xff] }
 0x574   :  { %1502 = vmatpush.msrb.mxu2 %v1419_v5 }
 0x576   :  { %1503 = vmatpush.msrb.mxu2 %v1418_v11 }
 0x578   :  { %1504 = vmatpush.msrb.mxu2 %v1417_v13 }
 0x579   :  { %3763 = vmatmul.msk.f32.vlgmr.msrb.gmra.mxu2 %vm6167_vm10, %v1421_v49  ;;  %vm6171_vm10 = vcmp.eq.s32.totalorder %v4409_v41, %v4350_v34 }
 0x57a   :  { %3861 = vmatpush.msk.msra.mxu2 %vm6168_vm8, %v6158_v14  ;;  %vm6172_vm8 = vcmask 261120  }
 0x57c   :  { %3862 = vmatpush.msk.msra.mxu2 %vm6169_vm3, %v6158_v14  ;;  %vm6173_vm3 = vcmp.eq.s32.totalorder %v4428_v42, %v4350_v34 }
 0x57e   :  { %3863 = vmatpush.msk.msra.mxu2 %vm6170_vm7, %v6158_v14  ;;  %vm6175_vm7 = vmmov %vm6172_vm8 }
 0x580   :  { %3864 = vmatpush.msk.msra.mxu2 %vm6171_vm10, %v6158_v14  ;;  %vm6177_vm10 = vmmov %vm6175_vm7 }
 0x581   :  { %3764 = vmatmul.msk.f32.gmra.mxu2 %vm6172_vm8, %v1422_v23  ;;  %vm6178_vm8 = vmmov %vm6175_vm7 }
 0x582   :  { %3865 = vmatpush.msk.msra.mxu2 %vm6173_vm3, %v6158_v14  ;;  %vm6179_vm3 = vmmov %vm6175_vm7 }
 0x584   :  { %3866 = vmatpush.msk.msra.mxu2 %vm6174_vm11, %v6158_v14  ;;  %vm6176_vm11 = vmmov %vm6175_vm7 }
 0x586   :  { %3867 = vmatpush.msk.msra.mxu2 %vm4521_vm9, %v6158_v14 }
 0x588   :  { %3868 = vmatpush.msk.msra.mxu2 %vm4549_vm4, %v6158_v14 }
 0x589   :  { %3765 = vmatmul.msk.f32.gmra.mxu2 %vm6175_vm7, %v1423_v26  ;;  %vm6180_vm7 = vmmov %vm6179_vm3 }
 0x58a   :  { %3905 = vmatpush.msk.msrb.mxu2 %vm4639_vm1, %v6158_v14 }
 0x58c   :  { %3906 = vmatpush.msk.msrb.mxu2 %vm4664_vm0, %v6158_v14 }
 0x58e   :  { %3907 = vmatpush.msk.msrb.mxu2 %vm4683_vm2, %v6158_v14 }
 0x590   :  { %3908 = vmatpush.msk.msrb.mxu2 %vm4702_vm5, %v6158_v14 }
 0x591   :  { %3766 = vmatmul.msk.f32.gmra.mxu2 %vm6176_vm11, %v1424_v19  ;;  %vm6181_vm11 = vmmov %vm6179_vm3  ;;  %v6218_v19 = vld [vmem:[#allocation14_spill] sm:$0xff] }
 0x599   :  { %3767 = vmatmul.msk.f32.gmra.mxu2 %vm6177_vm10, %v1425_v56  ;;  %vm6182_vm10 = vmmov %vm6179_vm3  ;;  %v1953_v56 = vpop.permute.xlu0 %1952 }
 0x5a1   :  { %3768 = vmatmul.msk.f32.gmra.mxu2 %vm6178_vm8, %v1426_v47  ;;  %vm6183_vm8 = vmmov %vm6179_vm3  ;;  %v1997_v47 = vmul.f32 %v4865_v36, %v1953_v56  ;;  %v6224_v56 = vld [vmem:[#allocation16_spill] sm:$0xff] }
 0x5a9   :  { %3769 = vmatmul.msk.f32.gmra.mxu2 %vm6179_vm3, %v1427_v27  ;;  %v1958_v27 = vpop.permute.xlu1 %1957 }
 0x5b1   :  { %3770 = vmatmul.msk.f32.gmra.mxu2 %vm6180_vm7, %v1428_v46  ;;  %vm6184_vm7 = vmmov %vm6179_vm3  ;;  %v1998_v46 = vmul.f32 %v4865_v36, %v1958_v27 }
 0x5b9   :  { %3771 = vmatmul.msk.f32.gmra.mxu2 %vm6181_vm11, %v1429_v32  ;;  %vm6098_vm11 = vcmp.eq.s32.totalorder %v4337_v30, %v5260_v51  ;;  %v1963_v32 = vpop.permute.xlu1 %1962 }
 0x5ba   :  { %3785 = vmatpush.msk.msra.mxu0 %vm6098_vm11, %v6158_v14 }
 0x5bc   :  { %3786 = vmatpush.msk.msra.mxu0 %vm5099_vm13, %v6158_v14 }
 0x5c1   :  { %3772 = vmatmul.msk.f32.gmra.mxu2 %vm6182_vm10, %v1430_v43  ;;  %vm6185_vm10 = vmmov %vm6179_vm3  ;;  %v1999_v43 = vmul.f32 %v4865_v36, %v1963_v32 }
 0x5c9   :  { %3773 = vmatmul.msk.f32.gmra.mxu2 %vm6183_vm8, %v1431_v17  ;;  %vm6186_vm8 = vmmov %vm6179_vm3 }
 0x5d1   :  { %3774 = vmatmul.msk.f32.gmra.mxu2 %vm6179_vm3, %v1432_v22 }
 0x5d9   :  { %3775 = vmatmul.msk.f32.gmra.mxu2 %vm6184_vm7, %v1433_v4  ;;  %vm6099_vm7 = vcmp.eq.s32.totalorder %v4337_v30, %v5257_v37 }
 0x5da   :  { %3779 = vmatpush.msk.msrb.mxu3 %vm6099_vm7, %v6158_v14 }
 0x5dc   :  { %3780 = vmatpush.msk.msrb.mxu3 %vm5120_vm6, %v6158_v14 }
 0x5e1   :  { %3776 = vmatmul.msk.f32.gmra.mxu2 %vm6185_vm10, %v1434_v50  ;;  %vm6187_vm10 = vcmask 523264  }
 0x5e9   :  { %3777 = vmatmul.msk.f32.gmra.mxu2 %vm6186_vm8, %v1435_v53  ;;  %vm6190_vm8 = vcmask 130048  }
 0x5ea   :  { %vm6192_vm11 = vmmov %vm6190_vm8 }
 0x5eb   :  { %vm6194_vm7 = vmmov %vm6190_vm8 }
 0x5f1   :  { %3778 = vmatmul.msk.f32.gmra.mxu2 %vm6179_vm3, %v1436_v55  ;;  %vm6191_vm3 = vmmov %vm6187_vm10 }
 0x5f2   :  { %vm6195_vm4 = vmmov %vm6191_vm3 }
 0x5f9   :  { %3869 = vmatmul.msk.f32.vlgmr.msra.gmra.mxu2 %vm6187_vm10, %v2000_v29  ;;  %vm6193_vm10 = vmmov %vm6191_vm3 }
 0x5fa   :  { %3929 = vmatpush.msk.msra.mxu2 %vm4509_vm14, %v6158_v14 }
 0x5fc   :  { %v1506_v24 = vpop.f32.mrf.mxu2  ;;  %3930 = vmatpush.msk.msra.mxu2 %vm4537_vm12, %v6158_v14 }
 0x5fd   :  { %3787 = vmatmul.msk.f32.vlgmr.msra.gmra.mxu0 %vm6190_vm8, %v1506_v24  ;;  %vm6196_vm8 = vmmov %vm6194_vm7 }
 0x601   :  { %3870 = vmatmul.msk.f32.gmra.mxu2 %vm6191_vm3, %v2001_v8 }
 0x604   :  { %v1509_v12 = vpop.f32.mrf.mxu2 }
 0x605   :  { %3788 = vmatmul.msk.f32.gmra.mxu0 %vm6192_vm11, %v1509_v12  ;;  %vm6103_vm11 = vcmp.eq.s32.totalorder %v4337_v30, %v5313_v44 }
 0x606   :  { %3791 = vmatpush.msk.msra.mxu3 %vm6103_vm11, %v6158_v14  ;;  %vm6206_vm11 = vcmp.eq.s32.totalorder %v4409_v41, %v6202_v39 }
 0x608   :  { %3792 = vmatpush.msk.msra.mxu3 %vm5132_vm15, %v6158_v14 }
 0x609   :  { %3871 = vmatmul.msk.f32.gmra.mxu2 %vm6193_vm10, %v2002_v1 }
 0x60c   :  { %v1512_v9 = vpop.f32.mrf.mxu2 }
 0x60d   :  { %3789 = vmatmul.msk.f32.gmra.mxu0 %vm6194_vm7, %v1512_v9 }
 0x611   :  { %3872 = vmatmul.msk.f32.gmra.mxu2 %vm6195_vm4, %v2003_v25  ;;  %vm6197_vm4 = vmmov %vm6194_vm7 }
 0x612   :  { %vm6198_vm7 = vmmov %vm6197_vm4 }
 0x613   :  { %vm6199_vm3 = vmmov %vm6197_vm4 }
 0x614   :  { %v1515_v35 = vpop.f32.mrf.mxu2  ;;  %vm6200_vm10 = vmmov %vm6199_vm3 }
 0x615   :  { %3790 = vmatmul.msk.f32.gmra.mxu0 %vm6196_vm8, %v1515_v35  ;;  %vm6102_vm8 = vcmp.eq.s32.totalorder %v4337_v30, %v5329_v3 }
 0x616   :  { %3797 = vmatpush.msk.msrb.mxu0 %vm6102_vm8, %v6158_v14  ;;  %vm6205_vm8 = vcmp.eq.s32.totalorder %v4388_v40, %v6202_v39 }
 0x61c   :  { %v1518_v62 = vpop.f32.mrf.mxu2 }
 0x61d   :  { %3781 = vmatmul.msk.f32.vlgmr.msrb.gmra.mxu3 %vm6197_vm4, %v1518_v62  ;;  %vm6201_vm4 = vnez %v6166_v57 }
 0x61e   :  { %3798 = vmatpush.msk.msrb.mxu0 %vm6201_vm4, %v6158_v14 }
 0x624   :  { %v1521_v7 = vpop.f32.mrf.mxu2 }
 0x625   :  { %3782 = vmatmul.msk.f32.gmra.mxu3 %vm6198_vm7, %v1521_v7  ;;  %vm6203_vm7 = vcmp.eq.s32.totalorder %v4347_v33, %v6202_v39 }
 0x626   :  { %3849 = vmatpush.msk.msra.mxu0 %vm6203_vm7, %v6158_v14  ;;  %vm6207_vm7 = vmmov %vm6199_vm3 }
 0x62c   :  { %v1524_v18 = vpop.f32.mrf.mxu2 }
 0x62d   :  { %3783 = vmatmul.msk.f32.gmra.mxu3 %vm6199_vm3, %v1524_v18 }
 0x634   :  { %v1527_v20 = vpop.f32.mrf.mxu2 }
 0x635   :  { %3784 = vmatmul.msk.f32.gmra.mxu3 %vm6200_vm10, %v1527_v20  ;;  %vm6204_vm10 = vcmp.eq.s32.totalorder %v4372_v38, %v6202_v39 }
 0x636   :  { %3850 = vmatpush.msk.msra.mxu0 %vm6204_vm10, %v6158_v14  ;;  %vm6214_vm10 = vnez %v6135_v58 }
 0x638   :  { %3851 = vmatpush.msk.msra.mxu0 %vm6205_vm8, %v6158_v14 }
 0x63a   :  { %3852 = vmatpush.msk.msra.mxu0 %vm6206_vm11, %v6158_v14  ;;  %vm6208_vm11 = vmmov %vm6199_vm3 }
 0x63c   :  { %v1530_v6 = vpop.f32.mrf.mxu2  ;;  %3853 = vmatpush.msk.msra.mxu0 %vm4639_vm1, %v6158_v14  ;;  %vm6209_vm1 = vmmov %vm6199_vm3 }
 0x63d   :  { %3793 = vmatmul.msk.f32.vlgmr.msra.gmra.mxu3 %vm6199_vm3, %v1530_v6  ;;  %vm6210_vm8 = vmmov %vm6209_vm1  ;;  %vm6213_vm3 = vcmp.eq.s32.totalorder %v4469_v48, %v6211_v61 }
 0x63e   :  { %3854 = vmatpush.msk.msra.mxu0 %vm4664_vm0, %v6158_v14  ;;  %vm6212_vm0 = vcmp.eq.s32.totalorder %v4428_v42, %v6211_v61 }
 0x640   :  { %3855 = vmatpush.msk.msra.mxu0 %vm4683_vm2, %v6158_v14 }
 0x642   :  { %3856 = vmatpush.msk.msra.mxu0 %vm4702_vm5, %v6158_v14 }
 0x644   :  { %v1533_v5 = vpop.f32.mrf.mxu2 }
 0x645   :  { %3794 = vmatmul.msk.f32.gmra.mxu3 %vm6207_vm7, %v1533_v5  ;;  %vm6215_vm7 = vnez %v6137_v59  ;;  %v5399_v5 = vmul.u32 2, %v4428_v42 }
 0x647   :  { %v5415_v27 = vadd.s32 1, %v5399_v5 }
 0x64c   :  { %v1536_v11 = vpop.f32.mrf.mxu2 }
 0x64d   :  { %3795 = vmatmul.msk.f32.gmra.mxu3 %vm6208_vm11, %v1536_v11  ;;  %vm6216_vm11 = vmmov %vm6209_vm1  ;;  %v5402_v11 = vmul.u32 2, %v4469_v48 }
 0x654   :  { %v1539_v60 = vpop.f32.mrf.mxu2 }
 0x655   :  { %3796 = vmatmul.msk.f32.gmra.mxu3 %vm6209_vm1, %v1539_v60 }
 0x65c   :  { %v1542_v13 = vpop.f32.mrf.mxu2 }
 0x65d   :  { %3799 = vmatmul.msk.f32.vlgmr.msrb.gmra.mxu0 %vm6210_vm8, %v1542_v13  ;;  %vm6217_vm8 = vmmov %vm6209_vm1 }
 0x65e   :  { %3897 = vmatpush.msk.msrb.mxu0 %vm6212_vm0, %v6158_v14  ;;  %vm6219_vm0 = vcmask 523264  }
 0x65f   :  { %vm6221_vm5 = vmmov %vm6219_vm0 }
 0x660   :  { %3898 = vmatpush.msk.msrb.mxu0 %vm6213_vm3, %v6158_v14  ;;  %vm6220_vm3 = vmmov %vm6219_vm0 }
 0x662   :  { %3899 = vmatpush.msk.msrb.mxu0 %vm6214_vm10, %v6158_v14 }
 0x664   :  { %v1545_v49 = vpop.f32.mrf.mxu2  ;;  %3900 = vmatpush.msk.msrb.mxu0 %vm6215_vm7, %v6158_v14 }
 0x665   :  { %3800 = vmatmul.msk.f32.gmra.mxu0 %vm6216_vm11, %v1545_v49  ;;  %vm6222_vm11 = vmmov %vm6219_vm0 }
 0x66c   :  { %v1548_v23 = vpop.f32.mrf.mxu2 }
 0x66d   :  { %3801 = vmatmul.msk.f32.gmra.mxu0 %vm6209_vm1, %v1548_v23  ;;  %vm6105_vm1 = vcmp.eq.s32.totalorder %v4337_v30, %v5402_v11 }
 0x674   :  { %v1551_v26 = vpop.f32.mrf.mxu2 }
 0x675   :  { %3802 = vmatmul.msk.f32.gmra.mxu0 %vm6217_vm8, %v1551_v26  ;;  %v6223_v26 = vld [vmem:[#allocation15_spill] sm:$0xff]  ;;  %vm6227_vm8 = vcmp.eq.s32.totalorder %v4337_v30, %v5257_v37 }
 0x67a   :  { %v1624_v4 = vpop.f32.mrf.mxu0 }
 0x67d   :  { %3857 = vmatmul.msk.f32.vlgmr.msra.gmra.mxu0 %vm6219_vm0, %v6218_v19  ;;  %vm6110_vm0 = vcmp.eq.s32.totalorder %v4337_v30, %v5415_v27 }
 0x682   :  { %v1627_v53 = vpop.f32.mrf.mxu0 }
 0x685   :  { %3858 = vmatmul.msk.f32.gmra.mxu0 %vm6220_vm3, %v1997_v47 }
 0x68a   :  { %v1630_v29 = vpop.f32.mrf.mxu0 }
 0x68d   :  { %3859 = vmatmul.msk.f32.gmra.mxu0 %vm6221_vm5, %v1998_v46  ;;  %vm6108_vm5 = vcmp.eq.s32.totalorder %v4337_v30, %v5399_v5  ;;  %v6225_v46 = vld [vmem:[#allocation13_spill] sm:$0xff] }
 0x68e   :  { %3804 = vmatpush.msk.msrb.mxu3 %vm6108_vm5, %v6158_v14 }
 0x690   :  { %3805 = vmatpush.msk.msrb.mxu3 %vm6105_vm1, %v6158_v14  ;;  %vm6229_vm1 = vcmp.eq.s32.totalorder %v4337_v30, %v5260_v51 }
 0x692   :  { %v1633_v24 = vpop.f32.mrf.mxu0  ;;  %3806 = vmatpush.msk.msrb.mxu3 %vm6227_vm8, %v6158_v14 }
 0x694   :  { %3807 = vmatpush.msk.msrb.mxu3 %vm5120_vm6, %v6158_v14 }
 0x695   :  { %3860 = vmatmul.msk.f32.gmra.mxu0 %vm6222_vm11, %v1999_v43  ;;  %vm6228_vm11 = vcmask 261120  }
 0x696   :  { %3814 = vmatpush.msk.msra.mxu3 %vm6110_vm0, %v6158_v14 }
 0x6a0   :  { %v1583_v17 = vpop.f32.mrf.mxu3 }
 0x6a1   :  { %v1625_v7 = vadd.f32 %v1624_v4, %v1583_v17  ;;  %v6226_v17 = vld [vmem:[#allocation18_spill] sm:$0xff] }
 0x6a8   :  { %v1586_v22 = vpop.f32.mrf.mxu3 }
 0x6a9   :  { %v1628_v35 = vadd.f32 %v1627_v53, %v1586_v22 }
 0x6b0   :  { %v1589_v50 = vpop.f32.mrf.mxu3 }
 0x6b1   :  { %v1631_v9 = vadd.f32 %v1630_v29, %v1589_v50  ;;  %v5430_v50 = vadd.s32 4294967295, %v5399_v5 }
 0x6b3   :  { %vm6106_vm3 = vcmp.eq.s32.totalorder %v4337_v30, %v5430_v50 }
 0x6b8   :  { %v1592_v55 = vpop.f32.mrf.mxu3 }
 0x6b9   :  { %v1634_v36 = vadd.f32 %v1633_v24, %v1592_v55  ;;  %v5436_v55 = vadd.s32 4294967295, %v5402_v11  ;;  %v6230_v24 = vld [vmem:[#allocation6_spill] sm:$0xff] }
 0x6bb   :  { %vm6107_vm8 = vcmp.eq.s32.totalorder %v4337_v30, %v5436_v55 }
 0x6c0   :  { %v1665_v31 = vpop.f32.mrf.mxu3 }
 0x6c1   :  { %v1677_v60 = vadd.f32 %v1665_v31, %v1625_v7  ;;  %v1754_v31 = vld [vmem:[%s6045_s11] sm:$0xf]  ;;  %v6249_v7 = vld [vmem:[#allocation23_spill] sm:$0xff] }
 0x6c8   :  { %v1668_v8 = vpop.f32.mrf.mxu3 }
 0x6c9   :  { %v1678_v18 = vadd.f32 %v1668_v8, %v1628_v35  ;;  %v6235_v8 = vld [vmem:[#allocation8_spill] sm:$0xff] }
 0x6ca   :  { %vm6236_vm5 = vnez %v6235_v8 }
 0x6d0   :  { %v1671_v1 = vpop.f32.mrf.mxu3 }
 0x6d1   :  { %v1679_v62 = vadd.f32 %v1671_v1, %v1631_v9  ;;  %v5510_v1 = vadd.s32 2, %v5399_v5 }
 0x6d8   :  { %v1674_v25 = vpop.f32.mrf.mxu3 }
 0x6d9   :  { %v1680_v20 = vadd.f32 %v1674_v25, %v1634_v36  ;;  %v6243_v36 = vld [vmem:[#allocation22_spill] sm:$0xff] }
 0x6da   :  { %v1710_v45 = vpop.f32.mrf.mxu0 }
 0x6db   :  { %v1722_v23 = vadd.f32 %v1710_v45, %v1677_v60  ;;  %v6237_v45 = vld [vmem:[#allocation9_spill] sm:$0xff] }
 0x6dd   :  { %v1746_v22 = vadd.f32 %v6226_v17, %v1722_v23 }
 0x6df   :  { %v1750_v29 = vmax.f32 %v1746_v22, 0.0 }
 0x6e2   :  { %v1713_v12 = vpop.f32.mrf.mxu0 }
 0x6e3   :  { %v1723_v13 = vadd.f32 %v1713_v12, %v1678_v18  ;;  %v5494_v12 = vadd.s32 1, %v5402_v11  ;;  %v1923_v18 = vpop.permute.xlu0 %1922 }
 0x6e5   :  { %v1747_v32 = vadd.f32 %v6225_v46, %v1723_v13 }
 0x6e7   :  { %v1751_v53 = vmax.f32 %v1747_v32, 0.0 }
 0x6ea   :  { %v1716_v2 = vpop.f32.mrf.mxu0 }
 0x6eb   :  { %v1724_v39 = vadd.f32 %v1716_v2, %v1679_v62  ;;  %v5513_v2 = vadd.s32 2, %v5402_v11 }
 0x6ed   :  { %v1748_v19 = vadd.f32 %v6223_v26, %v1724_v39 }
 0x6ef   :  { %v1752_v4 = vmax.f32 %v1748_v19, 0.0 }
 0x6f2   :  { %v1719_v6 = vpop.f32.mrf.mxu0 }
 0x6f3   :  { %v1725_v49 = vadd.f32 %v1719_v6, %v1680_v20  ;;  %v6258_v20 = vld [vmem:[#allocation21_spill] sm:$0xff] }
 0x6f5   :  { %v1749_v47 = vadd.f32 %v6224_v56, %v1725_v49 }
 0x6f7   :  { %v1753_v43 = vmax.f32 %v1749_v47, 0.0 }
 0x6f9   :  { %1771 = vmatpush.msrb.mxu1 %v1753_v43 }
 0x6fa   :  { %v2115_v22 = vpop.f32.mrf.mxu0 }
 0x6fb   :  { %1772 = vmatpush.msrb.mxu1 %v1752_v4  ;;  %v2160_v4 = vpop.f32.mrf.mxu2 }
 0x6fd   :  { %1773 = vmatpush.msrb.mxu1 %v1751_v53 }
 0x6ff   :  { %1774 = vmatpush.msrb.mxu1 %v1750_v29 }
 0x700   :  { %3803 = vmatmul.msk.f32.vlgmr.msrb.gmra.mxu1 %vm6228_vm11, %v1754_v31  ;;  %vm6231_vm11 = vcmp.eq.s32.totalorder %v4347_v33, %v6230_v24 }
 0x701   :  { %3809 = vmatpush.msk.msra.mxu1 %vm6106_vm3, %v6158_v14  ;;  %vm6232_vm3 = vcmp.eq.s32.totalorder %v4372_v38, %v6230_v24 }
 0x703   :  { %3810 = vmatpush.msk.msra.mxu1 %vm6107_vm8, %v6158_v14  ;;  %vm6233_vm8 = vcmp.eq.s32.totalorder %v4388_v40, %v6230_v24  ;;  %v2163_v8 = vpop.f32.mrf.mxu2 }
 0x705   :  { %3811 = vmatpush.msk.msra.mxu1 %vm6229_vm1, %v6158_v14  ;;  %vm6234_vm1 = vcmp.eq.s32.totalorder %v4409_v41, %v6230_v24  ;;  %v2118_v24 = vpop.f32.mrf.mxu0 }
 0x707   :  { %3812 = vmatpush.msk.msra.mxu1 %vm5099_vm13, %v6158_v14  ;;  %vm6245_vm13 = vcmask 261120  }
 0x709   :  { %3825 = vmatpush.msk.msrb.mxu1 %vm6231_vm11, %v6158_v14  ;;  %vm6238_vm11 = vnez %v6237_v45 }
 0x70b   :  { %3826 = vmatpush.msk.msrb.mxu1 %vm6232_vm3, %v6158_v14  ;;  %vm6109_vm3 = vcmp.eq.s32.totalorder %v4337_v30, %v5494_v12 }
 0x70c   :  { %3815 = vmatpush.msk.msra.mxu3 %vm6109_vm3, %v6158_v14  ;;  %vm6113_vm3 = vcmp.eq.s32.totalorder %v4337_v30, %v5510_v1 }
 0x70d   :  { %3827 = vmatpush.msk.msrb.mxu1 %vm6233_vm8, %v6158_v14  ;;  %vm6239_vm8 = vcmp.eq.s32.totalorder %v4337_v30, %v5313_v44 }
 0x70e   :  { %3816 = vmatpush.msk.msra.mxu3 %vm6239_vm8, %v6158_v14  ;;  %vm6114_vm8 = vcmp.eq.s32.totalorder %v4337_v30, %v5513_v2 }
 0x70f   :  { %3828 = vmatpush.msk.msrb.mxu1 %vm6234_vm1, %v6158_v14  ;;  %vm6240_vm1 = vcmask 261120  }
 0x710   :  { %3817 = vmatpush.msk.msra.mxu3 %vm5132_vm15, %v6158_v14  ;;  %vm6241_vm0 = vmmov %vm6240_vm1 }
 0x711   :  { %3829 = vmatpush.msk.msrb.mxu1 %vm6236_vm5, %v6158_v14 }
 0x713   :  { %3830 = vmatpush.msk.msrb.mxu1 %vm6238_vm11, %v6158_v14 }
 0x715   :  { %3831 = vmatpush.msk.msrb.mxu1 %vm4509_vm14, %v6158_v14 }
 0x717   :  { %3832 = vmatpush.msk.msrb.mxu1 %vm4537_vm12, %v6158_v14 }
 0x77d   :  { %v1776_v9 = vpop.f32.mrf.mxu1 }
 0x77e   :  { %v1780_v25 = vrot.slane %v1776_v9, 1  ;;  %3813 = vmatmul.msk.f32.vlgmr.msra.gmra.mxu1 %vm6240_vm1, %v1776_v9  ;;  %vm6242_vm1 = vcmp.eq.s32.totalorder %v4337_v30, %v5329_v3  ;;  %v1825_v35 = vrot.slane %v1776_v9, 2  ;;  %v1849_v62 = vrot.slane %v1776_v9, 3 }
 0x780   :  { %3808 = vmatmul.msk.f32.vlgmr.msrb.gmra.mxu3 %vm6241_vm0, %v1780_v25  ;;  %vm6244_vm0 = vcmask 523264   ;;  %v2121_v25 = vpop.f32.mrf.mxu0 }
 0x781   :  { %3819 = vmatpush.msk.msrb.mxu3 %vm6113_vm3, %v6158_v14  ;;  %vm6246_vm3 = vcmp.eq.s32.totalorder %v4347_v33, %v6211_v61  ;;  %v6254_v33 = vld [vmem:[#allocation20_spill] sm:$0xff] }
 0x783   :  { %3820 = vmatpush.msk.msrb.mxu3 %vm6114_vm8, %v6158_v14  ;;  %vm6247_vm8 = vcmp.eq.s32.totalorder %v4372_v38, %v6211_v61  ;;  %v6255_v38 = vld [vmem:[#allocation19_spill] sm:$0xff] }
 0x785   :  { %3821 = vmatpush.msk.msrb.mxu3 %vm6242_vm1, %v6158_v14  ;;  %vm6248_vm1 = vcmp.eq.s32.totalorder %v4388_v40, %v6211_v61  ;;  %v1943_v40 = vpop.permute.xlu0 %1942 }
 0x786   :  { %3833 = vmatmul.msk.f32.vlgmr.msrb.gmra.mxu1 %vm6244_vm0, %v6243_v36  ;;  %v2166_v36 = vpop.f32.mrf.mxu2 }
 0x787   :  { %3822 = vmatpush.msk.msrb.mxu3 %vm6201_vm4, %v6158_v14 }
 0x788   :  { %3818 = vmatmul.msk.f32.vlgmr.msra.gmra.mxu3 %vm6245_vm13, %v1825_v35  ;;  %vm6250_vm13 = vcmp.eq.s32.totalorder %v4409_v41, %v6211_v61  ;;  %v4072_v41 = vld [vmem:[%s6034_s0 + $0x1] ss:$0 sm:$0xff] }
 0x789   :  { %3837 = vmatpush.msk.msra.mxu3 %vm6246_vm3, %v6158_v14  ;;  %vm6251_vm3 = vcmask 261120   ;;  %v1991_v15 = vmul.f32 %v4072_v41, %v1923_v18 }
 0x78b   :  { %3838 = vmatpush.msk.msra.mxu3 %vm6247_vm8, %v6158_v14  ;;  %vm6252_vm8 = vcmp.eq.s32.totalorder %v4428_v42, %v6211_v61 }
 0x78d   :  { %3839 = vmatpush.msk.msra.mxu3 %vm6248_vm1, %v6158_v14  ;;  %vm6253_vm1 = vcmp.eq.s32.totalorder %v4469_v48, %v6211_v61  ;;  %v1995_v61 = vmul.f32 %v4072_v41, %v1943_v40 }
 0x78e   :  { %3834 = vmatmul.msk.f32.gmra.mxu1 %vm6244_vm0, %v6249_v7 }
 0x78f   :  { %3840 = vmatpush.msk.msra.mxu3 %vm6250_vm13, %v6158_v14  ;;  %vm6256_vm13 = vmmov %vm6244_vm0 }
 0x790   :  { %3823 = vmatmul.msk.f32.vlgmr.msrb.gmra.mxu3 %vm6251_vm3, %v1849_v62  ;;  %vm6257_vm3 = vmmov %vm6244_vm0 }
 0x791   :  { %3841 = vmatpush.msk.msra.mxu3 %vm6252_vm8, %v6158_v14  ;;  %vm6261_vm8 = vcmp.eq.s32.totalorder %v4469_v48, %v4350_v34 }
 0x793   :  { %3842 = vmatpush.msk.msra.mxu3 %vm6253_vm1, %v6158_v14  ;;  %vm6265_vm1 = vmmov %vm6244_vm0 }
 0x795   :  { %3843 = vmatpush.msk.msra.mxu3 %vm6214_vm10, %v6158_v14 }
 0x796   :  { %3835 = vmatmul.msk.f32.gmra.mxu1 %vm6244_vm0, %v6254_v33 }
 0x797   :  { %3844 = vmatpush.msk.msra.mxu3 %vm6215_vm7, %v6158_v14 }
 0x798   :  { %3845 = vmatmul.msk.f32.vlgmr.msra.gmra.mxu3 %vm6256_vm13, %v6255_v38  ;;  %vm6266_vm13 = vcmask 261120  }
 0x799   :  { %3889 = vmatpush.msk.msrb.mxu3 %vm6236_vm5, %v6158_v14  ;;  %vm6259_vm5 = vmmov %vm6244_vm0 }
 0x79b   :  { %3890 = vmatpush.msk.msrb.mxu3 %vm6238_vm11, %v6158_v14  ;;  %vm6260_vm11 = vcmp.eq.s32.totalorder %v4428_v42, %v4350_v34  ;;  %v2194_v42 = vpop.permute.xlu2 %2193 }
 0x79d   :  { %3891 = vmatpush.msk.msrb.mxu3 %vm4509_vm14, %v6158_v14  ;;  %vm6264_vm14 = vmmov %vm6244_vm0  ;;  %vm1881_vm0 = vcmask 516096  }
 0x79e   :  { %3836 = vmatmul.msk.f32.gmra.mxu1 %vm6257_vm3, %v1995_v61  ;;  %vm6267_vm3 = vcmp.eq.s32.totalorder %v4337_v30, %v5257_v37 }
 0x79f   :  { %3892 = vmatpush.msk.msrb.mxu3 %vm4537_vm12, %v6158_v14  ;;  %vm6262_vm12 = vnez %v6132_v54 }
 0x7a0   :  { %3846 = vmatmul.msk.f32.gmra.mxu3 %vm6259_vm5, %v6258_v20  ;;  %v2124_v20 = vpop.f32.mrf.mxu0  ;;  %vm6268_vm5 = vmmov %vm6266_vm13 }
 0x7a1   :  { %3913 = vmatpush.msk.msra.mxu3 %vm6260_vm11, %v6158_v14  ;;  %vm6269_vm11 = vmmov %vm6268_vm5 }
 0x7a3   :  { %3914 = vmatpush.msk.msra.mxu3 %vm6261_vm8, %v6158_v14  ;;  %v2179_v39 = vpop.permute.xlu2 %2178  ;;  %vm6270_vm8 = vmmov %vm6268_vm5 }
 0x7a5   :  { %3915 = vmatpush.msk.msra.mxu3 %vm4521_vm9, %v6158_v14 }
 0x7a7   :  { %3916 = vmatpush.msk.msra.mxu3 %vm6262_vm12, %v6158_v14 }
 0x7a8   :  { %3847 = vmatmul.msk.f32.gmra.mxu3 %vm6264_vm14, %v6263_v21  ;;  %vm6271_vm14 = vmmov %vm6268_vm5 }
 0x7ab   :  { %v5611_v6 = vpop.permute.xlu2 %2516 }
 0x7b0   :  { %3848 = vmatmul.msk.f32.gmra.mxu3 %vm6265_vm1, %v1991_v15  ;;  %vm6272_vm1 = vmmov %vm6268_vm5 }
 0x7b3   :  { %v5613_v34 = vpop.permute.xlu2 %2734 }
 0x7bb   :  { %v5615_v48 = vpop.permute.xlu2 %3058 }
 0x7c3   :  { %v5617_v13 = vpop.permute.xlu2 %3396 }
 0x7cb   :  { %v1876_v19 = vpop.permute.xlu2 %1875 }
 0x7cc   :  { %v1878_v46 = vperm.slane %v1876_v19, 0  ;;  %v2189_v19 = vpop.permute.xlu0 %2188 }
 0x7fb   :  { %v1822_v49 = vpop.f32.mrf.mxu1 }
 0x803   :  { %v1800_v60 = vpop.f32.mrf.mxu3  ;;  %v2033_v43 = vpop.f32.mrf.mxu1 }
 0x804   :  { %v1823_v26 = vadd.f32 %v1822_v49, %v1800_v60  ;;  %v2169_v49 = vpop.f32.mrf.mxu2 }
 0x80b   :  { %v1845_v23 = vpop.f32.mrf.mxu3  ;;  %v2036_v31 = vpop.f32.mrf.mxu1 }
 0x80c   :  { %v1848_v56 = vadd.f32 %v1845_v23, %v1823_v26 }
 0x813   :  { %v1869_v47 = vpop.f32.mrf.mxu3  ;;  %v2039_v9 = vpop.f32.mrf.mxu1 }
 0x814   :  { %v1872_v32 = vadd.f32 %v1869_v47, %v1848_v56 }
 0x816   :  { %v1879_v17 = vadd.f32 %v1878_v46, %v1872_v32  ;;  %v2184_v32 = vpop.permute.xlu1 %2183 }
 0x818   :  { %4068 = vtanh.f32 %v1879_v17 }
 0x81b   :  { %v2074_v53 = vpop.f32.mrf.mxu3  ;;  %v2042_v38 = vpop.f32.mrf.mxu1 }
 0x81c   :  { %v2075_v18 = vadd.f32 %v2074_v53, %v2033_v43 }
 0x81e   :  { %v4069_v29 = vpop.eup %4068  ;;  %v2127_v21 = vadd.f32 %v2115_v22, %v2075_v18  ;;  %v2204_v22 = vld [vmem:[%s6037_s3] sm:$0xff] }
 0x81f   :  { %1882 = vst.msk [vmem:[#allocation3] sm:$0x1] %vm1881_vm0, %v4069_v29  ;;  %v2216_v18 = vld [vmem:[%s6037_s3 + $0x60] sm:$0xff] }
 0x820   :  { %v2172_v56 = vadd.f32 %v2160_v4, %v2127_v21  ;;  %v2207_v4 = vld [vmem:[%s6037_s3 + $0x18] sm:$0xff] }
 0x822   :  { %v2196_v53 = vadd.f32 %v2179_v39, %v2172_v56  ;;  %v2206_v39 = vld [vmem:[%s6037_s3 + $0x10] sm:$0xff] }
 0x823   :  { %v2077_v45 = vpop.f32.mrf.mxu3 }
 0x824   :  { %v2078_v7 = vadd.f32 %v2077_v45, %v2036_v31  ;;  %v2209_v45 = vld [vmem:[%s6037_s3 + $0x28] sm:$0xff] }
 0x826   :  { %v2128_v41 = vadd.f32 %v2118_v24, %v2078_v7  ;;  %v2200_v24 = vmax.f32 %v2196_v53, 0.0  ;;  %v2215_v7 = vld [vmem:[%s6037_s3 + $0x58] sm:$0xff] }
 0x828   :  { %v2173_v23 = vadd.f32 %v2163_v8, %v2128_v41  ;;  %v2208_v8 = vld [vmem:[%s6037_s3 + $0x20] sm:$0xff] }
 0x82a   :  { %v2197_v29 = vadd.f32 %v2184_v32, %v2173_v23 }
 0x82b   :  { %v2080_v35 = vpop.f32.mrf.mxu3 }
 0x82c   :  { %v2081_v62 = vadd.f32 %v2080_v35, %v2039_v9  ;;  %v2201_v31 = vmax.f32 %v2197_v29, 0.0  ;;  %v2210_v9 = vld [vmem:[%s6037_s3 + $0x30] sm:$0xff]  ;;  %v2212_v35 = vld [vmem:[%s6037_s3 + $0x40] sm:$0xff] }
 0x82e   :  { %v2129_v33 = vadd.f32 %v2121_v25, %v2081_v62  ;;  %v2211_v25 = vld [vmem:[%s6037_s3 + $0x38] sm:$0xff]  ;;  %v2214_v62 = vld [vmem:[%s6037_s3 + $0x50] sm:$0xff] }
 0x830   :  { %v2174_v15 = vadd.f32 %v2166_v36, %v2129_v33  ;;  %v2213_v36 = vld [vmem:[%s6037_s3 + $0x48] sm:$0xff] }
 0x831   :  { %v2217_v33 = vld [vmem:[%s6037_s3 + $0x68] sm:$0xff] }
 0x832   :  { %v2198_v46 = vadd.f32 %v2189_v19, %v2174_v15 }
 0x833   :  { %v2083_v40 = vpop.f32.mrf.mxu3 }
 0x834   :  { %v2084_v61 = vadd.f32 %v2083_v40, %v2042_v38  ;;  %v2202_v43 = vmax.f32 %v2198_v46, 0.0  ;;  %v2218_v38 = vld [vmem:[%s6037_s3 + $0x70] sm:$0xff]  ;;  %v2219_v40 = vld [vmem:[%s6037_s3 + $0x78] sm:$0xff] }
 0x836   :  { %v2130_v60 = vadd.f32 %v2124_v20, %v2084_v61 }
 0x838   :  { %v2175_v26 = vadd.f32 %v2169_v49, %v2130_v60 }
 0x83a   :  { %v2199_v47 = vadd.f32 %v2194_v42, %v2175_v26  ;;  %v2205_v42 = vld [vmem:[%s6037_s3 + $0x8] sm:$0xff] }
 0x83c   :  { %v2203_v17 = vmax.f32 %v2199_v47, 0.0 }
 0x83e   :  { %2284 = vmatpush.msra.mxu1 %v2203_v17 }
 0x840   :  { %2285 = vmatpush.msra.mxu1 %v2202_v43 }
 0x842   :  { %2286 = vmatpush.msra.mxu1 %v2201_v31 }
 0x844   :  { %2287 = vmatpush.msra.mxu1 %v2200_v24 }
 0x845   :  { %3873 = vmatmul.msk.f32.vlgmr.msra.gmra.mxu1 %vm6266_vm13, %v2204_v22  ;;  %vm6273_vm13 = vmmov %vm6272_vm1 }
 0x846   :  { %3971 = vmatpush.msk.msrb.mxu1 %vm5132_vm15, %v6158_v14 }
 0x848   :  { %3997 = vmatpush.msk.msra.mxu1 %vm6267_vm3, %v6158_v14  ;;  %vm6274_vm3 = vmmov %vm6272_vm1 }
 0x84a   :  { %3998 = vmatpush.msk.msra.mxu1 %vm5120_vm6, %v6158_v14 }
 0x84d   :  { %3874 = vmatmul.msk.f32.gmra.mxu1 %vm6268_vm5, %v2205_v42  ;;  %vm6275_vm5 = vmmov %vm6272_vm1 }
 0x855   :  { %3875 = vmatmul.msk.f32.gmra.mxu1 %vm6269_vm11, %v2206_v39  ;;  %vm6276_vm11 = vmmov %vm6272_vm1 }
 0x85d   :  { %3876 = vmatmul.msk.f32.gmra.mxu1 %vm6270_vm8, %v2207_v4  ;;  %vm6277_vm8 = vmmov %vm6272_vm1  ;;  %v2527_v4 = vpop.permute.xlu0 %2526 }
 0x865   :  { %3877 = vmatmul.msk.f32.gmra.mxu1 %vm6271_vm14, %v2208_v8  ;;  %vm6278_vm14 = vmmov %vm6272_vm1 }
 0x86d   :  { %3878 = vmatmul.msk.f32.gmra.mxu1 %vm6272_vm1, %v2209_v45 }
 0x875   :  { %3879 = vmatmul.msk.f32.gmra.mxu1 %vm6273_vm13, %v2210_v9  ;;  %vm6279_vm13 = vmmov %vm6272_vm1 }
 0x87d   :  { %3880 = vmatmul.msk.f32.gmra.mxu1 %vm6274_vm3, %v2211_v25  ;;  %vm6280_vm3 = vmmov %vm6272_vm1 }
 0x885   :  { %3881 = vmatmul.msk.f32.gmra.mxu1 %vm6275_vm5, %v2212_v35  ;;  %vm6281_vm5 = vmmov %vm6272_vm1 }
 0x88d   :  { %3882 = vmatmul.msk.f32.gmra.mxu1 %vm6276_vm11, %v2213_v36  ;;  %vm6282_vm11 = vmmov %vm6272_vm1 }
 0x895   :  { %3883 = vmatmul.msk.f32.gmra.mxu1 %vm6277_vm8, %v2214_v62  ;;  %vm6283_vm8 = vmmov %vm6272_vm1 }
 0x89d   :  { %3884 = vmatmul.msk.f32.gmra.mxu1 %vm6278_vm14, %v2215_v7  ;;  %vm6284_vm14 = vmmov %vm6272_vm1 }
 0x8a5   :  { %3885 = vmatmul.msk.f32.gmra.mxu1 %vm6272_vm1, %v2216_v18 }
 0x8ad   :  { %3886 = vmatmul.msk.f32.gmra.mxu1 %vm6279_vm13, %v2217_v33  ;;  %vm6285_vm13 = vmmov %vm6272_vm1 }
 0x8b5   :  { %3887 = vmatmul.msk.f32.gmra.mxu1 %vm6280_vm3, %v2218_v38  ;;  %vm6286_vm3 = vmmov %vm6272_vm1 }
 0x8bd   :  { %3888 = vmatmul.msk.f32.gmra.mxu1 %vm6281_vm5, %v2219_v40  ;;  %vm6287_vm5 = vmmov %vm6272_vm1 }
 0x8c2   :  { %v2289_v41 = vpop.f32.mrf.mxu1 }
 0x8c3   :  { %3901 = vmatmul.msk.f32.vlgmr.msrb.gmra.mxu0 %vm6282_vm11, %v2289_v41  ;;  %vm6288_vm11 = vmmov %vm6272_vm1 }
 0x8ca   :  { %v2292_v61 = vpop.f32.mrf.mxu1 }
 0x8cb   :  { %3902 = vmatmul.msk.f32.gmra.mxu0 %vm6283_vm8, %v2292_v61  ;;  %vm6289_vm8 = vmmov %vm6272_vm1 }
 0x8d2   :  { %v2295_v20 = vpop.f32.mrf.mxu1 }
 0x8d3   :  { %3903 = vmatmul.msk.f32.gmra.mxu0 %vm6284_vm14, %v2295_v20  ;;  %vm6292_vm14 = vmmov %vm6272_vm1  ;;  %v2522_v20 = vpop.permute.xlu1 %2521 }
 0x8da   :  { %v2298_v21 = vpop.f32.mrf.mxu1 }
 0x8db   :  { %3904 = vmatmul.msk.f32.gmra.mxu0 %vm6272_vm1, %v2298_v21 }
 0x8e2   :  { %v2301_v15 = vpop.f32.mrf.mxu1 }
 0x8e3   :  { %3893 = vmatmul.msk.f32.vlgmr.msrb.gmra.mxu3 %vm6285_vm13, %v2301_v15  ;;  %vm6293_vm13 = vmmov %vm6272_vm1 }
 0x8e4   :  { %3933 = vmatpush.msk.msrb.mxu3 %vm6214_vm10, %v6158_v14  ;;  %vm6290_vm10 = vnez %v6145_v0 }
 0x8e6   :  { %3934 = vmatpush.msk.msrb.mxu3 %vm6215_vm7, %v6158_v14  ;;  %vm6291_vm7 = vmmov %vm6272_vm1 }
 0x8ea   :  { %v2304_v60 = vpop.f32.mrf.mxu1 }
 0x8eb   :  { %3894 = vmatmul.msk.f32.gmra.mxu3 %vm6286_vm3, %v2304_v60  ;;  %vm6295_vm3 = vmmov %vm6272_vm1 }
 0x8f2   :  { %v2307_v49 = vpop.f32.mrf.mxu1 }
 0x8f3   :  { %3895 = vmatmul.msk.f32.gmra.mxu3 %vm6287_vm5, %v2307_v49  ;;  %vm6296_vm5 = vmmov %vm6272_vm1 }
 0x8fa   :  { %v2310_v23 = vpop.f32.mrf.mxu1 }
 0x8fb   :  { %3896 = vmatmul.msk.f32.gmra.mxu3 %vm6288_vm11, %v2310_v23  ;;  %vm6299_vm11 = vmmov %vm6272_vm1 }
 0x902   :  { %v2313_v26 = vpop.f32.mrf.mxu1 }
 0x903   :  { %3909 = vmatmul.msk.f32.vlgmr.msrb.gmra.mxu2 %vm6289_vm8, %v2313_v26  ;;  %v2512_v26 = vpop.permute.xlu0 %2511  ;;  %vm6300_vm8 = vmmov %vm6272_vm1 }
 0x904   :  { %3937 = vmatpush.msk.msrb.mxu2 %vm4683_vm2, %v6158_v14  ;;  %vm6294_vm2 = vmmov %vm6272_vm1 }
 0x906   :  { %3938 = vmatpush.msk.msrb.mxu2 %vm6290_vm10, %v6158_v14  ;;  %vm6301_vm10 = vmmov %vm6272_vm1 }
 0x90a   :  { %v2316_v58 = vpop.f32.mrf.mxu1 }
 0x90b   :  { %3910 = vmatmul.msk.f32.gmra.mxu2 %vm6291_vm7, %v2316_v58  ;;  %vm6302_vm7 = vmmov %vm6272_vm1 }
 0x912   :  { %v2319_v59 = vpop.f32.mrf.mxu1 }
 0x913   :  { %3911 = vmatmul.msk.f32.gmra.mxu2 %vm6292_vm14, %v2319_v59  ;;  %vm6303_vm14 = vmmov %vm6272_vm1 }
 0x91a   :  { %v2322_v19 = vpop.f32.mrf.mxu1 }
 0x91b   :  { %3912 = vmatmul.msk.f32.gmra.mxu2 %vm6272_vm1, %v2322_v19 }
 0x922   :  { %v2325_v56 = vpop.f32.mrf.mxu1 }
 0x923   :  { %3917 = vmatmul.msk.f32.vlgmr.msra.gmra.mxu3 %vm6293_vm13, %v2325_v56  ;;  %vm6304_vm13 = vmmov %vm6272_vm1 }
 0x924   :  { %3941 = vmatpush.msk.msra.mxu3 %vm4521_vm9, %v6158_v14  ;;  %vm6297_vm9 = vmmov %vm6272_vm1 }
 0x926   :  { %3942 = vmatpush.msk.msra.mxu3 %vm6262_vm12, %v6158_v14  ;;  %vm6298_vm12 = vnez %v6160_v28 }
 0x92a   :  { %v2328_v63 = vpop.f32.mrf.mxu1 }
 0x92b   :  { %3918 = vmatmul.msk.f32.gmra.mxu3 %vm6294_vm2, %v2328_v63  ;;  %v2537_v63 = vld [vmem:[%s6039_s5] sm:$0xff]  ;;  %vm6305_vm2 = vcmask 130048  }
 0x932   :  { %v2331_v0 = vpop.f32.mrf.mxu1 }
 0x933   :  { %3919 = vmatmul.msk.f32.gmra.mxu3 %vm6295_vm3, %v2331_v0  ;;  %v2539_v0 = vld [vmem:[%s6039_s5 + $0x10] sm:$0xff]  ;;  %vm6306_vm3 = vmmov %vm6305_vm2 }
 0x93a   :  { %v2334_v47 = vpop.f32.mrf.mxu1 }
 0x93b   :  { %3920 = vmatmul.msk.f32.gmra.mxu3 %vm6296_vm5, %v2334_v47  ;;  %v2540_v47 = vld [vmem:[%s6039_s5 + $0x18] sm:$0xff]  ;;  %vm6307_vm5 = vmmov %vm6305_vm2 }
 0x940   :  { %v2407_v29 = vpop.f32.mrf.mxu0 }
 0x948   :  { %v2410_v53 = vpop.f32.mrf.mxu0 }
 0x950   :  { %v2413_v22 = vpop.f32.mrf.mxu0 }
 0x958   :  { %v2416_v45 = vpop.f32.mrf.mxu0 }
 0x966   :  { %v2366_v46 = vpop.f32.mrf.mxu3 }
 0x967   :  { %v2408_v62 = vadd.f32 %v2407_v29, %v2366_v46  ;;  %v2541_v46 = vld [vmem:[%s6039_s5 + $0x20] sm:$0xff]  ;;  %v2544_v29 = vld [vmem:[%s6039_s5 + $0x38] sm:$0xff] }
 0x96e   :  { %v2369_v32 = vpop.f32.mrf.mxu3 }
 0x96f   :  { %v2411_v25 = vadd.f32 %v2410_v53, %v2369_v32  ;;  %v2542_v32 = vld [vmem:[%s6039_s5 + $0x28] sm:$0xff] }
 0x976   :  { %v2372_v17 = vpop.f32.mrf.mxu3 }
 0x977   :  { %v2414_v8 = vadd.f32 %v2413_v22, %v2372_v17  ;;  %v2543_v17 = vld [vmem:[%s6039_s5 + $0x30] sm:$0xff] }
 0x97e   :  { %v2375_v52 = vpop.f32.mrf.mxu3 }
 0x97f   :  { %v2417_v35 = vadd.f32 %v2416_v45, %v2375_v52 }
 0x986   :  { %v2448_v43 = vpop.f32.mrf.mxu2 }
 0x987   :  { %v2460_v40 = vadd.f32 %v2448_v43, %v2408_v62 }
 0x98e   :  { %v2451_v31 = vpop.f32.mrf.mxu2 }
 0x98f   :  { %v2461_v7 = vadd.f32 %v2451_v31, %v2411_v25 }
 0x996   :  { %v2454_v42 = vpop.f32.mrf.mxu2 }
 0x997   :  { %v2462_v36 = vadd.f32 %v2454_v42, %v2414_v8 }
 0x99e   :  { %v2457_v9 = vpop.f32.mrf.mxu2 }
 0x99f   :  { %v2463_v18 = vadd.f32 %v2457_v9, %v2417_v35 }
 0x9a6   :  { %v2493_v24 = vpop.f32.mrf.mxu3 }
 0x9a7   :  { %v2505_v21 = vadd.f32 %v2493_v24, %v2460_v40 }
 0x9a9   :  { %v2529_v58 = vadd.f32 %v2512_v26, %v2505_v21  ;;  %v2750_v26 = vld [vmem:[%s6041_s7 + $0x20] sm:$0xff] }
 0x9ab   :  { %v2533_v56 = vmax.f32 %v2529_v58, 0.0  ;;  %v2751_v58 = vld [vmem:[%s6041_s7 + $0x28] sm:$0xff] }
 0x9ae   :  { %v2496_v54 = vpop.f32.mrf.mxu3 }
 0x9af   :  { %v2506_v41 = vadd.f32 %v2496_v54, %v2461_v7 }
 0x9b1   :  { %v2530_v49 = vadd.f32 %v5611_v6, %v2506_v41  ;;  %v2538_v6 = vld [vmem:[%s6039_s5 + $0x8] sm:$0xff]  ;;  %v2740_v41 = vpop.permute.xlu1 %2739 }
 0x9b3   :  { %v2534_v19 = vmax.f32 %v2530_v49, 0.0  ;;  %v2747_v49 = vld [vmem:[%s6041_s7 + $0x8] sm:$0xff] }
 0x9b6   :  { %v2499_v39 = vpop.f32.mrf.mxu3 }
 0x9b7   :  { %v2507_v33 = vadd.f32 %v2499_v39, %v2462_v36 }
 0x9b9   :  { %v2531_v15 = vadd.f32 %v2522_v20, %v2507_v33 }
 0x9bb   :  { %v2535_v59 = vmax.f32 %v2531_v15, 0.0 }
 0x9be   :  { %v2502_v38 = vpop.f32.mrf.mxu3 }
 0x9bf   :  { %v2508_v61 = vadd.f32 %v2502_v38, %v2463_v18 }
 0x9c1   :  { %v2532_v60 = vadd.f32 %v2527_v4, %v2508_v61 }
 0x9c3   :  { %v2536_v23 = vmax.f32 %v2532_v60, 0.0  ;;  %v2746_v60 = vld [vmem:[%s6041_s7] sm:$0xff] }
 0x9c5   :  { %2583 = vmatpush.msra.mxu0 %v2536_v23  ;;  %v2749_v23 = vld [vmem:[%s6041_s7 + $0x18] sm:$0xff] }
 0x9c7   :  { %2584 = vmatpush.msra.mxu0 %v2535_v59  ;;  %v2752_v59 = vld [vmem:[%s6041_s7 + $0x30] sm:$0xff] }
 0x9c9   :  { %2585 = vmatpush.msra.mxu0 %v2534_v19  ;;  %v2753_v19 = vld [vmem:[%s6041_s7 + $0x38] sm:$0xff] }
 0x9cb   :  { %2586 = vmatpush.msra.mxu0 %v2533_v56  ;;  %v2754_v56 = vld [vmem:[%s6041_s7 + $0x40] sm:$0xff] }
 0x9cc   :  { %3921 = vmatmul.msk.f32.vlgmr.msra.gmra.mxu0 %vm6297_vm9, %v2537_v63  ;;  %vm6308_vm9 = vmmov %vm6305_vm2  ;;  %v2755_v63 = vld [vmem:[%s6041_s7 + $0x48] sm:$0xff] }
 0x9cd   :  { %3966 = vmatpush.msk.msrb.mxu0 %vm6298_vm12, %v6158_v14 }
 0x9d4   :  { %3922 = vmatmul.msk.f32.gmra.mxu0 %vm6299_vm11, %v2538_v6  ;;  %vm6309_vm11 = vmmov %vm6305_vm2  ;;  %v2756_v6 = vld [vmem:[%s6041_s7 + $0x50] sm:$0xff] }
 0x9dc   :  { %3923 = vmatmul.msk.f32.gmra.mxu0 %vm6300_vm8, %v2539_v0  ;;  %vm6310_vm8 = vmmov %vm6305_vm2  ;;  %v2757_v0 = vld [vmem:[%s6041_s7 + $0x58] sm:$0xff] }
 0x9e4   :  { %3924 = vmatmul.msk.f32.gmra.mxu0 %vm6301_vm10, %v2540_v47  ;;  %vm6311_vm10 = vmmov %vm6305_vm2  ;;  %v2758_v47 = vld [vmem:[%s6041_s7 + $0x60] sm:$0xff] }
 0x9ec   :  { %3925 = vmatmul.msk.f32.gmra.mxu0 %vm6302_vm7, %v2541_v46  ;;  %vm6312_vm7 = vmmov %vm6305_vm2  ;;  %v2759_v46 = vld [vmem:[%s6041_s7 + $0x68] sm:$0xff] }
 0x9f4   :  { %3926 = vmatmul.msk.f32.gmra.mxu0 %vm6303_vm14, %v2542_v32  ;;  %vm6313_vm14 = vmmov %vm6305_vm2  ;;  %v2760_v32 = vld [vmem:[%s6041_s7 + $0x70] sm:$0xff] }
 0x9fc   :  { %3927 = vmatmul.msk.f32.gmra.mxu0 %vm6272_vm1, %v2543_v17  ;;  %vm6314_vm1 = vmmov %vm6305_vm2  ;;  %v2761_v17 = vld [vmem:[%s6041_s7 + $0x78] sm:$0xff] }
 0xa04   :  { %3928 = vmatmul.msk.f32.gmra.mxu0 %vm6304_vm13, %v2544_v29  ;;  %vm6315_vm13 = vmmov %vm6314_vm1 }
 0xa49   :  { %v2588_v43 = vpop.f32.mrf.mxu0 }
 0xa4a   :  { %3935 = vmatmul.msk.f32.vlgmr.msrb.gmra.mxu3 %vm6305_vm2, %v2588_v43  ;;  %vm6316_vm2 = vmmov %vm6314_vm1 }
 0xa4b   :  { %3961 = vmatpush.msk.msrb.mxu3 %vm5120_vm6, %v6158_v14 }
 0xa51   :  { %v2591_v52 = vpop.f32.mrf.mxu0 }
 0xa52   :  { %3936 = vmatmul.msk.f32.gmra.mxu3 %vm6306_vm3, %v2591_v52  ;;  %vm6317_vm3 = vmmov %vm6314_vm1 }
 0xa59   :  { %v2594_v53 = vpop.f32.mrf.mxu0 }
 0xa5a   :  { %3931 = vmatmul.msk.f32.vlgmr.msra.gmra.mxu2 %vm6307_vm5, %v2594_v53  ;;  %vm6318_vm5 = vmmov %vm6314_vm1 }
 0xa61   :  { %v2597_v31 = vpop.f32.mrf.mxu0 }
 0xa62   :  { %3932 = vmatmul.msk.f32.gmra.mxu2 %vm6308_vm9, %v2597_v31  ;;  %vm6319_vm9 = vmmov %vm6314_vm1 }
 0xa69   :  { %v2600_v24 = vpop.f32.mrf.mxu0 }
 0xa6a   :  { %3939 = vmatmul.msk.f32.vlgmr.msrb.gmra.mxu2 %vm6309_vm11, %v2600_v24  ;;  %vm6320_vm11 = vmmov %vm6314_vm1 }
 0xa71   :  { %v2603_v54 = vpop.f32.mrf.mxu0 }
 0xa72   :  { %3940 = vmatmul.msk.f32.gmra.mxu2 %vm6310_vm8, %v2603_v54  ;;  %vm6321_vm8 = vmmov %vm6314_vm1 }
 0xa79   :  { %v2606_v22 = vpop.f32.mrf.mxu0 }
 0xa7a   :  { %3943 = vmatmul.msk.f32.vlgmr.msra.gmra.mxu3 %vm6311_vm10, %v2606_v22  ;;  %vm6322_vm10 = vmmov %vm6314_vm1 }
 0xa7b   :  { %3976 = vmatpush.msk.msra.mxu3 %vm6201_vm4, %v6158_v14 }
 0xa81   :  { %v2609_v42 = vpop.f32.mrf.mxu0 }
 0xa82   :  { %3944 = vmatmul.msk.f32.gmra.mxu3 %vm6312_vm7, %v2609_v42  ;;  %vm6323_vm7 = vmmov %vm6314_vm1 }
 0xacd   :  { %v2664_v4 = vpop.f32.mrf.mxu3 }
 0xad5   :  { %v2667_v45 = vpop.f32.mrf.mxu3 }
 0xadd   :  { %v2635_v39 = vpop.f32.mrf.mxu2 }
 0xade   :  { %v2665_v35 = vadd.f32 %v2664_v4, %v2635_v39 }
 0xae5   :  { %v2638_v8 = vpop.f32.mrf.mxu2 }
 0xae6   :  { %v2668_v62 = vadd.f32 %v2667_v45, %v2638_v8 }
 0xaed   :  { %v2693_v9 = vpop.f32.mrf.mxu2 }
 0xaee   :  { %v2699_v7 = vadd.f32 %v2693_v9, %v2665_v35 }
 0xaf5   :  { %v2696_v36 = vpop.f32.mrf.mxu2 }
 0xaf6   :  { %v2700_v18 = vadd.f32 %v2696_v36, %v2668_v62 }
 0xafd   :  { %v2724_v25 = vpop.f32.mrf.mxu3 }
 0xafe   :  { %v2730_v33 = vadd.f32 %v2724_v25, %v2699_v7 }
 0xb00   :  { %v2742_v61 = vadd.f32 %v5613_v34, %v2730_v33  ;;  %v2748_v34 = vld [vmem:[%s6041_s7 + $0x10] sm:$0xff] }
 0xb02   :  { %v2744_v15 = vmax.f32 %v2742_v61, 0.0 }
 0xb05   :  { %v2727_v38 = vpop.f32.mrf.mxu3 }
 0xb06   :  { %v2731_v40 = vadd.f32 %v2727_v38, %v2700_v18 }
 0xb08   :  { %v2743_v20 = vadd.f32 %v2740_v41, %v2731_v40 }
 0xb0a   :  { %v2745_v21 = vmax.f32 %v2743_v20, 0.0 }
 0xb0c   :  { %2828 = vmatpush.msra.mxu2 %v2745_v21 }
 0xb0e   :  { %2829 = vmatpush.msra.mxu2 %v2744_v15 }
 0xb0f   :  { %3945 = vmatmul.msk.f32.vlgmr.msra.gmra.mxu2 %vm6313_vm14, %v2746_v60  ;;  %vm6324_vm14 = vmmov %vm6314_vm1 }
 0xb17   :  { %3946 = vmatmul.msk.f32.gmra.mxu2 %vm6314_vm1, %v2747_v49  ;;  %v3069_v49 = vpop.permute.xlu0 %3068 }
 0xb1f   :  { %3947 = vmatmul.msk.f32.gmra.mxu2 %vm6315_vm13, %v2748_v34  ;;  %vm6325_vm13 = vmmov %vm6314_vm1 }
 0xb27   :  { %3948 = vmatmul.msk.f32.gmra.mxu2 %vm6316_vm2, %v2749_v23  ;;  %vm6326_vm2 = vmmov %vm6314_vm1 }
 0xb2f   :  { %3949 = vmatmul.msk.f32.gmra.mxu2 %vm6317_vm3, %v2750_v26  ;;  %vm6327_vm3 = vmmov %vm6314_vm1 }
 0xb37   :  { %3950 = vmatmul.msk.f32.gmra.mxu2 %vm6318_vm5, %v2751_v58  ;;  %vm6328_vm5 = vcmask 64512  }
 0xb3f   :  { %3951 = vmatmul.msk.f32.gmra.mxu2 %vm6319_vm9, %v2752_v59  ;;  %vm6329_vm9 = vmmov %vm6328_vm5 }
 0xb47   :  { %3952 = vmatmul.msk.f32.gmra.mxu2 %vm6320_vm11, %v2753_v19  ;;  %vm6330_vm11 = vmmov %vm6328_vm5 }
 0xb4f   :  { %3953 = vmatmul.msk.f32.gmra.mxu2 %vm6321_vm8, %v2754_v56  ;;  %vm6331_vm8 = vmmov %vm6328_vm5 }
 0xb57   :  { %3954 = vmatmul.msk.f32.gmra.mxu2 %vm6322_vm10, %v2755_v63  ;;  %vm6332_vm10 = vmmov %vm6328_vm5 }
 0xb5f   :  { %3955 = vmatmul.msk.f32.gmra.mxu2 %vm6323_vm7, %v2756_v6  ;;  %vm6333_vm7 = vcmp.eq.s32.totalorder %v4337_v30, %v5260_v51 }
 0xb67   :  { %3956 = vmatmul.msk.f32.gmra.mxu2 %vm6324_vm14, %v2757_v0  ;;  %vm6334_vm14 = vmmov %vm6328_vm5 }
 0xb6f   :  { %3957 = vmatmul.msk.f32.gmra.mxu2 %vm6314_vm1, %v2758_v47  ;;  %vm6335_vm1 = vmmov %vm6328_vm5 }
 0xb77   :  { %3958 = vmatmul.msk.f32.gmra.mxu2 %vm6325_vm13, %v2759_v46  ;;  %vm6336_vm13 = vmmov %vm6335_vm1 }
 0xb7f   :  { %3959 = vmatmul.msk.f32.gmra.mxu2 %vm6326_vm2, %v2760_v32  ;;  %vm6337_vm2 = vmmov %vm6335_vm1 }
 0xb87   :  { %3960 = vmatmul.msk.f32.gmra.mxu2 %vm6327_vm3, %v2761_v17  ;;  %vm6338_vm3 = vcmp.eq.s32.totalorder %v4337_v30, %v5313_v44 }
 0xb92   :  { %v2831_v29 = vpop.f32.mrf.mxu2 }
 0xb93   :  { %3967 = vmatmul.msk.f32.vlgmr.msrb.gmra.mxu0 %vm6328_vm5, %v2831_v29  ;;  %vm6339_vm5 = vmmov %vm6335_vm1  ;;  %v3064_v29 = vpop.permute.xlu1 %3063 }
 0xb9a   :  { %v2834_v43 = vpop.f32.mrf.mxu2 }
 0xb9b   :  { %3968 = vmatmul.msk.f32.gmra.mxu0 %vm6329_vm9, %v2834_v43  ;;  %vm6340_vm9 = vmmov %vm6335_vm1 }
 0xba2   :  { %v2837_v52 = vpop.f32.mrf.mxu2 }
 0xba3   :  { %3969 = vmatmul.msk.f32.gmra.mxu0 %vm6330_vm11, %v2837_v52  ;;  %vm6341_vm11 = vmmov %vm6335_vm1 }
 0xbaa   :  { %v2840_v53 = vpop.f32.mrf.mxu2 }
 0xbab   :  { %3970 = vmatmul.msk.f32.gmra.mxu0 %vm6331_vm8, %v2840_v53  ;;  %vm6342_vm8 = vmmov %vm6335_vm1 }
 0xbb2   :  { %v2843_v31 = vpop.f32.mrf.mxu2 }
 0xbb3   :  { %3962 = vmatmul.msk.f32.vlgmr.msrb.gmra.mxu3 %vm6332_vm10, %v2843_v31  ;;  %vm6343_vm10 = vcmp.eq.s32.totalorder %v4337_v30, %v5329_v3 }
 0xbb4   :  { %4003 = vmatpush.msk.msrb.mxu3 %vm6333_vm7, %v6158_v14  ;;  %vm6344_vm7 = vmmov %vm6335_vm1 }
 0xbb6   :  { %4004 = vmatpush.msk.msrb.mxu3 %vm6298_vm12, %v6158_v14 }
 0xbba   :  { %v2846_v24 = vpop.f32.mrf.mxu2 }
 0xbbb   :  { %3963 = vmatmul.msk.f32.gmra.mxu3 %vm6334_vm14, %v2846_v24  ;;  %vm6345_vm14 = vmmov %vm6335_vm1 }
 0xbc2   :  { %v2849_v54 = vpop.f32.mrf.mxu2 }
 0xbc3   :  { %3964 = vmatmul.msk.f32.gmra.mxu3 %vm6335_vm1, %v2849_v54  ;;  %v3054_v54 = vpop.permute.xlu0 %3053 }
 0xbca   :  { %v2852_v22 = vpop.f32.mrf.mxu2 }
 0xbcb   :  { %3965 = vmatmul.msk.f32.gmra.mxu3 %vm6336_vm13, %v2852_v22  ;;  %vm6346_vm13 = vcmask 261120  }
 0xbd2   :  { %v2855_v42 = vpop.f32.mrf.mxu2 }
 0xbd3   :  { %3972 = vmatmul.msk.f32.vlgmr.msrb.gmra.mxu1 %vm6337_vm2, %v2855_v42  ;;  %vm6347_vm2 = vmmov %vm6346_vm13 }
 0xbd4   :  { %4009 = vmatpush.msk.msrb.mxu1 %vm6338_vm3, %v6158_v14  ;;  %vm6348_vm3 = vmmov %vm6347_vm2 }
 0xbd6   :  { %4010 = vmatpush.msk.msrb.mxu1 %vm5132_vm15, %v6158_v14 }
 0xbda   :  { %v2858_v39 = vpop.f32.mrf.mxu2 }
 0xbdb   :  { %3973 = vmatmul.msk.f32.gmra.mxu1 %vm6339_vm5, %v2858_v39  ;;  %vm6349_vm5 = vmmov %vm6347_vm2 }
 0xbe2   :  { %v2861_v4 = vpop.f32.mrf.mxu2 }
 0xbe3   :  { %3974 = vmatmul.msk.f32.gmra.mxu1 %vm6340_vm9, %v2861_v4  ;;  %vm6350_vm9 = vmmov %vm6347_vm2 }
 0xbea   :  { %v2864_v8 = vpop.f32.mrf.mxu2 }
 0xbeb   :  { %3975 = vmatmul.msk.f32.gmra.mxu1 %vm6341_vm11, %v2864_v8  ;;  %v3079_v8 = vld [vmem:[%s6043_s9] sm:$0xff]  ;;  %vm6351_vm11 = vmmov %vm6347_vm2 }
 0xbf2   :  { %v2867_v45 = vpop.f32.mrf.mxu2 }
 0xbf3   :  { %3977 = vmatmul.msk.f32.vlgmr.msra.gmra.mxu3 %vm6342_vm8, %v2867_v45  ;;  %v3081_v45 = vld [vmem:[%s6043_s9 + $0x10] sm:$0xff]  ;;  %vm6352_vm8 = vmmov %vm6347_vm2 }
 0xbf4   :  { %4015 = vmatpush.msk.msra.mxu3 %vm6343_vm10, %v6158_v14  ;;  %vm6353_vm10 = vmmov %vm6347_vm2 }
 0xbf6   :  { %4016 = vmatpush.msk.msra.mxu3 %vm6201_vm4, %v6158_v14 }
 0xbfa   :  { %v2870_v9 = vpop.f32.mrf.mxu2 }
 0xbfb   :  { %3978 = vmatmul.msk.f32.gmra.mxu3 %vm6344_vm7, %v2870_v9  ;;  %v3082_v9 = vld [vmem:[%s6043_s9 + $0x18] sm:$0xff]  ;;  %vm6354_vm7 = vmmov %vm6347_vm2 }
 0xc02   :  { %v2873_v25 = vpop.f32.mrf.mxu2 }
 0xc03   :  { %3979 = vmatmul.msk.f32.gmra.mxu3 %vm6345_vm14, %v2873_v25  ;;  %v3083_v25 = vld [vmem:[%s6043_s9 + $0x20] sm:$0xff]  ;;  %vm6355_vm14 = vmmov %vm6347_vm2 }
 0xc0a   :  { %v2876_v35 = vpop.f32.mrf.mxu2 }
 0xc0b   :  { %3980 = vmatmul.msk.f32.gmra.mxu3 %vm6335_vm1, %v2876_v35  ;;  %v3084_v35 = vld [vmem:[%s6043_s9 + $0x28] sm:$0xff]  ;;  %vm6356_vm1 = vmmov %vm6347_vm2 }
 0xc10   :  { %v2949_v18 = vpop.f32.mrf.mxu0 }
 0xc18   :  { %v2952_v40 = vpop.f32.mrf.mxu0 }
 0xc20   :  { %v2955_v21 = vpop.f32.mrf.mxu0 }
 0xc28   :  { %v2958_v23 = vpop.f32.mrf.mxu0 }
 0xc36   :  { %v2908_v36 = vpop.f32.mrf.mxu3 }
 0xc37   :  { %v2950_v56 = vadd.f32 %v2949_v18, %v2908_v36  ;;  %v3085_v36 = vld [vmem:[%s6043_s9 + $0x30] sm:$0xff]  ;;  %v3088_v18 = vld [vmem:[%s6043_s9 + $0x48] sm:$0xff] }
 0xc3e   :  { %v2911_v62 = vpop.f32.mrf.mxu3 }
 0xc3f   :  { %v2953_v58 = vadd.f32 %v2952_v40, %v2911_v62  ;;  %v3086_v62 = vld [vmem:[%s6043_s9 + $0x38] sm:$0xff]  ;;  %v3091_v40 = vld [vmem:[%s6043_s9 + $0x60] sm:$0xff] }
 0xc46   :  { %v2914_v7 = vpop.f32.mrf.mxu3 }
 0xc47   :  { %v2956_v34 = vadd.f32 %v2955_v21, %v2914_v7  ;;  %v3087_v7 = vld [vmem:[%s6043_s9 + $0x40] sm:$0xff] }
 0xc4e   :  { %v2917_v38 = vpop.f32.mrf.mxu3 }
 0xc4f   :  { %v2959_v59 = vadd.f32 %v2958_v23, %v2917_v38  ;;  %v3090_v38 = vld [vmem:[%s6043_s9 + $0x58] sm:$0xff] }
 0xc50   :  { %v2990_v33 = vpop.f32.mrf.mxu1 }
 0xc51   :  { %v3002_v46 = vadd.f32 %v2990_v33, %v2950_v56  ;;  %v3089_v33 = vld [vmem:[%s6043_s9 + $0x50] sm:$0xff] }
 0xc58   :  { %v2993_v41 = vpop.f32.mrf.mxu1 }
 0xc59   :  { %v3003_v63 = vadd.f32 %v2993_v41, %v2953_v58  ;;  %v3092_v41 = vld [vmem:[%s6043_s9 + $0x68] sm:$0xff] }
 0xc60   :  { %v2996_v15 = vpop.f32.mrf.mxu1 }
 0xc61   :  { %v3004_v19 = vadd.f32 %v2996_v15, %v2956_v34 }
 0xc68   :  { %v2999_v26 = vpop.f32.mrf.mxu1 }
 0xc69   :  { %v3005_v6 = vadd.f32 %v2999_v26, %v2959_v59 }
 0xc76   :  { %v3035_v61 = vpop.f32.mrf.mxu3 }
 0xc77   :  { %v3047_v43 = vadd.f32 %v3035_v61, %v3002_v46  ;;  %v3093_v61 = vld [vmem:[%s6043_s9 + $0x70] sm:$0xff] }
 0xc79   :  { %v3071_v22 = vadd.f32 %v3054_v54, %v3047_v43  ;;  %v3402_v43 = vpop.permute.xlu1 %3401 }
 0xc7b   :  { %v3075_v4 = vmax.f32 %v3071_v22, 0.0 }
 0xc7e   :  { %v3038_v20 = vpop.f32.mrf.mxu3 }
 0xc7f   :  { %v3048_v32 = vadd.f32 %v3038_v20, %v3003_v63  ;;  %v3094_v20 = vld [vmem:[%s6043_s9 + $0x78] sm:$0xff] }
 0xc81   :  { %v3072_v31 = vadd.f32 %v5615_v48, %v3048_v32  ;;  %v3080_v48 = vld [vmem:[%s6043_s9 + $0x8] sm:$0xff] }
 0xc83   :  { %v3076_v39 = vmax.f32 %v3072_v31, 0.0 }
 0xc86   :  { %v3041_v60 = vpop.f32.mrf.mxu3 }
 0xc87   :  { %v3049_v0 = vadd.f32 %v3041_v60, %v3004_v19 }
 0xc89   :  { %v3073_v52 = vadd.f32 %v3064_v29, %v3049_v0 }
 0xc8b   :  { %v3077_v42 = vmax.f32 %v3073_v52, 0.0 }
 0xc8e   :  { %v3044_v47 = vpop.f32.mrf.mxu3 }
 0xc8f   :  { %v3050_v17 = vadd.f32 %v3044_v47, %v3005_v6 }
 0xc91   :  { %v3074_v53 = vadd.f32 %v3069_v49, %v3050_v17 }
 0xc93   :  { %v3078_v24 = vmax.f32 %v3074_v53, 0.0 }
 0xc95   :  { %3159 = vmatpush.msra.mxu0 %v3078_v24 }
 0xc97   :  { %3160 = vmatpush.msra.mxu0 %v3077_v42 }
 0xc99   :  { %3161 = vmatpush.msra.mxu0 %v3076_v39 }
 0xc9b   :  { %3162 = vmatpush.msra.mxu0 %v3075_v4 }
 0xc9c   :  { %3981 = vmatmul.msk.f32.vlgmr.msra.gmra.mxu0 %vm6346_vm13, %v3079_v8  ;;  %vm6357_vm13 = vmmov %vm6356_vm1 }
 0xca4   :  { %3982 = vmatmul.msk.f32.gmra.mxu0 %vm6347_vm2, %v3080_v48  ;;  %vm6358_vm2 = vmmov %vm6356_vm1 }
 0xcac   :  { %3983 = vmatmul.msk.f32.gmra.mxu0 %vm6348_vm3, %v3081_v45  ;;  %vm6359_vm3 = vmmov %vm6356_vm1 }
 0xcb4   :  { %3984 = vmatmul.msk.f32.gmra.mxu0 %vm6349_vm5, %v3082_v9  ;;  %vm6360_vm5 = vmmov %vm6356_vm1 }
 0xcbc   :  { %3985 = vmatmul.msk.f32.gmra.mxu0 %vm6350_vm9, %v3083_v25  ;;  %vm6361_vm9 = vmmov %vm6356_vm1 }
 0xcc4   :  { %3986 = vmatmul.msk.f32.gmra.mxu0 %vm6351_vm11, %v3084_v35  ;;  %vm6362_vm11 = vcmask 130048  }
 0xccc   :  { %3987 = vmatmul.msk.f32.gmra.mxu0 %vm6352_vm8, %v3085_v36  ;;  %vm6363_vm8 = vcmp.eq.s32.totalorder %v4337_v30, %v5415_v27  ;;  %v3392_v36 = vpop.permute.xlu0 %3391 }
 0xcd4   :  { %3988 = vmatmul.msk.f32.gmra.mxu0 %vm6353_vm10, %v3086_v62  ;;  %vm6364_vm10 = vcmp.eq.s32.totalorder %v4337_v30, %v5494_v12 }
 0xcdc   :  { %3989 = vmatmul.msk.f32.gmra.mxu0 %vm6354_vm7, %v3087_v7  ;;  %vm6365_vm7 = vcmp.eq.s32.totalorder %v4337_v30, %v5313_v44 }
 0xce4   :  { %3990 = vmatmul.msk.f32.gmra.mxu0 %vm6355_vm14, %v3088_v18  ;;  %vm6366_vm14 = vmmov %vm6362_vm11  ;;  %v3387_v18 = vpop.permute.xlu1 %3386 }
 0xcec   :  { %3991 = vmatmul.msk.f32.gmra.mxu0 %vm6356_vm1, %v3089_v33  ;;  %vm6367_vm1 = vmmov %vm6362_vm11 }
 0xcf4   :  { %3992 = vmatmul.msk.f32.gmra.mxu0 %vm6357_vm13, %v3090_v38  ;;  %vm6368_vm13 = vmmov %vm6367_vm1 }
 0xcfc   :  { %3993 = vmatmul.msk.f32.gmra.mxu0 %vm6358_vm2, %v3091_v40  ;;  %vm6369_vm2 = vmmov %vm6367_vm1 }
 0xd04   :  { %3994 = vmatmul.msk.f32.gmra.mxu0 %vm6359_vm3, %v3092_v41  ;;  %vm6370_vm3 = vcmp.eq.s32.totalorder %v4337_v30, %v5399_v5 }
 0xd0c   :  { %3995 = vmatmul.msk.f32.gmra.mxu0 %vm6360_vm5, %v3093_v61  ;;  %vm6372_vm5 = vcmp.eq.s32.totalorder %v4337_v30, %v5257_v37  ;;  %v3412_v61 = vld [vmem:[%s6045_s11] sm:$0xf]  ;;  %s4101_s11 = smov [#allocation3]  }
 0xd0d   :  { %s3545_s2 = sshll.u32 %s4101_s11, 4  ;;  %s3546_s2 = int_to_ptr.vmem [resolvable:$true] %s3545_s2 }
 0xd14   :  { %3996 = vmatmul.msk.f32.gmra.mxu0 %vm6361_vm9, %v3094_v20  ;;  %vm6373_vm9 = vmmov %vm6367_vm1 }
 0xd19   :  { %v3164_v21 = vpop.f32.mrf.mxu0 }
 0xd1a   :  { %4005 = vmatmul.msk.f32.vlgmr.msrb.gmra.mxu3 %vm6362_vm11, %v3164_v21  ;;  %vm6374_vm11 = vmmov %vm6367_vm1 }
 0xd1b   :  { %4032 = vmatpush.msk.msrb.mxu3 %vm6363_vm8, %v6158_v14  ;;  %vm6375_vm8 = vmmov %vm6367_vm1 }
 0xd1d   :  { %4033 = vmatpush.msk.msrb.mxu3 %vm6364_vm10, %v6158_v14  ;;  %vm6376_vm10 = vmmov %vm6367_vm1 }
 0xd1f   :  { %4034 = vmatpush.msk.msrb.mxu3 %vm6365_vm7, %v6158_v14  ;;  %vm6377_vm7 = vcmp.eq.s32.totalorder %v4337_v30, %v5510_v1 }
 0xd21   :  { %v3167_v15 = vpop.f32.mrf.mxu0  ;;  %4035 = vmatpush.msk.msrb.mxu3 %vm5132_vm15, %v6158_v14  ;;  %vm6371_vm15 = vcmp.eq.s32.totalorder %v4337_v30, %v5402_v11 }
 0xd22   :  { %4006 = vmatmul.msk.f32.gmra.mxu3 %vm6366_vm14, %v3167_v15  ;;  %vm6379_vm14 = vcmp.eq.s32.totalorder %v4337_v30, %v5329_v3 }
 0xd29   :  { %v3170_v60 = vpop.f32.mrf.mxu0 }
 0xd2a   :  { %4007 = vmatmul.msk.f32.gmra.mxu3 %vm6367_vm1, %v3170_v60 }
 0xd31   :  { %v3173_v27 = vpop.f32.mrf.mxu0 }
 0xd32   :  { %4008 = vmatmul.msk.f32.gmra.mxu3 %vm6368_vm13, %v3173_v27  ;;  %vm6380_vm13 = vmmov %vm6367_vm1 }
 0xd39   :  { %v3176_v12 = vpop.f32.mrf.mxu0 }
 0xd3a   :  { %3999 = vmatmul.msk.f32.vlgmr.msra.gmra.mxu1 %vm6369_vm2, %v3176_v12  ;;  %vm6381_vm2 = vmmov %vm6367_vm1 }
 0xd3b   :  { %4022 = vmatpush.msk.msra.mxu1 %vm6370_vm3, %v6158_v14  ;;  %vm6382_vm3 = vmmov %vm6367_vm1 }
 0xd3d   :  { %4023 = vmatpush.msk.msra.mxu1 %vm6371_vm15, %v6158_v14  ;;  %vm6383_vm15 = vmmov %vm6367_vm1 }
 0xd3f   :  { %4024 = vmatpush.msk.msra.mxu1 %vm6372_vm5, %v6158_v14  ;;  %vm6384_vm5 = vmmov %vm6367_vm1 }
 0xd41   :  { %v3179_v10 = vpop.f32.mrf.mxu0  ;;  %4025 = vmatpush.msk.msra.mxu1 %vm5120_vm6, %v6158_v14  ;;  %vm6378_vm6 = vcmp.eq.s32.totalorder %v4337_v30, %v5513_v2 }
 0xd42   :  { %4000 = vmatmul.msk.f32.gmra.mxu1 %vm6373_vm9, %v3179_v10  ;;  %vm6385_vm9 = vmmov %vm6367_vm1 }
 0xd49   :  { %v3182_v44 = vpop.f32.mrf.mxu0 }
 0xd4a   :  { %4001 = vmatmul.msk.f32.gmra.mxu1 %vm6374_vm11, %v3182_v44  ;;  %vm6387_vm11 = vcmp.eq.s32.totalorder %v4337_v30, %v5430_v50 }
 0xd51   :  { %v3185_v5 = vpop.f32.mrf.mxu0 }
 0xd52   :  { %4002 = vmatmul.msk.f32.gmra.mxu1 %vm6375_vm8, %v3185_v5  ;;  %vm6388_vm8 = vcmp.eq.s32.totalorder %v4337_v30, %v5436_v55 }
 0xd59   :  { %v3188_v11 = vpop.f32.mrf.mxu0 }
 0xd5a   :  { %4011 = vmatmul.msk.f32.vlgmr.msrb.gmra.mxu1 %vm6376_vm10, %v3188_v11  ;;  %vm6389_vm10 = vcmp.eq.s32.totalorder %v4337_v30, %v5260_v51  ;;  %v3534_v51 = vpop.permute.xlu0 %3533 }
 0xd5b   :  { %4037 = vmatpush.msk.msrb.mxu1 %vm6377_vm7, %v6158_v14 }
 0xd5d   :  { %4038 = vmatpush.msk.msrb.mxu1 %vm6378_vm6, %v6158_v14 }
 0xd5f   :  { %4039 = vmatpush.msk.msrb.mxu1 %vm6379_vm14, %v6158_v14 }
 0xd61   :  { %v3191_v16 = vpop.f32.mrf.mxu0  ;;  %4040 = vmatpush.msk.msrb.mxu1 %vm6201_vm4, %v6158_v14  ;;  %vm6386_vm4 = vcmask 261120  }
 0xd62   :  { %4012 = vmatmul.msk.f32.gmra.mxu1 %vm6367_vm1, %v3191_v16  ;;  %vm6390_vm7 = vmmov %vm6386_vm4 }
 0xd63   :  { %vm6391_vm6 = vmmov %vm6386_vm4 }
 0xd64   :  { %vm6392_vm14 = vmmov %vm6386_vm4 }
 0xd65   :  { %vm6393_vm1 = vmmov %vm6386_vm4 }
 0xd69   :  { %v3194_v37 = vpop.f32.mrf.mxu0 }
 0xd6a   :  { %4013 = vmatmul.msk.f32.gmra.mxu1 %vm6380_vm13, %v3194_v37 }
 0xd71   :  { %v3197_v1 = vpop.f32.mrf.mxu0 }
 0xd72   :  { %4014 = vmatmul.msk.f32.gmra.mxu1 %vm6381_vm2, %v3197_v1 }
 0xd79   :  { %v3200_v2 = vpop.f32.mrf.mxu0 }
 0xd7a   :  { %4017 = vmatmul.msk.f32.vlgmr.msra.gmra.mxu3 %vm6382_vm3, %v3200_v2 }
 0xd81   :  { %v3203_v49 = vpop.f32.mrf.mxu0 }
 0xd82   :  { %4018 = vmatmul.msk.f32.gmra.mxu3 %vm6383_vm15, %v3203_v49 }
 0xd89   :  { %v3206_v3 = vpop.f32.mrf.mxu0 }
 0xd8a   :  { %4019 = vmatmul.msk.f32.gmra.mxu3 %vm6384_vm5, %v3206_v3 }
 0xd91   :  { %v3209_v34 = vpop.f32.mrf.mxu0 }
 0xd92   :  { %4020 = vmatmul.msk.f32.gmra.mxu3 %vm6385_vm9, %v3209_v34 }
 0xd9d   :  { %v3282_v26 = vpop.f32.mrf.mxu3 }
 0xda5   :  { %v3285_v59 = vpop.f32.mrf.mxu3 }
 0xdad   :  { %v3288_v56 = vpop.f32.mrf.mxu3 }
 0xdb5   :  { %v3291_v6 = vpop.f32.mrf.mxu3 }
 0xdb7   :  { %v3241_v57 = vpop.f32.mrf.mxu1 }
 0xdb8   :  { %v3283_v54 = vadd.f32 %v3282_v26, %v3241_v57 }
 0xdbf   :  { %v3244_v23 = vpop.f32.mrf.mxu1 }
 0xdc0   :  { %v3286_v53 = vadd.f32 %v3285_v59, %v3244_v23 }
 0xdc7   :  { %v3247_v58 = vpop.f32.mrf.mxu1 }
 0xdc8   :  { %v3289_v29 = vadd.f32 %v3288_v56, %v3247_v58 }
 0xdcf   :  { %v3250_v19 = vpop.f32.mrf.mxu1 }
 0xdd0   :  { %v3292_v31 = vadd.f32 %v3291_v6, %v3250_v19 }
 0xdd7   :  { %v3323_v63 = vpop.f32.mrf.mxu1 }
 0xdd8   :  { %v3335_v8 = vadd.f32 %v3323_v63, %v3283_v54 }
 0xddf   :  { %v3326_v0 = vpop.f32.mrf.mxu1 }
 0xde0   :  { %v3336_v22 = vadd.f32 %v3326_v0, %v3286_v53 }
 0xde7   :  { %v3329_v32 = vpop.f32.mrf.mxu1 }
 0xde8   :  { %v3337_v24 = vadd.f32 %v3329_v32, %v3289_v29 }
 0xdef   :  { %v3332_v52 = vpop.f32.mrf.mxu1 }
 0xdf0   :  { %v3338_v42 = vadd.f32 %v3332_v52, %v3292_v31 }
 0xdfd   :  { %v3368_v47 = vpop.f32.mrf.mxu3 }
 0xdfe   :  { %v3380_v9 = vadd.f32 %v3368_v47, %v3335_v8 }
 0xe00   :  { %v3404_v33 = vadd.f32 %v3387_v18, %v3380_v9 }
 0xe02   :  { %v3408_v41 = vmax.f32 %v3404_v33, 0.0 }
 0xe05   :  { %v3371_v46 = vpop.f32.mrf.mxu3 }
 0xe06   :  { %v3381_v48 = vadd.f32 %v3371_v46, %v3336_v22 }
 0xe08   :  { %v3405_v62 = vadd.f32 %v3392_v36, %v3381_v48 }
 0xe0a   :  { %v3409_v40 = vmax.f32 %v3405_v62, 0.0 }
 0xe0d   :  { %v3374_v17 = vpop.f32.mrf.mxu3 }
 0xe0e   :  { %v3382_v39 = vadd.f32 %v3374_v17, %v3337_v24 }
 0xe10   :  { %v3406_v25 = vadd.f32 %v5617_v13, %v3382_v39 }
 0xe12   :  { %v3410_v38 = vmax.f32 %v3406_v25, 0.0 }
 0xe15   :  { %v3377_v4 = vpop.f32.mrf.mxu3 }
 0xe16   :  { %v3383_v45 = vadd.f32 %v3377_v4, %v3338_v42 }
 0xe18   :  { %v3407_v35 = vadd.f32 %v3402_v43, %v3383_v45 }
 0xe1a   :  { %v3411_v7 = vmax.f32 %v3407_v35, 0.0 }
 0xe1c   :  { %3429 = vmatpush.msrb.mxu2 %v3411_v7 }
 0xe1e   :  { %3430 = vmatpush.msrb.mxu2 %v3410_v38 }
 0xe20   :  { %3431 = vmatpush.msrb.mxu2 %v3409_v40 }
 0xe22   :  { %3432 = vmatpush.msrb.mxu2 %v3408_v41 }
 0xe23   :  { %4021 = vmatmul.msk.f32.vlgmr.msrb.gmra.mxu2 %vm6386_vm4, %v3412_v61 }
 0xe24   :  { %4027 = vmatpush.msk.msra.mxu2 %vm6387_vm11, %v6158_v14 }
 0xe26   :  { %4028 = vmatpush.msk.msra.mxu2 %vm6388_vm8, %v6158_v14 }
 0xe28   :  { %4029 = vmatpush.msk.msra.mxu2 %vm6389_vm10, %v6158_v14 }
 0xe2a   :  { %4030 = vmatpush.msk.msra.mxu2 %vm6298_vm12, %v6158_v14  ;;  %v3536_v14 = vperm.slane %v3534_v51, 0 }
 0xea6   :  { %v3434_v13 = vpop.f32.mrf.mxu2 }
 0xea7   :  { %v3438_v20 = vrot.slane %v3434_v13, 1  ;;  %v3483_v21 = vrot.slane %v3434_v13, 2  ;;  %4031 = vmatmul.msk.f32.vlgmr.msra.gmra.mxu2 %vm6390_vm7, %v3434_v13  ;;  %v3507_v50 = vrot.slane %v3434_v13, 3 }
 0xea9   :  { %4026 = vmatmul.msk.f32.vlgmr.msra.gmra.mxu1 %vm6391_vm6, %v3438_v20  ;;  %4036 = vmatmul.msk.f32.vlgmr.msrb.gmra.mxu3 %vm6392_vm14, %v3483_v21 }
 0xeb1   :  { %4041 = vmatmul.msk.f32.vlgmr.msrb.gmra.mxu1 %vm6393_vm1, %v3507_v50 }
 0xf26   :  { %v3458_v55 = vpop.f32.mrf.mxu1 }
 0xf2a   :  { %v3480_v15 = vpop.f32.mrf.mxu2 }
 0xf2b   :  { %v3481_v30 = vadd.f32 %v3480_v15, %v3458_v55 }
 0xf2c   :  { %v3503_v60 = vpop.f32.mrf.mxu3 }
 0xf2d   :  { %v3506_v27 = vadd.f32 %v3503_v60, %v3481_v30 }
 0xf2e   :  { %v3527_v28 = vpop.f32.mrf.mxu1 }
 0xf2f   :  { %v3530_v12 = vadd.f32 %v3527_v28, %v3506_v27 }
 0xf31   :  { %v3537_v10 = vadd.f32 %v3536_v14, %v3530_v12 }
 0xf33   :  { %4070 = vtanh.f32 %v3537_v10 }
 0xf39   :  { %v4071_v44 = vpop.eup %4070 }
 0xf3a   :  { %3540 = vst.msk [vmem:[#allocation3 + $0x1] sm:$0x1] %vm1881_vm0, %v4071_v44 }
 0xf3b   :  { %3553 = dma.vmem_to_hbm [thread:$0]  %s3546_s2, 32, %s3548_s21, [#allocation4], %s4102_s22, %s4102_s22, %s4103_s23  }
 0xf3c   :  { %4097 = dma.done.wait [#allocation4], 32  }
 0xf3d   :  { %4098 = vsyncadd [#allocation4], 4294967264 }
 0xf3e   :  { %3558 = vsyncpa [#allocation4], 1 }

</bundles_post_ra>
